<compile_context>
chip_gen: v7x
topology: tpu7x:2x2x1
jax: 0.10.0
libtpu: 0.0.40
codegen_flags: <defaults>
</compile_context>

<pallas_src>
import jax
import jax.numpy as jnp
from jax.experimental import pallas as pl
from jax.experimental.pallas import tpu as pltpu

FEATURE_DIM = 64
OUTPUT_DIM = 128
HID1 = 128
HID2 = 256
ATT_HID = 64
BN_EPS = 1e-5
VMEM_LIMIT = 48 * 1024 * 1024   # per-call scoped VMEM; safe on v7x (64 MiB/TC)


# --------------------------- in-kernel helpers --------------------------------

def _zero_border(pref, H, W):
    """Zero only the 1-wide padding ring the 3x3 taps read (no full memset)."""
    n, hp, wp, c = pref.shape
    z_row = jnp.zeros((n, 1, wp, c), pref.dtype)
    z_col = jnp.zeros((n, hp, 1, c), pref.dtype)
    pref[:, 0:1, :, :] = z_row
    pref[:, H + 1:H + 2, :, :] = z_row
    pref[:, :, 0:1, :] = z_col
    pref[:, :, W + 1:W + 2, :] = z_col


def _store_padded(pref, val4d, H, W):
    _zero_border(pref, H, W)
    pref[:, 1:H + 1, 1:W + 1, :] = val4d.astype(pref.dtype)


def _conv3x3(pref, wref, H, W, cout):
    """3x3 'SAME' conv as 3 accumulating deep-K MXU matmuls (one per dx tap
    column). The dy taps are H-axis slices above the (sublane,lane) tile, so
    they are free; only 3 W-shifted slabs are touched per layer.
    wref: [3, 3*cin, cout] bf16, dx-major / (dy, cin)-minor."""
    cin = pref.shape[-1]
    hw = H * W
    acc = jnp.zeros((hw, cout), jnp.float32)
    for dx in range(3):
        slab = pref[:, :, dx:dx + W, :]                       # [1, H+2, W, cin]
        patch = jnp.concatenate(
            [slab[:, dy:dy + H].reshape(hw, cin) for dy in range(3)],
            axis=-1).astype(jnp.bfloat16)                     # [HW, 3*cin]
        acc = acc + jnp.dot(patch, wref[dx],
                            preferred_element_type=jnp.float32)
    return acc


def _dwconv3x3(pref, wref, H, W):
    """Depthwise 3x3: 9 shifted elementwise FMAs on the VPU (f32)."""
    cin = pref.shape[-1]
    acc = jnp.zeros((1, H, W, cin), jnp.float32)
    for dy in range(3):
        for dx in range(3):
            acc = acc + pref[:, dy:dy + H, dx:dx + W, :] * wref[dy * 3 + dx]
    return acc.reshape(H * W, cin)


def _partial_stats(stat_ref, x2d):
    """Per-tile [sum, sum-of-squares] for global BatchNorm statistics."""
    c = x2d.shape[-1]
    stat_ref[...] = jnp.concatenate(
        [jnp.sum(x2d, axis=0, keepdims=True),
         jnp.sum(x2d * x2d, axis=0, keepdims=True)], axis=0).reshape(1, 2, c)


# ------------------------------- pass kernels ---------------------------------

def _pass1_kernel(x_ref, w1_ref, wd1_ref,
                  y1_ref, s1_ref, d1_ref, sd1_ref,
                  xpad_ref):
    _, H, W, C = x_ref.shape
    _store_padded(xpad_ref, x_ref[...], H, W)

    # conv 3x3 64->128 (bias b1 absorbed by the following BatchNorm)
    y1 = _conv3x3(xpad_ref, w1_ref, H, W, HID1)               # [HW, 128]
    y1_ref[...] = y1.reshape(1, H, W, HID1)
    _partial_stats(s1_ref, y1)

    # depthwise 3x3 (bias bd1 absorbed by the following BatchNorm)
    d1 = _dwconv3x3(xpad_ref, wd1_ref, H, W)                  # [HW, 64]
    d1_ref[...] = d1.reshape(1, H, W, C)
    _partial_stats(sd1_ref, d1)


def _pass2_kernel(y1_ref, d1_ref, sc1_ref, sh1_ref, scd1_ref, shd1_ref,
                  w2_ref, wd2_ref,
                  y2_ref, s2_ref, d2_ref, sd2_ref,
                  pad1_ref, padd_ref):
    _, H, W, C1 = y1_ref.shape
    C = d1_ref.shape[-1]
    hw = H * W

    # BN1 + ReLU (fused scale/shift), store once as bf16, conv 3x3 128->256.
    t1 = jnp.maximum(y1_ref[...].reshape(hw, C1) * sc1_ref[...] + sh1_ref[...],
                     0.0)
    _store_padded(pad1_ref, t1.reshape(1, H, W, C1), H, W)    # bf16 scratch
    y2 = _conv3x3(pad1_ref, w2_ref, H, W, HID2)               # [HW, 256]
    y2_ref[...] = y2.reshape(1, H, W, HID2)
    _partial_stats(s2_ref, y2)

    # BNd1 + ReLU, depthwise 3x3.
    e1 = jnp.maximum(d1_ref[...].reshape(hw, C) * scd1_ref[...] + shd1_ref[...],
                     0.0)
    _store_padded(padd_ref, e1.reshape(1, H, W, C), H, W)
    d2 = _dwconv3x3(padd_ref, wd2_ref, H, W)                  # [HW, 64]
    d2_ref[...] = d2.reshape(1, H, W, C)
    _partial_stats(sd2_ref, d2)


def _pass3_kernel(y2_ref, d2_ref, sc2_ref, sh2_ref, scd2_ref, shd2_ref,
                  w3_ref, b3_ref, wcomb_p_ref, wcomb_c_ref,
                  ba1_ref, wa2_ref, ba2_ref, bo_ref,
                  out_ref):
    _, H, W, C2 = y2_ref.shape
    C = d2_ref.shape[-1]
    hw = H * W

    # BN2 + ReLU -> 1x1 conv 256->128 (proc).
    t2 = jnp.maximum(y2_ref[...].reshape(hw, C2) * sc2_ref[...] + sh2_ref[...],
                     0.0)
    proc = jnp.dot(t2.astype(jnp.bfloat16), w3_ref[...],
                   preferred_element_type=jnp.float32) + b3_ref[...]  # [HW,128]

    # BNd2 + ReLU (coherence branch).
    coh = jnp.maximum(d2_ref[...].reshape(hw, C) * scd2_ref[...] + shd2_ref[...],
                      0.0)                                             # [HW,64]

    # Fused RHS: columns [:128] = output projection, [128:192] = attention
    # hidden layer; split along K (proc rows / coh rows) so the 192-wide
    # channel concat never materializes. Two MXU matmuls cover both heads.
    z = (jnp.dot(proc.astype(jnp.bfloat16), wcomb_p_ref[...],
                 preferred_element_type=jnp.float32)
         + jnp.dot(coh.astype(jnp.bfloat16), wcomb_c_ref[...],
                   preferred_element_type=jnp.float32))                # [HW,192]

    a = jnp.maximum(z[:, OUTPUT_DIM:] + ba1_ref[...], 0.0)             # [HW,64]
    # [HW,64]@[64,1] as a VPU multiply + lane reduction, not a 1-col MXU matmul.
    att = jax.nn.sigmoid(jnp.sum(a * wa2_ref[...], axis=-1, keepdims=True)
                         + ba2_ref[...])                               # [HW,1]
    # att is a per-pixel scalar -> gate after the matmul; bias added last.
    out = att * z[:, :OUTPUT_DIM] + bo_ref[...]
    out_ref[...] = out.reshape(1, H, W, OUTPUT_DIM)


# --------------------------------- wrapper ------------------------------------

def _bn_scale_shift(stats, gamma, beta, count):
    """Reduce per-tile partial sums to global BN stats, fold with the affine
    params into one per-channel scale + shift."""
    s = jnp.sum(stats, axis=0)                                # [2, C]
    mean = s[0] / count
    # TODO(synk): single-pass E[x^2]-E[x]^2 can cancel if |mean| >> std at real
    # scales; switch to a shifted two-pass reduction if accuracy drifts.
    var = jnp.maximum(s[1] / count - mean * mean, 0.0)
    scale = gamma.reshape(-1) * jax.lax.rsqrt(var + BN_EPS)
    shift = beta.reshape(-1) - mean * scale
    return scale.reshape(1, -1), shift.reshape(1, -1)


@jax.jit
def phase_correlation_forward(features_nchw, params):
    """features_nchw: [N, 64, H, W] -> [N, 128, H, W] (matches PyTorch module)."""
    # TODO(synk): fold the NCHW<->NHWC layout change into the kernels to avoid
    # two extra full-array HBM round trips.
    x = jnp.transpose(features_nchw, (0, 2, 3, 1)).astype(jnp.float32)  # NHWC
    N, H, W, C = x.shape
    Wp = ((W + 2 + 7) // 8) * 8           # pad scratch W to a sublane multiple
    count = float(N * H * W)
    bf16 = jnp.bfloat16
    p = params

    # ---- weight packing (once, outside the kernels) -------------------------
    # 3x3 convs: dx-major, (dy, cin)-minor -> each dx slab is one deep-K matmul.
    w1 = jnp.transpose(p["w1"], (1, 0, 2, 3)).reshape(3, 3 * C, HID1).astype(bf16)
    w2 = jnp.transpose(p["w2"], (1, 0, 2, 3)).reshape(3, 3 * HID1, HID2).astype(bf16)
    w3 = p["w3"].astype(bf16)
    wd1 = p["wd1"].reshape(9, C).astype(jnp.float32)
    wd2 = p["wd2"].reshape(9, C).astype(jnp.float32)
    # Fused [output | attention-hidden] RHS, split along K (proc / coh rows).
    wcomb_p = jnp.concatenate([p["wo"][:OUTPUT_DIM], p["wa1"][:OUTPUT_DIM]],
                              axis=1).astype(bf16)            # [128, 192]
    wcomb_c = jnp.concatenate([p["wo"][OUTPUT_DIM:], p["wa1"][OUTPUT_DIM:]],
                              axis=1).astype(bf16)            # [64, 192]
    wa2 = p["wa2"].reshape(1, ATT_HID).astype(jnp.float32)
    # b1/b2/bd1/bd2 intentionally not passed: BatchNorm absorbs them exactly.

    grid = (N,)
    cparams = pltpu.CompilerParams(dimension_semantics=("parallel",),
                                   vmem_limit_bytes=VMEM_LIMIT)

    def img_spec(c):
        return pl.BlockSpec((1, H, W, c), lambda n: (n, 0, 0, 0))

    def stat_spec(c):
        return pl.BlockSpec((1, 2, c), lambda n: (n, 0, 0))

    def full_spec(arr):
        zeros = (0,) * arr.ndim
        return pl.BlockSpec(arr.shape, lambda n: zeros)

    # ---- pass 1: conv1 + dwconv1, per-tile BN partial stats ------------------
    y1, s1, d1, sd1 = pl.pallas_call(
        _pass1_kernel,
        grid=grid,
        in_specs=[img_spec(C), full_spec(w1), full_spec(wd1)],
        out_specs=(img_spec(HID1), stat_spec(HID1), img_spec(C), stat_spec(C)),
        out_shape=(jax.ShapeDtypeStruct((N, H, W, HID1), jnp.float32),
                   jax.ShapeDtypeStruct((N, 2, HID1), jnp.float32),
                   jax.ShapeDtypeStruct((N, H, W, C), jnp.float32),
                   jax.ShapeDtypeStruct((N, 2, C), jnp.float32)),
        scratch_shapes=[pltpu.VMEM((1, H + 2, Wp, C), jnp.float32)],
        compiler_params=cparams,
    )(x, w1, wd1)

    sc1, sh1 = _bn_scale_shift(s1, p["g1"], p["be1"], count)
    scd1, shd1 = _bn_scale_shift(sd1, p["gd1"], p["bed1"], count)

    # ---- pass 2: BN1+ReLU -> conv2 ; BNd1+ReLU -> dwconv2 --------------------
    y2, s2, d2, sd2 = pl.pallas_call(
        _pass2_kernel,
        grid=grid,
        in_specs=[img_spec(HID1), img_spec(C),
                  full_spec(sc1), full_spec(sh1),
                  full_spec(scd1), full_spec(shd1),
                  full_spec(w2), full_spec(wd2)],
        out_specs=(img_spec(HID2), stat_spec(HID2), img_spec(C), stat_spec(C)),
        out_shape=(jax.ShapeDtypeStruct((N, H, W, HID2), jnp.float32),
                   jax.ShapeDtypeStruct((N, 2, HID2), jnp.float32),
                   jax.ShapeDtypeStruct((N, H, W, C), jnp.float32),
                   jax.ShapeDtypeStruct((N, 2, C), jnp.float32)),
        scratch_shapes=[pltpu.VMEM((1, H + 2, Wp, HID1), jnp.bfloat16),
                        pltpu.VMEM((1, H + 2, Wp, C), jnp.float32)],
        compiler_params=cparams,
    )(y1, d1, sc1, sh1, scd1, shd1, w2, wd2)

    sc2, sh2 = _bn_scale_shift(s2, p["g2"], p["be2"], count)
    scd2, shd2 = _bn_scale_shift(sd2, p["gd2"], p["bed2"], count)

    # ---- pass 3: BN2+ReLU -> 1x1 convs, attention gate, output ---------------
    out_nhwc = pl.pallas_call(
        _pass3_kernel,
        grid=grid,
        in_specs=[img_spec(HID2), img_spec(C),
                  full_spec(sc2), full_spec(sh2),
                  full_spec(scd2), full_spec(shd2),
                  full_spec(w3), full_spec(p["b3"]),
                  full_spec(wcomb_p), full_spec(wcomb_c),
                  full_spec(p["ba1"]), full_spec(wa2), full_spec(p["ba2"]),
                  full_spec(p["bo"])],
        out_specs=img_spec(OUTPUT_DIM),
        out_shape=jax.ShapeDtypeStruct((N, H, W, OUTPUT_DIM), jnp.float32),
        compiler_params=cparams,
    )(y2, d2, sc2, sh2, scd2, shd2, w3, p["b3"], wcomb_p, wcomb_c,
      p["ba1"], wa2, p["ba2"], p["bo"])

    return jnp.transpose(out_nhwc, (0, 3, 1, 2))              # back to NCHW


# ------------------------------ params / reference ----------------------------

def init_params(key):
    ks = list(jax.random.split(key, 32))

    def nrm(shape, scale=0.05):
        return scale * jax.random.normal(ks.pop(), shape, jnp.float32)

    C, O = FEATURE_DIM, OUTPUT_DIM
    p = {}
    p["w1"], p["b1"] = nrm((3, 3, C, HID1)), nrm((1, HID1))
    p["g1"], p["be1"] = 1.0 + nrm((1, HID1)), nrm((1, HID1))
    p["w2"], p["b2"] = nrm((3, 3, HID1, HID2)), nrm((1, HID2))
    p["g2"], p["be2"] = 1.0 + nrm((1, HID2)), nrm((1, HID2))
    p["w3"], p["b3"] = nrm((HID2, O)), nrm((1, O))
    p["wd1"], p["bd1"] = nrm((3, 3, C)), nrm((1, C))
    p["gd1"], p["bed1"] = 1.0 + nrm((1, C)), nrm((1, C))
    p["wd2"], p["bd2"] = nrm((3, 3, C)), nrm((1, C))
    p["gd2"], p["bed2"] = 1.0 + nrm((1, C)), nrm((1, C))
    p["wa1"], p["ba1"] = nrm((C + O, ATT_HID)), nrm((1, ATT_HID))
    p["wa2"], p["ba2"] = nrm((ATT_HID, 1)), nrm((1, 1))
    p["wo"], p["bo"] = nrm((C + O, O)), nrm((1, O))
    return p


def reference_forward(features_nchw, p):
    """Pure-JAX f32 reference (lax.conv) mirroring the PyTorch forward."""
    x = jnp.transpose(features_nchw, (0, 2, 3, 1)).astype(jnp.float32)
    C, O = FEATURE_DIM, OUTPUT_DIM

    def conv(x, w, b, groups=1):
        y = jax.lax.conv_general_dilated(
            x, w, window_strides=(1, 1), padding="SAME",
            dimension_numbers=("NHWC", "HWIO", "NHWC"),
            feature_group_count=groups)
        return y + b.reshape(1, 1, 1, -1)

    def bn_relu(x, g, be):
        mean = jnp.mean(x, axis=(0, 1, 2), keepdims=True)
        var = jnp.mean(jnp.square(x - mean), axis=(0, 1, 2), keepdims=True)
        y = (g.reshape(1, 1, 1, -1) * (x - mean) * jax.lax.rsqrt(var + BN_EPS)
             + be.reshape(1, 1, 1, -1))
        return jnp.maximum(y, 0.0)

    t1 = bn_relu(conv(x, p["w1"], p["b1"]), p["g1"], p["be1"])
    t2 = bn_relu(conv(t1, p["w2"], p["b2"]), p["g2"], p["be2"])
    proc = conv(t2, p["w3"].reshape(1, 1, HID2, O), p["b3"])
    d1 = bn_relu(conv(x, p["wd1"].reshape(3, 3, 1, C), p["bd1"], groups=C),
                 p["gd1"], p["bed1"])
    coh = bn_relu(conv(d1, p["wd2"].reshape(3, 3, 1, C), p["bd2"], groups=C),
                  p["gd2"], p["bed2"])
    combined = jnp.concatenate([proc, coh], axis=-1)
    a = jnp.maximum(conv(combined, p["wa1"].reshape(1, 1, C + O, ATT_HID),
                         p["ba1"]), 0.0)
    att = jax.nn.sigmoid(conv(a, p["wa2"].reshape(1, 1, ATT_HID, 1), p["ba2"]))
    out = conv(combined * att, p["wo"].reshape(1, 1, C + O, O), p["bo"])
    return jnp.transpose(out, (0, 3, 1, 2))


if __name__ == "__main__":
    key = jax.random.PRNGKey(0)
    kx, kp = jax.random.split(key)
    x = jax.random.normal(kx, (2, FEATURE_DIM, 8, 8), jnp.float32)  # NCHW
    params = init_params(kp)

    out = jax.block_until_ready(phase_correlation_forward(x, params))
    assert out.shape == (2, OUTPUT_DIM, 8, 8), out.shape

    ref = reference_forward(x, params)
    max_err = float(jnp.max(jnp.abs(out - ref)))
    # bf16 MXU operands with f32 accumulation through 4 stacked conv/BN stages;
    # observed error is a few 1e-3 against the pure-f32 reference.
    assert max_err < 2.5e-2, f"max abs err vs f32 reference: {max_err}"

    print("KERNEL_OK")
</pallas_src>

<mosaic_0001>
module attributes {stable_mosaic.version = 11 : i64} {
  func.func @_pass1_kernel(%arg0: i32, %arg1: memref<1x8x8x64xf32, #tpu.memory_space<vmem>>, %arg2: memref<3x192x128xbf16, #tpu.memory_space<vmem>>, %arg3: memref<9x64xf32, #tpu.memory_space<vmem>>, %arg4: memref<1x8x8x128xf32, #tpu.memory_space<vmem>>, %arg5: memref<1x2x128xf32, #tpu.memory_space<vmem>>, %arg6: memref<1x8x8x64xf32, #tpu.memory_space<vmem>>, %arg7: memref<1x2x64xf32, #tpu.memory_space<vmem>>, %arg8: memref<1x10x16x64xf32, #tpu.memory_space<vmem>>) attributes {dimension_semantics = [#tpu.dimension_semantics<parallel>], iteration_bounds = array<i64: 2>, scalar_prefetch = 0 : i64, scratch_operands = 1 : i64, tpu.core_type = #tpu.core_type<tc>, window_params = [{transform_indices = @transform_0, window_bounds = array<i64: 1, 8, 8, 64>}, {pipeline_mode = #tpu.pipeline_mode<synchronous>, transform_indices = @transform_1, window_bounds = array<i64: 3, 192, 128>}, {pipeline_mode = #tpu.pipeline_mode<synchronous>, transform_indices = @transform_2, window_bounds = array<i64: 9, 64>}, {transform_indices = @transform_3, window_bounds = array<i64: 1, 8, 8, 128>}, {transform_indices = @transform_4, window_bounds = array<i64: 1, 2, 128>}, {transform_indices = @transform_5, window_bounds = array<i64: 1, 8, 8, 64>}, {transform_indices = @transform_6, window_bounds = array<i64: 1, 2, 64>}]} {
    %c0 = arith.constant 0 : index
    %c0_0 = arith.constant 0 : index
    %c0_1 = arith.constant 0 : index
    %c0_2 = arith.constant 0 : index
    %0 = vector.load %arg1[%c0, %c0_0, %c0_1, %c0_2] : memref<1x8x8x64xf32, #tpu.memory_space<vmem>>, vector<1x8x8x64xf32>
    %cst = arith.constant 0.000000e+00 : f32
    %1 = vector.broadcast %cst : f32 to vector<1x1x16x64xf32>
    %cst_3 = arith.constant 0.000000e+00 : f32
    %2 = vector.broadcast %cst_3 : f32 to vector<1x10x1x64xf32>
    %c0_4 = arith.constant 0 : index
    %c0_5 = arith.constant 0 : index
    %c0_6 = arith.constant 0 : index
    %c0_7 = arith.constant 0 : index
    %3 = vector.load %arg8[%c0_4, %c0_5, %c0_6, %c0_7] : memref<1x10x16x64xf32, #tpu.memory_space<vmem>>, vector<1x1x16x64xf32>
    tpu.vector_store %arg8[%c0_4, %c0_5, %c0_6, %c0_7], %1 {strides = array<i32>} : memref<1x10x16x64xf32, #tpu.memory_space<vmem>>, vector<1x1x16x64xf32>,
    %c0_8 = arith.constant 0 : index
    %c9 = arith.constant 9 : index
    %c0_9 = arith.constant 0 : index
    %c0_10 = arith.constant 0 : index
    %4 = vector.load %arg8[%c0_8, %c9, %c0_9, %c0_10] : memref<1x10x16x64xf32, #tpu.memory_space<vmem>>, vector<1x1x16x64xf32>
    tpu.vector_store %arg8[%c0_8, %c9, %c0_9, %c0_10], %1 {strides = array<i32>} : memref<1x10x16x64xf32, #tpu.memory_space<vmem>>, vector<1x1x16x64xf32>,
    %c0_11 = arith.constant 0 : index
    %c0_12 = arith.constant 0 : index
    %c0_13 = arith.constant 0 : index
    %c0_14 = arith.constant 0 : index
    %5 = vector.load %arg8[%c0_11, %c0_12, %c0_13, %c0_14] : memref<1x10x16x64xf32, #tpu.memory_space<vmem>>, vector<1x10x1x64xf32>
    tpu.vector_store %arg8[%c0_11, %c0_12, %c0_13, %c0_14], %2 {strides = array<i32>} : memref<1x10x16x64xf32, #tpu.memory_space<vmem>>, vector<1x10x1x64xf32>,
    %c0_15 = arith.constant 0 : index
    %c0_16 = arith.constant 0 : index
    %c9_17 = arith.constant 9 : index
    %c0_18 = arith.constant 0 : index
    %6 = vector.load %arg8[%c0_15, %c0_16, %c9_17, %c0_18] : memref<1x10x16x64xf32, #tpu.memory_space<vmem>>, vector<1x10x1x64xf32>
    tpu.vector_store %arg8[%c0_15, %c0_16, %c9_17, %c0_18], %2 {strides = array<i32>} : memref<1x10x16x64xf32, #tpu.memory_space<vmem>>, vector<1x10x1x64xf32>,
    %c0_19 = arith.constant 0 : index
    %c1 = arith.constant 1 : index
    %c1_20 = arith.constant 1 : index
    %c0_21 = arith.constant 0 : index
    %7 = vector.load %arg8[%c0_19, %c1, %c1_20, %c0_21] : memref<1x10x16x64xf32, #tpu.memory_space<vmem>>, vector<1x8x8x64xf32>
    tpu.vector_store %arg8[%c0_19, %c1, %c1_20, %c0_21], %0 {strides = array<i32>} : memref<1x10x16x64xf32, #tpu.memory_space<vmem>>, vector<1x8x8x64xf32>,
    %cst_22 = arith.constant 0.000000e+00 : f32
    %8 = vector.broadcast %cst_22 : f32 to vector<64x128xf32>
    %c0_23 = arith.constant 0 : index
    %c0_24 = arith.constant 0 : index
    %c0_25 = arith.constant 0 : index
    %c0_26 = arith.constant 0 : index
    %9 = vector.load %arg8[%c0_23, %c0_24, %c0_25, %c0_26] : memref<1x10x16x64xf32, #tpu.memory_space<vmem>>, vector<1x10x8x64xf32>
    %10 = vector.extract_strided_slice %9 {offsets = [0, 0, 0, 0], sizes = [1, 8, 8, 64], strides = [1, 1, 1, 1]} : vector<1x10x8x64xf32> to vector<1x8x8x64xf32>
    %11 = vector.shape_cast %10 : vector<1x8x8x64xf32> to vector<64x64xf32>
    %12 = vector.extract_strided_slice %9 {offsets = [0, 1, 0, 0], sizes = [1, 8, 8, 64], strides = [1, 1, 1, 1]} : vector<1x10x8x64xf32> to vector<1x8x8x64xf32>
    %13 = vector.shape_cast %12 : vector<1x8x8x64xf32> to vector<64x64xf32>
    %14 = vector.extract_strided_slice %9 {offsets = [0, 2, 0, 0], sizes = [1, 8, 8, 64], strides = [1, 1, 1, 1]} : vector<1x10x8x64xf32> to vector<1x8x8x64xf32>
    %15 = vector.shape_cast %14 : vector<1x8x8x64xf32> to vector<64x64xf32>
    %16 = tpu.concatenate %11, %13, %15 in 1 : vector<64x64xf32>, vector<64x64xf32>, vector<64x64xf32> -> vector<64x192xf32>
    %17 = arith.truncf %16 : vector<64x192xf32> to vector<64x192xbf16>
    %c0_27 = arith.constant 0 : index
    %c0_28 = arith.constant 0 : index
    %c0_29 = arith.constant 0 : index
    %18 = vector.load %arg2[%c0_27, %c0_28, %c0_29] : memref<3x192x128xbf16, #tpu.memory_space<vmem>>, vector<1x192x128xbf16>
    %19 = vector.shape_cast %18 : vector<1x192x128xbf16> to vector<192x128xbf16>
    %cst_30 = arith.constant dense<0.000000e+00> : vector<64x128xf32>
    %20 = tpu.matmul %17, %19, %cst_30 {dimension_numbers = #tpu.dot_dimension_numbers<[1], [0], [0], [1], [0, 0, 1, 1], [], []>} : vector<64x192xbf16>, vector<192x128xbf16>, vector<64x128xf32> -> vector<64x128xf32>
    %21 = arith.addf %8, %20 : vector<64x128xf32>
    %c0_31 = arith.constant 0 : index
    %c0_32 = arith.constant 0 : index
    %c1_33 = arith.constant 1 : index
    %c0_34 = arith.constant 0 : index
    %22 = vector.load %arg8[%c0_31, %c0_32, %c1_33, %c0_34] : memref<1x10x16x64xf32, #tpu.memory_space<vmem>>, vector<1x10x8x64xf32>
    %23 = vector.extract_strided_slice %22 {offsets = [0, 0, 0, 0], sizes = [1, 8, 8, 64], strides = [1, 1, 1, 1]} : vector<1x10x8x64xf32> to vector<1x8x8x64xf32>
    %24 = vector.shape_cast %23 : vector<1x8x8x64xf32> to vector<64x64xf32>
    %25 = vector.extract_strided_slice %22 {offsets = [0, 1, 0, 0], sizes = [1, 8, 8, 64], strides = [1, 1, 1, 1]} : vector<1x10x8x64xf32> to vector<1x8x8x64xf32>
    %26 = vector.shape_cast %25 : vector<1x8x8x64xf32> to vector<64x64xf32>
    %27 = vector.extract_strided_slice %22 {offsets = [0, 2, 0, 0], sizes = [1, 8, 8, 64], strides = [1, 1, 1, 1]} : vector<1x10x8x64xf32> to vector<1x8x8x64xf32>
    %28 = vector.shape_cast %27 : vector<1x8x8x64xf32> to vector<64x64xf32>
    %29 = tpu.concatenate %24, %26, %28 in 1 : vector<64x64xf32>, vector<64x64xf32>, vector<64x64xf32> -> vector<64x192xf32>
    %30 = arith.truncf %29 : vector<64x192xf32> to vector<64x192xbf16>
    %c1_35 = arith.constant 1 : index
    %c0_36 = arith.constant 0 : index
    %c0_37 = arith.constant 0 : index
    %31 = vector.load %arg2[%c1_35, %c0_36, %c0_37] : memref<3x192x128xbf16, #tpu.memory_space<vmem>>, vector<1x192x128xbf16>
    %32 = vector.shape_cast %31 : vector<1x192x128xbf16> to vector<192x128xbf16>
    %cst_38 = arith.constant dense<0.000000e+00> : vector<64x128xf32>
    %33 = tpu.matmul %30, %32, %cst_38 {dimension_numbers = #tpu.dot_dimension_numbers<[1], [0], [0], [1], [0, 0, 1, 1], [], []>} : vector<64x192xbf16>, vector<192x128xbf16>, vector<64x128xf32> -> vector<64x128xf32>
    %34 = arith.addf %21, %33 : vector<64x128xf32>
    %c0_39 = arith.constant 0 : index
    %c0_40 = arith.constant 0 : index
    %c2 = arith.constant 2 : index
    %c0_41 = arith.constant 0 : index
    %35 = vector.load %arg8[%c0_39, %c0_40, %c2, %c0_41] : memref<1x10x16x64xf32, #tpu.memory_space<vmem>>, vector<1x10x8x64xf32>
    %36 = vector.extract_strided_slice %35 {offsets = [0, 0, 0, 0], sizes = [1, 8, 8, 64], strides = [1, 1, 1, 1]} : vector<1x10x8x64xf32> to vector<1x8x8x64xf32>
    %37 = vector.shape_cast %36 : vector<1x8x8x64xf32> to vector<64x64xf32>
    %38 = vector.extract_strided_slice %35 {offsets = [0, 1, 0, 0], sizes = [1, 8, 8, 64], strides = [1, 1, 1, 1]} : vector<1x10x8x64xf32> to vector<1x8x8x64xf32>
    %39 = vector.shape_cast %38 : vector<1x8x8x64xf32> to vector<64x64xf32>
    %40 = vector.extract_strided_slice %35 {offsets = [0, 2, 0, 0], sizes = [1, 8, 8, 64], strides = [1, 1, 1, 1]} : vector<1x10x8x64xf32> to vector<1x8x8x64xf32>
    %41 = vector.shape_cast %40 : vector<1x8x8x64xf32> to vector<64x64xf32>
    %42 = tpu.concatenate %37, %39, %41 in 1 : vector<64x64xf32>, vector<64x64xf32>, vector<64x64xf32> -> vector<64x192xf32>
    %43 = arith.truncf %42 : vector<64x192xf32> to vector<64x192xbf16>
    %c2_42 = arith.constant 2 : index
    %c0_43 = arith.constant 0 : index
    %c0_44 = arith.constant 0 : index
    %44 = vector.load %arg2[%c2_42, %c0_43, %c0_44] : memref<3x192x128xbf16, #tpu.memory_space<vmem>>, vector<1x192x128xbf16>
    %45 = vector.shape_cast %44 : vector<1x192x128xbf16> to vector<192x128xbf16>
    %cst_45 = arith.constant dense<0.000000e+00> : vector<64x128xf32>
    %46 = tpu.matmul %43, %45, %cst_45 {dimension_numbers = #tpu.dot_dimension_numbers<[1], [0], [0], [1], [0, 0, 1, 1], [], []>} : vector<64x192xbf16>, vector<192x128xbf16>, vector<64x128xf32> -> vector<64x128xf32>
    %47 = arith.addf %34, %46 : vector<64x128xf32>
    %48 = vector.shape_cast %47 : vector<64x128xf32> to vector<1x8x8x128xf32>
    %c0_46 = arith.constant 0 : index
    %c0_47 = arith.constant 0 : index
    %c0_48 = arith.constant 0 : index
    %c0_49 = arith.constant 0 : index
    %49 = vector.load %arg4[%c0_46, %c0_47, %c0_48, %c0_49] : memref<1x8x8x128xf32, #tpu.memory_space<vmem>>, vector<1x8x8x128xf32>
    tpu.vector_store %arg4[%c0_46, %c0_47, %c0_48, %c0_49], %48 {strides = array<i32>} : memref<1x8x8x128xf32, #tpu.memory_space<vmem>>, vector<1x8x8x128xf32>,
    %cst_50 = arith.constant dense<0.000000e+00> : vector<128xf32>
    %50 = vector.multi_reduction <add>, %47, %cst_50 [0] : vector<64x128xf32> to vector<128xf32>
    %51 = vector.shape_cast %50 : vector<128xf32> to vector<1x128xf32>
    %52 = arith.mulf %47, %47 : vector<64x128xf32>
    %cst_51 = arith.constant dense<0.000000e+00> : vector<128xf32>
    %53 = vector.multi_reduction <add>, %52, %cst_51 [0] : vector<64x128xf32> to vector<128xf32>
    %54 = vector.shape_cast %53 : vector<128xf32> to vector<1x128xf32>
    %55 = tpu.concatenate %51, %54 in 0 : vector<1x128xf32>, vector<1x128xf32> -> vector<2x128xf32>
    %56 = vector.shape_cast %55 : vector<2x128xf32> to vector<1x2x128xf32>
    %c0_52 = arith.constant 0 : index
    %c0_53 = arith.constant 0 : index
    %c0_54 = arith.constant 0 : index
    %57 = vector.load %arg5[%c0_52, %c0_53, %c0_54] : memref<1x2x128xf32, #tpu.memory_space<vmem>>, vector<1x2x128xf32>
    tpu.vector_store %arg5[%c0_52, %c0_53, %c0_54], %56 {strides = array<i32>} : memref<1x2x128xf32, #tpu.memory_space<vmem>>, vector<1x2x128xf32>,
    %cst_55 = arith.constant 0.000000e+00 : f32
    %58 = vector.broadcast %cst_55 : f32 to vector<1x8x8x64xf32>
    %c0_56 = arith.constant 0 : index
    %c0_57 = arith.constant 0 : index
    %c0_58 = arith.constant 0 : index
    %c0_59 = arith.constant 0 : index
    %59 = vector.load %arg8[%c0_56, %c0_57, %c0_58, %c0_59] : memref<1x10x16x64xf32, #tpu.memory_space<vmem>>, vector<1x8x8x64xf32>
    %c0_60 = arith.constant 0 : index
    %c0_61 = arith.constant 0 : index
    %60 = vector.load %arg3[%c0_60, %c0_61] : memref<9x64xf32, #tpu.memory_space<vmem>>, vector<1x64xf32>
    %61 = vector.shape_cast %60 : vector<1x64xf32> to vector<64xf32>
    %62 = vector.shape_cast %61 : vector<64xf32> to vector<1x1x1x64xf32>
    %63 = vector.broadcast %62 : vector<1x1x1x64xf32> to vector<1x8x8x64xf32>
    %64 = arith.mulf %59, %63 : vector<1x8x8x64xf32>
    %65 = arith.addf %58, %64 : vector<1x8x8x64xf32>
    %c0_62 = arith.constant 0 : index
    %c0_63 = arith.constant 0 : index
    %c1_64 = arith.constant 1 : index
    %c0_65 = arith.constant 0 : index
    %66 = vector.load %arg8[%c0_62, %c0_63, %c1_64, %c0_65] : memref<1x10x16x64xf32, #tpu.memory_space<vmem>>, vector<1x8x8x64xf32>
    %c1_66 = arith.constant 1 : index
    %c0_67 = arith.constant 0 : index
    %67 = vector.load %arg3[%c1_66, %c0_67] : memref<9x64xf32, #tpu.memory_space<vmem>>, vector<1x64xf32>
    %68 = vector.shape_cast %67 : vector<1x64xf32> to vector<64xf32>
    %69 = vector.shape_cast %68 : vector<64xf32> to vector<1x1x1x64xf32>
    %70 = vector.broadcast %69 : vector<1x1x1x64xf32> to vector<1x8x8x64xf32>
    %71 = arith.mulf %66, %70 : vector<1x8x8x64xf32>
    %72 = arith.addf %65, %71 : vector<1x8x8x64xf32>
    %c0_68 = arith.constant 0 : index
    %c0_69 = arith.constant 0 : index
    %c2_70 = arith.constant 2 : index
    %c0_71 = arith.constant 0 : index
    %73 = vector.load %arg8[%c0_68, %c0_69, %c2_70, %c0_71] : memref<1x10x16x64xf32, #tpu.memory_space<vmem>>, vector<1x8x8x64xf32>
    %c2_72 = arith.constant 2 : index
    %c0_73 = arith.constant 0 : index
    %74 = vector.load %arg3[%c2_72, %c0_73] : memref<9x64xf32, #tpu.memory_space<vmem>>, vector<1x64xf32>
    %75 = vector.shape_cast %74 : vector<1x64xf32> to vector<64xf32>
    %76 = vector.shape_cast %75 : vector<64xf32> to vector<1x1x1x64xf32>
    %77 = vector.broadcast %76 : vector<1x1x1x64xf32> to vector<1x8x8x64xf32>
    %78 = arith.mulf %73, %77 : vector<1x8x8x64xf32>
    %79 = arith.addf %72, %78 : vector<1x8x8x64xf32>
    %c0_74 = arith.constant 0 : index
    %c1_75 = arith.constant 1 : index
    %c0_76 = arith.constant 0 : index
    %c0_77 = arith.constant 0 : index
    %80 = vector.load %arg8[%c0_74, %c1_75, %c0_76, %c0_77] : memref<1x10x16x64xf32, #tpu.memory_space<vmem>>, vector<1x8x8x64xf32>
    %c3 = arith.constant 3 : index
    %c0_78 = arith.constant 0 : index
    %81 = vector.load %arg3[%c3, %c0_78] : memref<9x64xf32, #tpu.memory_space<vmem>>, vector<1x64xf32>
    %82 = vector.shape_cast %81 : vector<1x64xf32> to vector<64xf32>
    %83 = vector.shape_cast %82 : vector<64xf32> to vector<1x1x1x64xf32>
    %84 = vector.broadcast %83 : vector<1x1x1x64xf32> to vector<1x8x8x64xf32>
    %85 = arith.mulf %80, %84 : vector<1x8x8x64xf32>
    %86 = arith.addf %79, %85 : vector<1x8x8x64xf32>
    %c0_79 = arith.constant 0 : index
    %c1_80 = arith.constant 1 : index
    %c1_81 = arith.constant 1 : index
    %c0_82 = arith.constant 0 : index
    %87 = vector.load %arg8[%c0_79, %c1_80, %c1_81, %c0_82] : memref<1x10x16x64xf32, #tpu.memory_space<vmem>>, vector<1x8x8x64xf32>
    %c4 = arith.constant 4 : index
    %c0_83 = arith.constant 0 : index
    %88 = vector.load %arg3[%c4, %c0_83] : memref<9x64xf32, #tpu.memory_space<vmem>>, vector<1x64xf32>
    %89 = vector.shape_cast %88 : vector<1x64xf32> to vector<64xf32>
    %90 = vector.shape_cast %89 : vector<64xf32> to vector<1x1x1x64xf32>
    %91 = vector.broadcast %90 : vector<1x1x1x64xf32> to vector<1x8x8x64xf32>
    %92 = arith.mulf %87, %91 : vector<1x8x8x64xf32>
    %93 = arith.addf %86, %92 : vector<1x8x8x64xf32>
    %c0_84 = arith.constant 0 : index
    %c1_85 = arith.constant 1 : index
    %c2_86 = arith.constant 2 : index
    %c0_87 = arith.constant 0 : index
    %94 = vector.load %arg8[%c0_84, %c1_85, %c2_86, %c0_87] : memref<1x10x16x64xf32, #tpu.memory_space<vmem>>, vector<1x8x8x64xf32>
    %c5 = arith.constant 5 : index
    %c0_88 = arith.constant 0 : index
    %95 = vector.load %arg3[%c5, %c0_88] : memref<9x64xf32, #tpu.memory_space<vmem>>, vector<1x64xf32>
    %96 = vector.shape_cast %95 : vector<1x64xf32> to vector<64xf32>
    %97 = vector.shape_cast %96 : vector<64xf32> to vector<1x1x1x64xf32>
    %98 = vector.broadcast %97 : vector<1x1x1x64xf32> to vector<1x8x8x64xf32>
    %99 = arith.mulf %94, %98 : vector<1x8x8x64xf32>
    %100 = arith.addf %93, %99 : vector<1x8x8x64xf32>
    %c0_89 = arith.constant 0 : index
    %c2_90 = arith.constant 2 : index
    %c0_91 = arith.constant 0 : index
    %c0_92 = arith.constant 0 : index
    %101 = vector.load %arg8[%c0_89, %c2_90, %c0_91, %c0_92] : memref<1x10x16x64xf32, #tpu.memory_space<vmem>>, vector<1x8x8x64xf32>
    %c6 = arith.constant 6 : index
    %c0_93 = arith.constant 0 : index
    %102 = vector.load %arg3[%c6, %c0_93] : memref<9x64xf32, #tpu.memory_space<vmem>>, vector<1x64xf32>
    %103 = vector.shape_cast %102 : vector<1x64xf32> to vector<64xf32>
    %104 = vector.shape_cast %103 : vector<64xf32> to vector<1x1x1x64xf32>
    %105 = vector.broadcast %104 : vector<1x1x1x64xf32> to vector<1x8x8x64xf32>
    %106 = arith.mulf %101, %105 : vector<1x8x8x64xf32>
    %107 = arith.addf %100, %106 : vector<1x8x8x64xf32>
    %c0_94 = arith.constant 0 : index
    %c2_95 = arith.constant 2 : index
    %c1_96 = arith.constant 1 : index
    %c0_97 = arith.constant 0 : index
    %108 = vector.load %arg8[%c0_94, %c2_95, %c1_96, %c0_97] : memref<1x10x16x64xf32, #tpu.memory_space<vmem>>, vector<1x8x8x64xf32>
    %c7 = arith.constant 7 : index
    %c0_98 = arith.constant 0 : index
    %109 = vector.load %arg3[%c7, %c0_98] : memref<9x64xf32, #tpu.memory_space<vmem>>, vector<1x64xf32>
    %110 = vector.shape_cast %109 : vector<1x64xf32> to vector<64xf32>
    %111 = vector.shape_cast %110 : vector<64xf32> to vector<1x1x1x64xf32>
    %112 = vector.broadcast %111 : vector<1x1x1x64xf32> to vector<1x8x8x64xf32>
    %113 = arith.mulf %108, %112 : vector<1x8x8x64xf32>
    %114 = arith.addf %107, %113 : vector<1x8x8x64xf32>
    %c0_99 = arith.constant 0 : index
    %c2_100 = arith.constant 2 : index
    %c2_101 = arith.constant 2 : index
    %c0_102 = arith.constant 0 : index
    %115 = vector.load %arg8[%c0_99, %c2_100, %c2_101, %c0_102] : memref<1x10x16x64xf32, #tpu.memory_space<vmem>>, vector<1x8x8x64xf32>
    %c8 = arith.constant 8 : index
    %c0_103 = arith.constant 0 : index
    %116 = vector.load %arg3[%c8, %c0_103] : memref<9x64xf32, #tpu.memory_space<vmem>>, vector<1x64xf32>
    %117 = vector.shape_cast %116 : vector<1x64xf32> to vector<64xf32>
    %118 = vector.shape_cast %117 : vector<64xf32> to vector<1x1x1x64xf32>
    %119 = vector.broadcast %118 : vector<1x1x1x64xf32> to vector<1x8x8x64xf32>
    %120 = arith.mulf %115, %119 : vector<1x8x8x64xf32>
    %121 = arith.addf %114, %120 : vector<1x8x8x64xf32>
    %122 = vector.shape_cast %121 : vector<1x8x8x64xf32> to vector<64x64xf32>
    %123 = vector.shape_cast %122 : vector<64x64xf32> to vector<1x8x8x64xf32>
    %c0_104 = arith.constant 0 : index
    %c0_105 = arith.constant 0 : index
    %c0_106 = arith.constant 0 : index
    %c0_107 = arith.constant 0 : index
    %124 = vector.load %arg6[%c0_104, %c0_105, %c0_106, %c0_107] : memref<1x8x8x64xf32, #tpu.memory_space<vmem>>, vector<1x8x8x64xf32>
    tpu.vector_store %arg6[%c0_104, %c0_105, %c0_106, %c0_107], %123 {strides = array<i32>} : memref<1x8x8x64xf32, #tpu.memory_space<vmem>>, vector<1x8x8x64xf32>,
    %cst_108 = arith.constant dense<0.000000e+00> : vector<64xf32>
    %125 = vector.multi_reduction <add>, %122, %cst_108 [0] : vector<64x64xf32> to vector<64xf32>
    %126 = vector.shape_cast %125 : vector<64xf32> to vector<1x64xf32>
    %127 = arith.mulf %122, %122 : vector<64x64xf32>
    %cst_109 = arith.constant dense<0.000000e+00> : vector<64xf32>
    %128 = vector.multi_reduction <add>, %127, %cst_109 [0] : vector<64x64xf32> to vector<64xf32>
    %129 = vector.shape_cast %128 : vector<64xf32> to vector<1x64xf32>
    %130 = tpu.concatenate %126, %129 in 0 : vector<1x64xf32>, vector<1x64xf32> -> vector<2x64xf32>
    %131 = vector.shape_cast %130 : vector<2x64xf32> to vector<1x2x64xf32>
    %c0_110 = arith.constant 0 : index
    %c0_111 = arith.constant 0 : index
    %c0_112 = arith.constant 0 : index
    %132 = vector.load %arg7[%c0_110, %c0_111, %c0_112] : memref<1x2x64xf32, #tpu.memory_space<vmem>>, vector<1x2x64xf32>
    tpu.vector_store %arg7[%c0_110, %c0_111, %c0_112], %131 {strides = array<i32>} : memref<1x2x64xf32, #tpu.memory_space<vmem>>, vector<1x2x64xf32>,
    return
  }
  func.func @transform_0(%arg0: i32) -> (i32, i32, i32, i32) {
    %c0_i32 = arith.constant 0 : i32
    %c0_i32_0 = arith.constant 0 : i32
    %c0_i32_1 = arith.constant 0 : i32
    %c0_i32_2 = arith.constant 0 : i32
    return %arg0, %c0_i32, %c0_i32_0, %c0_i32_1 : i32, i32, i32, i32
  }
  func.func @transform_1(%arg0: i32) -> (i32, i32, i32) {
    %c0_i32 = arith.constant 0 : i32
    %c0_i32_0 = arith.constant 0 : i32
    %c0_i32_1 = arith.constant 0 : i32
    %c0_i32_2 = arith.constant 0 : i32
    return %c0_i32, %c0_i32_0, %c0_i32_1 : i32, i32, i32
  }
  func.func @transform_2(%arg0: i32) -> (i32, i32) {
    %c0_i32 = arith.constant 0 : i32
    %c0_i32_0 = arith.constant 0 : i32
    %c0_i32_1 = arith.constant 0 : i32
    return %c0_i32, %c0_i32_0 : i32, i32
  }
  func.func @transform_3(%arg0: i32) -> (i32, i32, i32, i32) {
    %c0_i32 = arith.constant 0 : i32
    %c0_i32_0 = arith.constant 0 : i32
    %c0_i32_1 = arith.constant 0 : i32
    %c0_i32_2 = arith.constant 0 : i32
    return %arg0, %c0_i32, %c0_i32_0, %c0_i32_1 : i32, i32, i32, i32
  }
  func.func @transform_4(%arg0: i32) -> (i32, i32, i32) {
    %c0_i32 = arith.constant 0 : i32
    %c0_i32_0 = arith.constant 0 : i32
    %c0_i32_1 = arith.constant 0 : i32
    return %arg0, %c0_i32, %c0_i32_0 : i32, i32, i32
  }
  func.func @transform_5(%arg0: i32) -> (i32, i32, i32, i32) {
    %c0_i32 = arith.constant 0 : i32
    %c0_i32_0 = arith.constant 0 : i32
    %c0_i32_1 = arith.constant 0 : i32
    %c0_i32_2 = arith.constant 0 : i32
    return %arg0, %c0_i32, %c0_i32_0, %c0_i32_1 : i32, i32, i32, i32
  }
  func.func @transform_6(%arg0: i32) -> (i32, i32, i32) {
    %c0_i32 = arith.constant 0 : i32
    %c0_i32_0 = arith.constant 0 : i32
    %c0_i32_1 = arith.constant 0 : i32
    return %arg0, %c0_i32, %c0_i32_0 : i32, i32, i32
  }
}

module attributes {stable_mosaic.version = 11 : i64} {
  func.func @_pass2_kernel(%arg0: i32, %arg1: memref<1x8x8x128xf32, #tpu.memory_space<vmem>>, %arg2: memref<1x8x8x64xf32, #tpu.memory_space<vmem>>, %arg3: memref<1x128xf32, #tpu.memory_space<vmem>>, %arg4: memref<1x128xf32, #tpu.memory_space<vmem>>, %arg5: memref<1x64xf32, #tpu.memory_space<vmem>>, %arg6: memref<1x64xf32, #tpu.memory_space<vmem>>, %arg7: memref<3x384x256xbf16, #tpu.memory_space<vmem>>, %arg8: memref<9x64xf32, #tpu.memory_space<vmem>>, %arg9: memref<1x8x8x256xf32, #tpu.memory_space<vmem>>, %arg10: memref<1x2x256xf32, #tpu.memory_space<vmem>>, %arg11: memref<1x8x8x64xf32, #tpu.memory_space<vmem>>, %arg12: memref<1x2x64xf32, #tpu.memory_space<vmem>>, %arg13: memref<1x10x16x128xbf16, #tpu.memory_space<vmem>>, %arg14: memref<1x10x16x64xf32, #tpu.memory_space<vmem>>) attributes {dimension_semantics = [#tpu.dimension_semantics<parallel>], iteration_bounds = array<i64: 2>, scalar_prefetch = 0 : i64, scratch_operands = 2 : i64, tpu.core_type = #tpu.core_type<tc>, window_params = [{transform_indices = @transform_0, window_bounds = array<i64: 1, 8, 8, 128>}, {transform_indices = @transform_1, window_bounds = array<i64: 1, 8, 8, 64>}, {pipeline_mode = #tpu.pipeline_mode<synchronous>, transform_indices = @transform_2, window_bounds = array<i64: 1, 128>}, {pipeline_mode = #tpu.pipeline_mode<synchronous>, transform_indices = @transform_3, window_bounds = array<i64: 1, 128>}, {pipeline_mode = #tpu.pipeline_mode<synchronous>, transform_indices = @transform_4, window_bounds = array<i64: 1, 64>}, {pipeline_mode = #tpu.pipeline_mode<synchronous>, transform_indices = @transform_5, window_bounds = array<i64: 1, 64>}, {pipeline_mode = #tpu.pipeline_mode<synchronous>, transform_indices = @transform_6, window_bounds = array<i64: 3, 384, 256>}, {pipeline_mode = #tpu.pipeline_mode<synchronous>, transform_indices = @transform_7, window_bounds = array<i64: 9, 64>}, {transform_indices = @transform_8, window_bounds = array<i64: 1, 8, 8, 256>}, {transform_indices = @transform_9, window_bounds = array<i64: 1, 2, 256>}, {transform_indices = @transform_10, window_bounds = array<i64: 1, 8, 8, 64>}, {transform_indices = @transform_11, window_bounds = array<i64: 1, 2, 64>}]} {
    %c0 = arith.constant 0 : index
    %c0_0 = arith.constant 0 : index
    %c0_1 = arith.constant 0 : index
    %c0_2 = arith.constant 0 : index
    %0 = vector.load %arg1[%c0, %c0_0, %c0_1, %c0_2] : memref<1x8x8x128xf32, #tpu.memory_space<vmem>>, vector<1x8x8x128xf32>
    %1 = vector.shape_cast %0 : vector<1x8x8x128xf32> to vector<64x128xf32>
    %c0_3 = arith.constant 0 : index
    %c0_4 = arith.constant 0 : index
    %2 = vector.load %arg3[%c0_3, %c0_4] : memref<1x128xf32, #tpu.memory_space<vmem>>, vector<1x128xf32>
    %3 = vector.broadcast %2 : vector<1x128xf32> to vector<64x128xf32>
    %4 = arith.mulf %1, %3 : vector<64x128xf32>
    %c0_5 = arith.constant 0 : index
    %c0_6 = arith.constant 0 : index
    %5 = vector.load %arg4[%c0_5, %c0_6] : memref<1x128xf32, #tpu.memory_space<vmem>>, vector<1x128xf32>
    %6 = vector.broadcast %5 : vector<1x128xf32> to vector<64x128xf32>
    %7 = arith.addf %4, %6 : vector<64x128xf32>
    %cst = arith.constant 0.000000e+00 : f32
    %8 = vector.broadcast %cst : f32 to vector<64x128xf32>
    %9 = arith.maximumf %7, %8 : vector<64x128xf32>
    %10 = vector.shape_cast %9 : vector<64x128xf32> to vector<1x8x8x128xf32>
    %cst_7 = arith.constant 0.000000e+00 : bf16
    %11 = vector.broadcast %cst_7 : bf16 to vector<1x1x16x128xbf16>
    %cst_8 = arith.constant 0.000000e+00 : bf16
    %12 = vector.broadcast %cst_8 : bf16 to vector<1x10x1x128xbf16>
    %c0_9 = arith.constant 0 : index
    %c0_10 = arith.constant 0 : index
    %c0_11 = arith.constant 0 : index
    %c0_12 = arith.constant 0 : index
    %13 = vector.load %arg13[%c0_9, %c0_10, %c0_11, %c0_12] : memref<1x10x16x128xbf16, #tpu.memory_space<vmem>>, vector<1x1x16x128xbf16>
    tpu.vector_store %arg13[%c0_9, %c0_10, %c0_11, %c0_12], %11 {strides = array<i32>} : memref<1x10x16x128xbf16, #tpu.memory_space<vmem>>, vector<1x1x16x128xbf16>,
    %c0_13 = arith.constant 0 : index
    %c9 = arith.constant 9 : index
    %c0_14 = arith.constant 0 : index
    %c0_15 = arith.constant 0 : index
    %14 = vector.load %arg13[%c0_13, %c9, %c0_14, %c0_15] : memref<1x10x16x128xbf16, #tpu.memory_space<vmem>>, vector<1x1x16x128xbf16>
    tpu.vector_store %arg13[%c0_13, %c9, %c0_14, %c0_15], %11 {strides = array<i32>} : memref<1x10x16x128xbf16, #tpu.memory_space<vmem>>, vector<1x1x16x128xbf16>,
    %c0_16 = arith.constant 0 : index
    %c0_17 = arith.constant 0 : index
    %c0_18 = arith.constant 0 : index
    %c0_19 = arith.constant 0 : index
    %15 = vector.load %arg13[%c0_16, %c0_17, %c0_18, %c0_19] : memref<1x10x16x128xbf16, #tpu.memory_space<vmem>>, vector<1x10x1x128xbf16>
    tpu.vector_store %arg13[%c0_16, %c0_17, %c0_18, %c0_19], %12 {strides = array<i32>} : memref<1x10x16x128xbf16, #tpu.memory_space<vmem>>, vector<1x10x1x128xbf16>,
    %c0_20 = arith.constant 0 : index
    %c0_21 = arith.constant 0 : index
    %c9_22 = arith.constant 9 : index
    %c0_23 = arith.constant 0 : index
    %16 = vector.load %arg13[%c0_20, %c0_21, %c9_22, %c0_23] : memref<1x10x16x128xbf16, #tpu.memory_space<vmem>>, vector<1x10x1x128xbf16>
    tpu.vector_store %arg13[%c0_20, %c0_21, %c9_22, %c0_23], %12 {strides = array<i32>} : memref<1x10x16x128xbf16, #tpu.memory_space<vmem>>, vector<1x10x1x128xbf16>,
    %17 = arith.truncf %10 : vector<1x8x8x128xf32> to vector<1x8x8x128xbf16>
    %c0_24 = arith.constant 0 : index
    %c1 = arith.constant 1 : index
    %c1_25 = arith.constant 1 : index
    %c0_26 = arith.constant 0 : index
    %18 = vector.load %arg13[%c0_24, %c1, %c1_25, %c0_26] : memref<1x10x16x128xbf16, #tpu.memory_space<vmem>>, vector<1x8x8x128xbf16>
    tpu.vector_store %arg13[%c0_24, %c1, %c1_25, %c0_26], %17 {strides = array<i32>} : memref<1x10x16x128xbf16, #tpu.memory_space<vmem>>, vector<1x8x8x128xbf16>,
    %cst_27 = arith.constant 0.000000e+00 : f32
    %19 = vector.broadcast %cst_27 : f32 to vector<64x256xf32>
    %c0_28 = arith.constant 0 : index
    %c0_29 = arith.constant 0 : index
    %c0_30 = arith.constant 0 : index
    %c0_31 = arith.constant 0 : index
    %20 = vector.load %arg13[%c0_28, %c0_29, %c0_30, %c0_31] : memref<1x10x16x128xbf16, #tpu.memory_space<vmem>>, vector<1x10x8x128xbf16>
    %21 = vector.extract_strided_slice %20 {offsets = [0, 0, 0, 0], sizes = [1, 8, 8, 128], strides = [1, 1, 1, 1]} : vector<1x10x8x128xbf16> to vector<1x8x8x128xbf16>
    %22 = vector.shape_cast %21 : vector<1x8x8x128xbf16> to vector<64x128xbf16>
    %23 = vector.extract_strided_slice %20 {offsets = [0, 1, 0, 0], sizes = [1, 8, 8, 128], strides = [1, 1, 1, 1]} : vector<1x10x8x128xbf16> to vector<1x8x8x128xbf16>
    %24 = vector.shape_cast %23 : vector<1x8x8x128xbf16> to vector<64x128xbf16>
    %25 = vector.extract_strided_slice %20 {offsets = [0, 2, 0, 0], sizes = [1, 8, 8, 128], strides = [1, 1, 1, 1]} : vector<1x10x8x128xbf16> to vector<1x8x8x128xbf16>
    %26 = vector.shape_cast %25 : vector<1x8x8x128xbf16> to vector<64x128xbf16>
    %27 = tpu.concatenate %22, %24, %26 in 1 : vector<64x128xbf16>, vector<64x128xbf16>, vector<64x128xbf16> -> vector<64x384xbf16>
    %c0_32 = arith.constant 0 : index
    %c0_33 = arith.constant 0 : index
    %c0_34 = arith.constant 0 : index
    %28 = vector.load %arg7[%c0_32, %c0_33, %c0_34] : memref<3x384x256xbf16, #tpu.memory_space<vmem>>, vector<1x384x256xbf16>
    %29 = vector.shape_cast %28 : vector<1x384x256xbf16> to vector<384x256xbf16>
    %cst_35 = arith.constant dense<0.000000e+00> : vector<64x256xf32>
    %30 = tpu.matmul %27, %29, %cst_35 {dimension_numbers = #tpu.dot_dimension_numbers<[1], [0], [0], [1], [0, 0, 1, 1], [], []>} : vector<64x384xbf16>, vector<384x256xbf16>, vector<64x256xf32> -> vector<64x256xf32>
    %31 = arith.addf %19, %30 : vector<64x256xf32>
    %c0_36 = arith.constant 0 : index
    %c0_37 = arith.constant 0 : index
    %c1_38 = arith.constant 1 : index
    %c0_39 = arith.constant 0 : index
    %32 = vector.load %arg13[%c0_36, %c0_37, %c1_38, %c0_39] : memref<1x10x16x128xbf16, #tpu.memory_space<vmem>>, vector<1x10x8x128xbf16>
    %33 = vector.extract_strided_slice %32 {offsets = [0, 0, 0, 0], sizes = [1, 8, 8, 128], strides = [1, 1, 1, 1]} : vector<1x10x8x128xbf16> to vector<1x8x8x128xbf16>
    %34 = vector.shape_cast %33 : vector<1x8x8x128xbf16> to vector<64x128xbf16>
    %35 = vector.extract_strided_slice %32 {offsets = [0, 1, 0, 0], sizes = [1, 8, 8, 128], strides = [1, 1, 1, 1]} : vector<1x10x8x128xbf16> to vector<1x8x8x128xbf16>
    %36 = vector.shape_cast %35 : vector<1x8x8x128xbf16> to vector<64x128xbf16>
    %37 = vector.extract_strided_slice %32 {offsets = [0, 2, 0, 0], sizes = [1, 8, 8, 128], strides = [1, 1, 1, 1]} : vector<1x10x8x128xbf16> to vector<1x8x8x128xbf16>
    %38 = vector.shape_cast %37 : vector<1x8x8x128xbf16> to vector<64x128xbf16>
    %39 = tpu.concatenate %34, %36, %38 in 1 : vector<64x128xbf16>, vector<64x128xbf16>, vector<64x128xbf16> -> vector<64x384xbf16>
    %c1_40 = arith.constant 1 : index
    %c0_41 = arith.constant 0 : index
    %c0_42 = arith.constant 0 : index
    %40 = vector.load %arg7[%c1_40, %c0_41, %c0_42] : memref<3x384x256xbf16, #tpu.memory_space<vmem>>, vector<1x384x256xbf16>
    %41 = vector.shape_cast %40 : vector<1x384x256xbf16> to vector<384x256xbf16>
    %cst_43 = arith.constant dense<0.000000e+00> : vector<64x256xf32>
    %42 = tpu.matmul %39, %41, %cst_43 {dimension_numbers = #tpu.dot_dimension_numbers<[1], [0], [0], [1], [0, 0, 1, 1], [], []>} : vector<64x384xbf16>, vector<384x256xbf16>, vector<64x256xf32> -> vector<64x256xf32>
    %43 = arith.addf %31, %42 : vector<64x256xf32>
    %c0_44 = arith.constant 0 : index
    %c0_45 = arith.constant 0 : index
    %c2 = arith.constant 2 : index
    %c0_46 = arith.constant 0 : index
    %44 = vector.load %arg13[%c0_44, %c0_45, %c2, %c0_46] : memref<1x10x16x128xbf16, #tpu.memory_space<vmem>>, vector<1x10x8x128xbf16>
    %45 = vector.extract_strided_slice %44 {offsets = [0, 0, 0, 0], sizes = [1, 8, 8, 128], strides = [1, 1, 1, 1]} : vector<1x10x8x128xbf16> to vector<1x8x8x128xbf16>
    %46 = vector.shape_cast %45 : vector<1x8x8x128xbf16> to vector<64x128xbf16>
    %47 = vector.extract_strided_slice %44 {offsets = [0, 1, 0, 0], sizes = [1, 8, 8, 128], strides = [1, 1, 1, 1]} : vector<1x10x8x128xbf16> to vector<1x8x8x128xbf16>
    %48 = vector.shape_cast %47 : vector<1x8x8x128xbf16> to vector<64x128xbf16>
    %49 = vector.extract_strided_slice %44 {offsets = [0, 2, 0, 0], sizes = [1, 8, 8, 128], strides = [1, 1, 1, 1]} : vector<1x10x8x128xbf16> to vector<1x8x8x128xbf16>
    %50 = vector.shape_cast %49 : vector<1x8x8x128xbf16> to vector<64x128xbf16>
    %51 = tpu.concatenate %46, %48, %50 in 1 : vector<64x128xbf16>, vector<64x128xbf16>, vector<64x128xbf16> -> vector<64x384xbf16>
    %c2_47 = arith.constant 2 : index
    %c0_48 = arith.constant 0 : index
    %c0_49 = arith.constant 0 : index
    %52 = vector.load %arg7[%c2_47, %c0_48, %c0_49] : memref<3x384x256xbf16, #tpu.memory_space<vmem>>, vector<1x384x256xbf16>
    %53 = vector.shape_cast %52 : vector<1x384x256xbf16> to vector<384x256xbf16>
    %cst_50 = arith.constant dense<0.000000e+00> : vector<64x256xf32>
    %54 = tpu.matmul %51, %53, %cst_50 {dimension_numbers = #tpu.dot_dimension_numbers<[1], [0], [0], [1], [0, 0, 1, 1], [], []>} : vector<64x384xbf16>, vector<384x256xbf16>, vector<64x256xf32> -> vector<64x256xf32>
    %55 = arith.addf %43, %54 : vector<64x256xf32>
    %56 = vector.shape_cast %55 : vector<64x256xf32> to vector<1x8x8x256xf32>
    %c0_51 = arith.constant 0 : index
    %c0_52 = arith.constant 0 : index
    %c0_53 = arith.constant 0 : index
    %c0_54 = arith.constant 0 : index
    %57 = vector.load %arg9[%c0_51, %c0_52, %c0_53, %c0_54] : memref<1x8x8x256xf32, #tpu.memory_space<vmem>>, vector<1x8x8x256xf32>
    tpu.vector_store %arg9[%c0_51, %c0_52, %c0_53, %c0_54], %56 {strides = array<i32>} : memref<1x8x8x256xf32, #tpu.memory_space<vmem>>, vector<1x8x8x256xf32>,
    %cst_55 = arith.constant dense<0.000000e+00> : vector<256xf32>
    %58 = vector.multi_reduction <add>, %55, %cst_55 [0] : vector<64x256xf32> to vector<256xf32>
    %59 = vector.shape_cast %58 : vector<256xf32> to vector<1x256xf32>
    %60 = arith.mulf %55, %55 : vector<64x256xf32>
    %cst_56 = arith.constant dense<0.000000e+00> : vector<256xf32>
    %61 = vector.multi_reduction <add>, %60, %cst_56 [0] : vector<64x256xf32> to vector<256xf32>
    %62 = vector.shape_cast %61 : vector<256xf32> to vector<1x256xf32>
    %63 = tpu.concatenate %59, %62 in 0 : vector<1x256xf32>, vector<1x256xf32> -> vector<2x256xf32>
    %64 = vector.shape_cast %63 : vector<2x256xf32> to vector<1x2x256xf32>
    %c0_57 = arith.constant 0 : index
    %c0_58 = arith.constant 0 : index
    %c0_59 = arith.constant 0 : index
    %65 = vector.load %arg10[%c0_57, %c0_58, %c0_59] : memref<1x2x256xf32, #tpu.memory_space<vmem>>, vector<1x2x256xf32>
    tpu.vector_store %arg10[%c0_57, %c0_58, %c0_59], %64 {strides = array<i32>} : memref<1x2x256xf32, #tpu.memory_space<vmem>>, vector<1x2x256xf32>,
    %c0_60 = arith.constant 0 : index
    %c0_61 = arith.constant 0 : index
    %c0_62 = arith.constant 0 : index
    %c0_63 = arith.constant 0 : index
    %66 = vector.load %arg2[%c0_60, %c0_61, %c0_62, %c0_63] : memref<1x8x8x64xf32, #tpu.memory_space<vmem>>, vector<1x8x8x64xf32>
    %67 = vector.shape_cast %66 : vector<1x8x8x64xf32> to vector<64x64xf32>
    %c0_64 = arith.constant 0 : index
    %c0_65 = arith.constant 0 : index
    %68 = vector.load %arg5[%c0_64, %c0_65] : memref<1x64xf32, #tpu.memory_space<vmem>>, vector<1x64xf32>
    %69 = vector.broadcast %68 : vector<1x64xf32> to vector<64x64xf32>
    %70 = arith.mulf %67, %69 : vector<64x64xf32>
    %c0_66 = arith.constant 0 : index
    %c0_67 = arith.constant 0 : index
    %71 = vector.load %arg6[%c0_66, %c0_67] : memref<1x64xf32, #tpu.memory_space<vmem>>, vector<1x64xf32>
    %72 = vector.broadcast %71 : vector<1x64xf32> to vector<64x64xf32>
    %73 = arith.addf %70, %72 : vector<64x64xf32>
    %cst_68 = arith.constant 0.000000e+00 : f32
    %74 = vector.broadcast %cst_68 : f32 to vector<64x64xf32>
    %75 = arith.maximumf %73, %74 : vector<64x64xf32>
    %76 = vector.shape_cast %75 : vector<64x64xf32> to vector<1x8x8x64xf32>
    %cst_69 = arith.constant 0.000000e+00 : f32
    %77 = vector.broadcast %cst_69 : f32 to vector<1x1x16x64xf32>
    %cst_70 = arith.constant 0.000000e+00 : f32
    %78 = vector.broadcast %cst_70 : f32 to vector<1x10x1x64xf32>
    %c0_71 = arith.constant 0 : index
    %c0_72 = arith.constant 0 : index
    %c0_73 = arith.constant 0 : index
    %c0_74 = arith.constant 0 : index
    %79 = vector.load %arg14[%c0_71, %c0_72, %c0_73, %c0_74] : memref<1x10x16x64xf32, #tpu.memory_space<vmem>>, vector<1x1x16x64xf32>
    tpu.vector_store %arg14[%c0_71, %c0_72, %c0_73, %c0_74], %77 {strides = array<i32>} : memref<1x10x16x64xf32, #tpu.memory_space<vmem>>, vector<1x1x16x64xf32>,
    %c0_75 = arith.constant 0 : index
    %c9_76 = arith.constant 9 : index
    %c0_77 = arith.constant 0 : index
    %c0_78 = arith.constant 0 : index
    %80 = vector.load %arg14[%c0_75, %c9_76, %c0_77, %c0_78] : memref<1x10x16x64xf32, #tpu.memory_space<vmem>>, vector<1x1x16x64xf32>
    tpu.vector_store %arg14[%c0_75, %c9_76, %c0_77, %c0_78], %77 {strides = array<i32>} : memref<1x10x16x64xf32, #tpu.memory_space<vmem>>, vector<1x1x16x64xf32>,
    %c0_79 = arith.constant 0 : index
    %c0_80 = arith.constant 0 : index
    %c0_81 = arith.constant 0 : index
    %c0_82 = arith.constant 0 : index
    %81 = vector.load %arg14[%c0_79, %c0_80, %c0_81, %c0_82] : memref<1x10x16x64xf32, #tpu.memory_space<vmem>>, vector<1x10x1x64xf32>
    tpu.vector_store %arg14[%c0_79, %c0_80, %c0_81, %c0_82], %78 {strides = array<i32>} : memref<1x10x16x64xf32, #tpu.memory_space<vmem>>, vector<1x10x1x64xf32>,
    %c0_83 = arith.constant 0 : index
    %c0_84 = arith.constant 0 : index
    %c9_85 = arith.constant 9 : index
    %c0_86 = arith.constant 0 : index
    %82 = vector.load %arg14[%c0_83, %c0_84, %c9_85, %c0_86] : memref<1x10x16x64xf32, #tpu.memory_space<vmem>>, vector<1x10x1x64xf32>
    tpu.vector_store %arg14[%c0_83, %c0_84, %c9_85, %c0_86], %78 {strides = array<i32>} : memref<1x10x16x64xf32, #tpu.memory_space<vmem>>, vector<1x10x1x64xf32>,
    %c0_87 = arith.constant 0 : index
    %c1_88 = arith.constant 1 : index
    %c1_89 = arith.constant 1 : index
    %c0_90 = arith.constant 0 : index
    %83 = vector.load %arg14[%c0_87, %c1_88, %c1_89, %c0_90] : memref<1x10x16x64xf32, #tpu.memory_space<vmem>>, vector<1x8x8x64xf32>
    tpu.vector_store %arg14[%c0_87, %c1_88, %c1_89, %c0_90], %76 {strides = array<i32>} : memref<1x10x16x64xf32, #tpu.memory_space<vmem>>, vector<1x8x8x64xf32>,
    %cst_91 = arith.constant 0.000000e+00 : f32
    %84 = vector.broadcast %cst_91 : f32 to vector<1x8x8x64xf32>
    %c0_92 = arith.constant 0 : index
    %c0_93 = arith.constant 0 : index
    %c0_94 = arith.constant 0 : index
    %c0_95 = arith.constant 0 : index
    %85 = vector.load %arg14[%c0_92, %c0_93, %c0_94, %c0_95] : memref<1x10x16x64xf32, #tpu.memory_space<vmem>>, vector<1x8x8x64xf32>
    %c0_96 = arith.constant 0 : index
    %c0_97 = arith.constant 0 : index
    %86 = vector.load %arg8[%c0_96, %c0_97] : memref<9x64xf32, #tpu.memory_space<vmem>>, vector<1x64xf32>
    %87 = vector.shape_cast %86 : vector<1x64xf32> to vector<64xf32>
    %88 = vector.shape_cast %87 : vector<64xf32> to vector<1x1x1x64xf32>
    %89 = vector.broadcast %88 : vector<1x1x1x64xf32> to vector<1x8x8x64xf32>
    %90 = arith.mulf %85, %89 : vector<1x8x8x64xf32>
    %91 = arith.addf %84, %90 : vector<1x8x8x64xf32>
    %c0_98 = arith.constant 0 : index
    %c0_99 = arith.constant 0 : index
    %c1_100 = arith.constant 1 : index
    %c0_101 = arith.constant 0 : index
    %92 = vector.load %arg14[%c0_98, %c0_99, %c1_100, %c0_101] : memref<1x10x16x64xf32, #tpu.memory_space<vmem>>, vector<1x8x8x64xf32>
    %c1_102 = arith.constant 1 : index
    %c0_103 = arith.constant 0 : index
    %93 = vector.load %arg8[%c1_102, %c0_103] : memref<9x64xf32, #tpu.memory_space<vmem>>, vector<1x64xf32>
    %94 = vector.shape_cast %93 : vector<1x64xf32> to vector<64xf32>
    %95 = vector.shape_cast %94 : vector<64xf32> to vector<1x1x1x64xf32>
    %96 = vector.broadcast %95 : vector<1x1x1x64xf32> to vector<1x8x8x64xf32>
    %97 = arith.mulf %92, %96 : vector<1x8x8x64xf32>
    %98 = arith.addf %91, %97 : vector<1x8x8x64xf32>
    %c0_104 = arith.constant 0 : index
    %c0_105 = arith.constant 0 : index
    %c2_106 = arith.constant 2 : index
    %c0_107 = arith.constant 0 : index
    %99 = vector.load %arg14[%c0_104, %c0_105, %c2_106, %c0_107] : memref<1x10x16x64xf32, #tpu.memory_space<vmem>>, vector<1x8x8x64xf32>
    %c2_108 = arith.constant 2 : index
    %c0_109 = arith.constant 0 : index
    %100 = vector.load %arg8[%c2_108, %c0_109] : memref<9x64xf32, #tpu.memory_space<vmem>>, vector<1x64xf32>
    %101 = vector.shape_cast %100 : vector<1x64xf32> to vector<64xf32>
    %102 = vector.shape_cast %101 : vector<64xf32> to vector<1x1x1x64xf32>
    %103 = vector.broadcast %102 : vector<1x1x1x64xf32> to vector<1x8x8x64xf32>
    %104 = arith.mulf %99, %103 : vector<1x8x8x64xf32>
    %105 = arith.addf %98, %104 : vector<1x8x8x64xf32>
    %c0_110 = arith.constant 0 : index
    %c1_111 = arith.constant 1 : index
    %c0_112 = arith.constant 0 : index
    %c0_113 = arith.constant 0 : index
    %106 = vector.load %arg14[%c0_110, %c1_111, %c0_112, %c0_113] : memref<1x10x16x64xf32, #tpu.memory_space<vmem>>, vector<1x8x8x64xf32>
    %c3 = arith.constant 3 : index
    %c0_114 = arith.constant 0 : index
    %107 = vector.load %arg8[%c3, %c0_114] : memref<9x64xf32, #tpu.memory_space<vmem>>, vector<1x64xf32>
    %108 = vector.shape_cast %107 : vector<1x64xf32> to vector<64xf32>
    %109 = vector.shape_cast %108 : vector<64xf32> to vector<1x1x1x64xf32>
    %110 = vector.broadcast %109 : vector<1x1x1x64xf32> to vector<1x8x8x64xf32>
    %111 = arith.mulf %106, %110 : vector<1x8x8x64xf32>
    %112 = arith.addf %105, %111 : vector<1x8x8x64xf32>
    %c0_115 = arith.constant 0 : index
    %c1_116 = arith.constant 1 : index
    %c1_117 = arith.constant 1 : index
    %c0_118 = arith.constant 0 : index
    %113 = vector.load %arg14[%c0_115, %c1_116, %c1_117, %c0_118] : memref<1x10x16x64xf32, #tpu.memory_space<vmem>>, vector<1x8x8x64xf32>
    %c4 = arith.constant 4 : index
    %c0_119 = arith.constant 0 : index
    %114 = vector.load %arg8[%c4, %c0_119] : memref<9x64xf32, #tpu.memory_space<vmem>>, vector<1x64xf32>
    %115 = vector.shape_cast %114 : vector<1x64xf32> to vector<64xf32>
    %116 = vector.shape_cast %115 : vector<64xf32> to vector<1x1x1x64xf32>
    %117 = vector.broadcast %116 : vector<1x1x1x64xf32> to vector<1x8x8x64xf32>
    %118 = arith.mulf %113, %117 : vector<1x8x8x64xf32>
    %119 = arith.addf %112, %118 : vector<1x8x8x64xf32>
    %c0_120 = arith.constant 0 : index
    %c1_121 = arith.constant 1 : index
    %c2_122 = arith.constant 2 : index
    %c0_123 = arith.constant 0 : index
    %120 = vector.load %arg14[%c0_120, %c1_121, %c2_122, %c0_123] : memref<1x10x16x64xf32, #tpu.memory_space<vmem>>, vector<1x8x8x64xf32>
    %c5 = arith.constant 5 : index
    %c0_124 = arith.constant 0 : index
    %121 = vector.load %arg8[%c5, %c0_124] : memref<9x64xf32, #tpu.memory_space<vmem>>, vector<1x64xf32>
    %122 = vector.shape_cast %121 : vector<1x64xf32> to vector<64xf32>
    %123 = vector.shape_cast %122 : vector<64xf32> to vector<1x1x1x64xf32>
    %124 = vector.broadcast %123 : vector<1x1x1x64xf32> to vector<1x8x8x64xf32>
    %125 = arith.mulf %120, %124 : vector<1x8x8x64xf32>
    %126 = arith.addf %119, %125 : vector<1x8x8x64xf32>
    %c0_125 = arith.constant 0 : index
    %c2_126 = arith.constant 2 : index
    %c0_127 = arith.constant 0 : index
    %c0_128 = arith.constant 0 : index
    %127 = vector.load %arg14[%c0_125, %c2_126, %c0_127, %c0_128] : memref<1x10x16x64xf32, #tpu.memory_space<vmem>>, vector<1x8x8x64xf32>
    %c6 = arith.constant 6 : index
    %c0_129 = arith.constant 0 : index
    %128 = vector.load %arg8[%c6, %c0_129] : memref<9x64xf32, #tpu.memory_space<vmem>>, vector<1x64xf32>
    %129 = vector.shape_cast %128 : vector<1x64xf32> to vector<64xf32>
    %130 = vector.shape_cast %129 : vector<64xf32> to vector<1x1x1x64xf32>
    %131 = vector.broadcast %130 : vector<1x1x1x64xf32> to vector<1x8x8x64xf32>
    %132 = arith.mulf %127, %131 : vector<1x8x8x64xf32>
    %133 = arith.addf %126, %132 : vector<1x8x8x64xf32>
    %c0_130 = arith.constant 0 : index
    %c2_131 = arith.constant 2 : index
    %c1_132 = arith.constant 1 : index
    %c0_133 = arith.constant 0 : index
    %134 = vector.load %arg14[%c0_130, %c2_131, %c1_132, %c0_133] : memref<1x10x16x64xf32, #tpu.memory_space<vmem>>, vector<1x8x8x64xf32>
    %c7 = arith.constant 7 : index
    %c0_134 = arith.constant 0 : index
    %135 = vector.load %arg8[%c7, %c0_134] : memref<9x64xf32, #tpu.memory_space<vmem>>, vector<1x64xf32>
    %136 = vector.shape_cast %135 : vector<1x64xf32> to vector<64xf32>
    %137 = vector.shape_cast %136 : vector<64xf32> to vector<1x1x1x64xf32>
    %138 = vector.broadcast %137 : vector<1x1x1x64xf32> to vector<1x8x8x64xf32>
    %139 = arith.mulf %134, %138 : vector<1x8x8x64xf32>
    %140 = arith.addf %133, %139 : vector<1x8x8x64xf32>
    %c0_135 = arith.constant 0 : index
    %c2_136 = arith.constant 2 : index
    %c2_137 = arith.constant 2 : index
    %c0_138 = arith.constant 0 : index
    %141 = vector.load %arg14[%c0_135, %c2_136, %c2_137, %c0_138] : memref<1x10x16x64xf32, #tpu.memory_space<vmem>>, vector<1x8x8x64xf32>
    %c8 = arith.constant 8 : index
    %c0_139 = arith.constant 0 : index
    %142 = vector.load %arg8[%c8, %c0_139] : memref<9x64xf32, #tpu.memory_space<vmem>>, vector<1x64xf32>
    %143 = vector.shape_cast %142 : vector<1x64xf32> to vector<64xf32>
    %144 = vector.shape_cast %143 : vector<64xf32> to vector<1x1x1x64xf32>
    %145 = vector.broadcast %144 : vector<1x1x1x64xf32> to vector<1x8x8x64xf32>
    %146 = arith.mulf %141, %145 : vector<1x8x8x64xf32>
    %147 = arith.addf %140, %146 : vector<1x8x8x64xf32>
    %148 = vector.shape_cast %147 : vector<1x8x8x64xf32> to vector<64x64xf32>
    %149 = vector.shape_cast %148 : vector<64x64xf32> to vector<1x8x8x64xf32>
    %c0_140 = arith.constant 0 : index
    %c0_141 = arith.constant 0 : index
    %c0_142 = arith.constant 0 : index
    %c0_143 = arith.constant 0 : index
    %150 = vector.load %arg11[%c0_140, %c0_141, %c0_142, %c0_143] : memref<1x8x8x64xf32, #tpu.memory_space<vmem>>, vector<1x8x8x64xf32>
    tpu.vector_store %arg11[%c0_140, %c0_141, %c0_142, %c0_143], %149 {strides = array<i32>} : memref<1x8x8x64xf32, #tpu.memory_space<vmem>>, vector<1x8x8x64xf32>,
    %cst_144 = arith.constant dense<0.000000e+00> : vector<64xf32>
    %151 = vector.multi_reduction <add>, %148, %cst_144 [0] : vector<64x64xf32> to vector<64xf32>
    %152 = vector.shape_cast %151 : vector<64xf32> to vector<1x64xf32>
    %153 = arith.mulf %148, %148 : vector<64x64xf32>
    %cst_145 = arith.constant dense<0.000000e+00> : vector<64xf32>
    %154 = vector.multi_reduction <add>, %153, %cst_145 [0] : vector<64x64xf32> to vector<64xf32>
    %155 = vector.shape_cast %154 : vector<64xf32> to vector<1x64xf32>
    %156 = tpu.concatenate %152, %155 in 0 : vector<1x64xf32>, vector<1x64xf32> -> vector<2x64xf32>
    %157 = vector.shape_cast %156 : vector<2x64xf32> to vector<1x2x64xf32>
    %c0_146 = arith.constant 0 : index
    %c0_147 = arith.constant 0 : index
    %c0_148 = arith.constant 0 : index
    %158 = vector.load %arg12[%c0_146, %c0_147, %c0_148] : memref<1x2x64xf32, #tpu.memory_space<vmem>>, vector<1x2x64xf32>
    tpu.vector_store %arg12[%c0_146, %c0_147, %c0_148], %157 {strides = array<i32>} : memref<1x2x64xf32, #tpu.memory_space<vmem>>, vector<1x2x64xf32>,
    return
  }
  func.func @transform_0(%arg0: i32) -> (i32, i32, i32, i32) {
    %c0_i32 = arith.constant 0 : i32
    %c0_i32_0 = arith.constant 0 : i32
    %c0_i32_1 = arith.constant 0 : i32
    %c0_i32_2 = arith.constant 0 : i32
    return %arg0, %c0_i32, %c0_i32_0, %c0_i32_1 : i32, i32, i32, i32
  }
  func.func @transform_1(%arg0: i32) -> (i32, i32, i32, i32) {
    %c0_i32 = arith.constant 0 : i32
    %c0_i32_0 = arith.constant 0 : i32
    %c0_i32_1 = arith.constant 0 : i32
    %c0_i32_2 = arith.constant 0 : i32
    return %arg0, %c0_i32, %c0_i32_0, %c0_i32_1 : i32, i32, i32, i32
  }
  func.func @transform_2(%arg0: i32) -> (i32, i32) {
    %c0_i32 = arith.constant 0 : i32
    %c0_i32_0 = arith.constant 0 : i32
    %c0_i32_1 = arith.constant 0 : i32
    return %c0_i32, %c0_i32_0 : i32, i32
  }
  func.func @transform_3(%arg0: i32) -> (i32, i32) {
    %c0_i32 = arith.constant 0 : i32
    %c0_i32_0 = arith.constant 0 : i32
    %c0_i32_1 = arith.constant 0 : i32
    return %c0_i32, %c0_i32_0 : i32, i32
  }
  func.func @transform_4(%arg0: i32) -> (i32, i32) {
    %c0_i32 = arith.constant 0 : i32
    %c0_i32_0 = arith.constant 0 : i32
    %c0_i32_1 = arith.constant 0 : i32
    return %c0_i32, %c0_i32_0 : i32, i32
  }
  func.func @transform_5(%arg0: i32) -> (i32, i32) {
    %c0_i32 = arith.constant 0 : i32
    %c0_i32_0 = arith.constant 0 : i32
    %c0_i32_1 = arith.constant 0 : i32
    return %c0_i32, %c0_i32_0 : i32, i32
  }
  func.func @transform_6(%arg0: i32) -> (i32, i32, i32) {
    %c0_i32 = arith.constant 0 : i32
    %c0_i32_0 = arith.constant 0 : i32
    %c0_i32_1 = arith.constant 0 : i32
    %c0_i32_2 = arith.constant 0 : i32
    return %c0_i32, %c0_i32_0, %c0_i32_1 : i32, i32, i32
  }
  func.func @transform_7(%arg0: i32) -> (i32, i32) {
    %c0_i32 = arith.constant 0 : i32
    %c0_i32_0 = arith.constant 0 : i32
    %c0_i32_1 = arith.constant 0 : i32
    return %c0_i32, %c0_i32_0 : i32, i32
  }
  func.func @transform_8(%arg0: i32) -> (i32, i32, i32, i32) {
    %c0_i32 = arith.constant 0 : i32
    %c0_i32_0 = arith.constant 0 : i32
    %c0_i32_1 = arith.constant 0 : i32
    %c0_i32_2 = arith.constant 0 : i32
    return %arg0, %c0_i32, %c0_i32_0, %c0_i32_1 : i32, i32, i32, i32
  }
  func.func @transform_9(%arg0: i32) -> (i32, i32, i32) {
    %c0_i32 = arith.constant 0 : i32
    %c0_i32_0 = arith.constant 0 : i32
    %c0_i32_1 = arith.constant 0 : i32
    return %arg0, %c0_i32, %c0_i32_0 : i32, i32, i32
  }
  func.func @transform_10(%arg0: i32) -> (i32, i32, i32, i32) {
    %c0_i32 = arith.constant 0 : i32
    %c0_i32_0 = arith.constant 0 : i32
    %c0_i32_1 = arith.constant 0 : i32
    %c0_i32_2 = arith.constant 0 : i32
    return %arg0, %c0_i32, %c0_i32_0, %c0_i32_1 : i32, i32, i32, i32
  }
  func.func @transform_11(%arg0: i32) -> (i32, i32, i32) {
    %c0_i32 = arith.constant 0 : i32
    %c0_i32_0 = arith.constant 0 : i32
    %c0_i32_1 = arith.constant 0 : i32
    return %arg0, %c0_i32, %c0_i32_0 : i32, i32, i32
  }
}

module attributes {stable_mosaic.version = 11 : i64} {
  func.func @_pass3_kernel(%arg0: i32, %arg1: memref<1x8x8x256xf32, #tpu.memory_space<vmem>>, %arg2: memref<1x8x8x64xf32, #tpu.memory_space<vmem>>, %arg3: memref<1x256xf32, #tpu.memory_space<vmem>>, %arg4: memref<1x256xf32, #tpu.memory_space<vmem>>, %arg5: memref<1x64xf32, #tpu.memory_space<vmem>>, %arg6: memref<1x64xf32, #tpu.memory_space<vmem>>, %arg7: memref<256x128xbf16, #tpu.memory_space<vmem>>, %arg8: memref<1x128xf32, #tpu.memory_space<vmem>>, %arg9: memref<128x192xbf16, #tpu.memory_space<vmem>>, %arg10: memref<64x192xbf16, #tpu.memory_space<vmem>>, %arg11: memref<1x64xf32, #tpu.memory_space<vmem>>, %arg12: memref<1x64xf32, #tpu.memory_space<vmem>>, %arg13: memref<1x1xf32, #tpu.memory_space<vmem>>, %arg14: memref<1x128xf32, #tpu.memory_space<vmem>>, %arg15: memref<1x8x8x128xf32, #tpu.memory_space<vmem>>) attributes {dimension_semantics = [#tpu.dimension_semantics<parallel>], iteration_bounds = array<i64: 2>, scalar_prefetch = 0 : i64, scratch_operands = 0 : i64, tpu.core_type = #tpu.core_type<tc>, window_params = [{transform_indices = @transform_0, window_bounds = array<i64: 1, 8, 8, 256>}, {transform_indices = @transform_1, window_bounds = array<i64: 1, 8, 8, 64>}, {pipeline_mode = #tpu.pipeline_mode<synchronous>, transform_indices = @transform_2, window_bounds = array<i64: 1, 256>}, {pipeline_mode = #tpu.pipeline_mode<synchronous>, transform_indices = @transform_3, window_bounds = array<i64: 1, 256>}, {pipeline_mode = #tpu.pipeline_mode<synchronous>, transform_indices = @transform_4, window_bounds = array<i64: 1, 64>}, {pipeline_mode = #tpu.pipeline_mode<synchronous>, transform_indices = @transform_5, window_bounds = array<i64: 1, 64>}, {pipeline_mode = #tpu.pipeline_mode<synchronous>, transform_indices = @transform_6, window_bounds = array<i64: 256, 128>}, {pipeline_mode = #tpu.pipeline_mode<synchronous>, transform_indices = @transform_7, window_bounds = array<i64: 1, 128>}, {pipeline_mode = #tpu.pipeline_mode<synchronous>, transform_indices = @transform_8, window_bounds = array<i64: 128, 192>}, {pipeline_mode = #tpu.pipeline_mode<synchronous>, transform_indices = @transform_9, window_bounds = array<i64: 64, 192>}, {pipeline_mode = #tpu.pipeline_mode<synchronous>, transform_indices = @transform_10, window_bounds = array<i64: 1, 64>}, {pipeline_mode = #tpu.pipeline_mode<synchronous>, transform_indices = @transform_11, window_bounds = array<i64: 1, 64>}, {pipeline_mode = #tpu.pipeline_mode<synchronous>, transform_indices = @transform_12, window_bounds = array<i64: 1, 1>}, {pipeline_mode = #tpu.pipeline_mode<synchronous>, transform_indices = @transform_13, window_bounds = array<i64: 1, 128>}, {transform_indices = @transform_14, window_bounds = array<i64: 1, 8, 8, 128>}]} {
    %c0 = arith.constant 0 : index
    %c0_0 = arith.constant 0 : index
    %c0_1 = arith.constant 0 : index
    %c0_2 = arith.constant 0 : index
    %0 = vector.load %arg1[%c0, %c0_0, %c0_1, %c0_2] : memref<1x8x8x256xf32, #tpu.memory_space<vmem>>, vector<1x8x8x256xf32>
    %1 = vector.shape_cast %0 : vector<1x8x8x256xf32> to vector<64x256xf32>
    %c0_3 = arith.constant 0 : index
    %c0_4 = arith.constant 0 : index
    %2 = vector.load %arg3[%c0_3, %c0_4] : memref<1x256xf32, #tpu.memory_space<vmem>>, vector<1x256xf32>
    %3 = vector.broadcast %2 : vector<1x256xf32> to vector<64x256xf32>
    %4 = arith.mulf %1, %3 : vector<64x256xf32>
    %c0_5 = arith.constant 0 : index
    %c0_6 = arith.constant 0 : index
    %5 = vector.load %arg4[%c0_5, %c0_6] : memref<1x256xf32, #tpu.memory_space<vmem>>, vector<1x256xf32>
    %6 = vector.broadcast %5 : vector<1x256xf32> to vector<64x256xf32>
    %7 = arith.addf %4, %6 : vector<64x256xf32>
    %cst = arith.constant 0.000000e+00 : f32
    %8 = vector.broadcast %cst : f32 to vector<64x256xf32>
    %9 = arith.maximumf %7, %8 : vector<64x256xf32>
    %10 = arith.truncf %9 : vector<64x256xf32> to vector<64x256xbf16>
    %c0_7 = arith.constant 0 : index
    %c0_8 = arith.constant 0 : index
    %11 = vector.load %arg7[%c0_7, %c0_8] : memref<256x128xbf16, #tpu.memory_space<vmem>>, vector<256x128xbf16>
    %cst_9 = arith.constant dense<0.000000e+00> : vector<64x128xf32>
    %12 = tpu.matmul %10, %11, %cst_9 {dimension_numbers = #tpu.dot_dimension_numbers<[1], [0], [0], [1], [0, 0, 1, 1], [], []>} : vector<64x256xbf16>, vector<256x128xbf16>, vector<64x128xf32> -> vector<64x128xf32>
    %c0_10 = arith.constant 0 : index
    %c0_11 = arith.constant 0 : index
    %13 = vector.load %arg8[%c0_10, %c0_11] : memref<1x128xf32, #tpu.memory_space<vmem>>, vector<1x128xf32>
    %14 = vector.broadcast %13 : vector<1x128xf32> to vector<64x128xf32>
    %15 = arith.addf %12, %14 : vector<64x128xf32>
    %c0_12 = arith.constant 0 : index
    %c0_13 = arith.constant 0 : index
    %c0_14 = arith.constant 0 : index
    %c0_15 = arith.constant 0 : index
    %16 = vector.load %arg2[%c0_12, %c0_13, %c0_14, %c0_15] : memref<1x8x8x64xf32, #tpu.memory_space<vmem>>, vector<1x8x8x64xf32>
    %17 = vector.shape_cast %16 : vector<1x8x8x64xf32> to vector<64x64xf32>
    %c0_16 = arith.constant 0 : index
    %c0_17 = arith.constant 0 : index
    %18 = vector.load %arg5[%c0_16, %c0_17] : memref<1x64xf32, #tpu.memory_space<vmem>>, vector<1x64xf32>
    %19 = vector.broadcast %18 : vector<1x64xf32> to vector<64x64xf32>
    %20 = arith.mulf %17, %19 : vector<64x64xf32>
    %c0_18 = arith.constant 0 : index
    %c0_19 = arith.constant 0 : index
    %21 = vector.load %arg6[%c0_18, %c0_19] : memref<1x64xf32, #tpu.memory_space<vmem>>, vector<1x64xf32>
    %22 = vector.broadcast %21 : vector<1x64xf32> to vector<64x64xf32>
    %23 = arith.addf %20, %22 : vector<64x64xf32>
    %cst_20 = arith.constant 0.000000e+00 : f32
    %24 = vector.broadcast %cst_20 : f32 to vector<64x64xf32>
    %25 = arith.maximumf %23, %24 : vector<64x64xf32>
    %26 = arith.truncf %15 : vector<64x128xf32> to vector<64x128xbf16>
    %c0_21 = arith.constant 0 : index
    %c0_22 = arith.constant 0 : index
    %27 = vector.load %arg9[%c0_21, %c0_22] : memref<128x192xbf16, #tpu.memory_space<vmem>>, vector<128x192xbf16>
    %cst_23 = arith.constant dense<0.000000e+00> : vector<64x192xf32>
    %28 = tpu.matmul %26, %27, %cst_23 {dimension_numbers = #tpu.dot_dimension_numbers<[1], [0], [0], [1], [0, 0, 1, 1], [], []>} : vector<64x128xbf16>, vector<128x192xbf16>, vector<64x192xf32> -> vector<64x192xf32>
    %29 = arith.truncf %25 : vector<64x64xf32> to vector<64x64xbf16>
    %c0_24 = arith.constant 0 : index
    %c0_25 = arith.constant 0 : index
    %30 = vector.load %arg10[%c0_24, %c0_25] : memref<64x192xbf16, #tpu.memory_space<vmem>>, vector<64x192xbf16>
    %cst_26 = arith.constant dense<0.000000e+00> : vector<64x192xf32>
    %31 = tpu.matmul %29, %30, %cst_26 {dimension_numbers = #tpu.dot_dimension_numbers<[1], [0], [0], [1], [0, 0, 1, 1], [], []>} : vector<64x64xbf16>, vector<64x192xbf16>, vector<64x192xf32> -> vector<64x192xf32>
    %32 = arith.addf %28, %31 : vector<64x192xf32>
    %33 = vector.extract_strided_slice %32 {offsets = [0, 128], sizes = [64, 64], strides = [1, 1]} : vector<64x192xf32> to vector<64x64xf32>
    %c0_27 = arith.constant 0 : index
    %c0_28 = arith.constant 0 : index
    %34 = vector.load %arg11[%c0_27, %c0_28] : memref<1x64xf32, #tpu.memory_space<vmem>>, vector<1x64xf32>
    %35 = vector.broadcast %34 : vector<1x64xf32> to vector<64x64xf32>
    %36 = arith.addf %33, %35 : vector<64x64xf32>
    %cst_29 = arith.constant 0.000000e+00 : f32
    %37 = vector.broadcast %cst_29 : f32 to vector<64x64xf32>
    %38 = arith.maximumf %36, %37 : vector<64x64xf32>
    %c0_30 = arith.constant 0 : index
    %c0_31 = arith.constant 0 : index
    %39 = vector.load %arg12[%c0_30, %c0_31] : memref<1x64xf32, #tpu.memory_space<vmem>>, vector<1x64xf32>
    %40 = vector.broadcast %39 : vector<1x64xf32> to vector<64x64xf32>
    %41 = arith.mulf %38, %40 : vector<64x64xf32>
    %cst_32 = arith.constant dense<0.000000e+00> : vector<64xf32>
    %42 = vector.multi_reduction <add>, %41, %cst_32 [1] : vector<64x64xf32> to vector<64xf32>
    %43 = vector.shape_cast %42 : vector<64xf32> to vector<64x1xf32>
    %c0_33 = arith.constant 0 : index
    %c0_34 = arith.constant 0 : index
    %44 = vector.load %arg13[%c0_33, %c0_34] : memref<1x1xf32, #tpu.memory_space<vmem>>, vector<1x1xf32>
    %45 = vector.broadcast %44 : vector<1x1xf32> to vector<64x1xf32>
    %46 = arith.addf %43, %45 : vector<64x1xf32>
    %47 = arith.negf %46 : vector<64x1xf32>
    %48 = math.exp %47 : vector<64x1xf32>
    %cst_35 = arith.constant 1.000000e+00 : f32
    %49 = vector.broadcast %cst_35 : f32 to vector<64x1xf32>
    %50 = arith.addf %49, %48 : vector<64x1xf32>
    %51 = arith.divf %49, %50 : vector<64x1xf32>
    %52 = vector.extract_strided_slice %32 {offsets = [0, 0], sizes = [64, 128], strides = [1, 1]} : vector<64x192xf32> to vector<64x128xf32>
    %53 = vector.broadcast %51 : vector<64x1xf32> to vector<64x128xf32>
    %54 = arith.mulf %53, %52 : vector<64x128xf32>
    %c0_36 = arith.constant 0 : index
    %c0_37 = arith.constant 0 : index
    %55 = vector.load %arg14[%c0_36, %c0_37] : memref<1x128xf32, #tpu.memory_space<vmem>>, vector<1x128xf32>
    %56 = vector.broadcast %55 : vector<1x128xf32> to vector<64x128xf32>
    %57 = arith.addf %54, %56 : vector<64x128xf32>
    %58 = vector.shape_cast %57 : vector<64x128xf32> to vector<1x8x8x128xf32>
    %c0_38 = arith.constant 0 : index
    %c0_39 = arith.constant 0 : index
    %c0_40 = arith.constant 0 : index
    %c0_41 = arith.constant 0 : index
    %59 = vector.load %arg15[%c0_38, %c0_39, %c0_40, %c0_41] : memref<1x8x8x128xf32, #tpu.memory_space<vmem>>, vector<1x8x8x128xf32>
    tpu.vector_store %arg15[%c0_38, %c0_39, %c0_40, %c0_41], %58 {strides = array<i32>} : memref<1x8x8x128xf32, #tpu.memory_space<vmem>>, vector<1x8x8x128xf32>,
    return
  }
  func.func @transform_0(%arg0: i32) -> (i32, i32, i32, i32) {
    %c0_i32 = arith.constant 0 : i32
    %c0_i32_0 = arith.constant 0 : i32
    %c0_i32_1 = arith.constant 0 : i32
    %c0_i32_2 = arith.constant 0 : i32
    return %arg0, %c0_i32, %c0_i32_0, %c0_i32_1 : i32, i32, i32, i32
  }
  func.func @transform_1(%arg0: i32) -> (i32, i32, i32, i32) {
    %c0_i32 = arith.constant 0 : i32
    %c0_i32_0 = arith.constant 0 : i32
    %c0_i32_1 = arith.constant 0 : i32
    %c0_i32_2 = arith.constant 0 : i32
    return %arg0, %c0_i32, %c0_i32_0, %c0_i32_1 : i32, i32, i32, i32
  }
  func.func @transform_2(%arg0: i32) -> (i32, i32) {
    %c0_i32 = arith.constant 0 : i32
    %c0_i32_0 = arith.constant 0 : i32
    %c0_i32_1 = arith.constant 0 : i32
    return %c0_i32, %c0_i32_0 : i32, i32
  }
  func.func @transform_3(%arg0: i32) -> (i32, i32) {
    %c0_i32 = arith.constant 0 : i32
    %c0_i32_0 = arith.constant 0 : i32
    %c0_i32_1 = arith.constant 0 : i32
    return %c0_i32, %c0_i32_0 : i32, i32
  }
  func.func @transform_4(%arg0: i32) -> (i32, i32) {
    %c0_i32 = arith.constant 0 : i32
    %c0_i32_0 = arith.constant 0 : i32
    %c0_i32_1 = arith.constant 0 : i32
    return %c0_i32, %c0_i32_0 : i32, i32
  }
  func.func @transform_5(%arg0: i32) -> (i32, i32) {
    %c0_i32 = arith.constant 0 : i32
    %c0_i32_0 = arith.constant 0 : i32
    %c0_i32_1 = arith.constant 0 : i32
    return %c0_i32, %c0_i32_0 : i32, i32
  }
  func.func @transform_6(%arg0: i32) -> (i32, i32) {
    %c0_i32 = arith.constant 0 : i32
    %c0_i32_0 = arith.constant 0 : i32
    %c0_i32_1 = arith.constant 0 : i32
    return %c0_i32, %c0_i32_0 : i32, i32
  }
  func.func @transform_7(%arg0: i32) -> (i32, i32) {
    %c0_i32 = arith.constant 0 : i32
    %c0_i32_0 = arith.constant 0 : i32
    %c0_i32_1 = arith.constant 0 : i32
    return %c0_i32, %c0_i32_0 : i32, i32
  }
  func.func @transform_8(%arg0: i32) -> (i32, i32) {
    %c0_i32 = arith.constant 0 : i32
    %c0_i32_0 = arith.constant 0 : i32
    %c0_i32_1 = arith.constant 0 : i32
    return %c0_i32, %c0_i32_0 : i32, i32
  }
  func.func @transform_9(%arg0: i32) -> (i32, i32) {
    %c0_i32 = arith.constant 0 : i32
    %c0_i32_0 = arith.constant 0 : i32
    %c0_i32_1 = arith.constant 0 : i32
    return %c0_i32, %c0_i32_0 : i32, i32
  }
  func.func @transform_10(%arg0: i32) -> (i32, i32) {
    %c0_i32 = arith.constant 0 : i32
    %c0_i32_0 = arith.constant 0 : i32
    %c0_i32_1 = arith.constant 0 : i32
    return %c0_i32, %c0_i32_0 : i32, i32
  }
  func.func @transform_11(%arg0: i32) -> (i32, i32) {
    %c0_i32 = arith.constant 0 : i32
    %c0_i32_0 = arith.constant 0 : i32
    %c0_i32_1 = arith.constant 0 : i32
    return %c0_i32, %c0_i32_0 : i32, i32
  }
  func.func @transform_12(%arg0: i32) -> (i32, i32) {
    %c0_i32 = arith.constant 0 : i32
    %c0_i32_0 = arith.constant 0 : i32
    %c0_i32_1 = arith.constant 0 : i32
    return %c0_i32, %c0_i32_0 : i32, i32
  }
  func.func @transform_13(%arg0: i32) -> (i32, i32) {
    %c0_i32 = arith.constant 0 : i32
    %c0_i32_0 = arith.constant 0 : i32
    %c0_i32_1 = arith.constant 0 : i32
    return %c0_i32, %c0_i32_0 : i32, i32
  }
  func.func @transform_14(%arg0: i32) -> (i32, i32, i32, i32) {
    %c0_i32 = arith.constant 0 : i32
    %c0_i32_0 = arith.constant 0 : i32
    %c0_i32_1 = arith.constant 0 : i32
    %c0_i32_2 = arith.constant 0 : i32
    return %arg0, %c0_i32, %c0_i32_0, %c0_i32_1 : i32, i32, i32, i32
  }
}

</mosaic_0001>

<bundles_post_ra>
// kernel: phase_correlation_forward.3
= control target key start
LH: loop header
LB: loop body
LE: loop exit
PB: predicated region body
PF: predicated region fallthrough
CT: control target
= control target key end

     0   :  { %12 = vsyncpa [#allocation4], 0  ;;  %s2705_s0 = inlined_call_operand.hbm [shape: f32[2,8,8,64], index: 0, kind: input, shape index: {}]   ;;  %s2706_s1 = inlined_call_operand.vmem [shape: bf16[3,192,128], index: 1, kind: input, shape index: {}]   ;;  %s2707_s2 = inlined_call_operand.vmem [shape: f32[9,64], index: 2, kind: input, shape index: {}]   ;;  %s2708_s3 = inlined_call_operand.vmem [shape: f32[2,8,8,128], index: 3, kind: output, shape index: {0}]   ;;  %s2709_s4 = inlined_call_operand.vmem [shape: f32[2,2,128], index: 4, kind: output, shape index: {1}]   ;;  %s2710_s5 = inlined_call_operand.vmem [shape: f32[2,8,8,64], index: 5, kind: output, shape index: {2}]   ;;  %s2711_s6 = inlined_call_operand.vmem [shape: f32[2,2,64], index: 6, kind: output, shape index: {3}]  }
   0x1   :  { %14 = vsyncpa [#allocation4 + $0x1], 0  ;;  %s1998_s21 = smov 0   ;;  %s2000_s22 = smov 0  }
   0x2   :  { %s2002_s23 = smov 0   ;;  %s2004_s24 = smov 0  }
   0x3 LB: > { %s2017_s25 = sadd.s32 4294967295, %s1955_s24   ;;  %s2020_s26 = sadd.s32 1, %s1955_s24   ;;  %s1955_s24 = sphi %s2004_s24, %s2718_s24   ;;  %s1951_s23 = sphi %s2002_s23, %s2717_s23   ;;  %s1947_s22 = sphi %s2000_s22, %s2716_s22   ;;  %s1943_s21 = sphi %s1998_s21, %s2715_s21  }
   0x4   : > { %s24_s27 = ssub.s32 %s1955_s24, %s2020_s26  ;;  %s27_s28 = sadd.s32 1, %s1951_s23 }
   0x5   : > { %p25_p0 = scmp.eq.s32.totalorder %s24_s27, 0  ;;  %p34_p1 = scmp.ne.s32.totalorder %s1951_s23, %s1947_s22 }
   0x6   : > { %p35_p2 = scmp.eq.s32.totalorder %s1955_s24, 0  ;;  %p40_p3 = scmp.ne.s32.totalorder %s1947_s22, %s1943_s21 }
   0x7   : > { %s2030_s29 = scalar_select %p25_p0, %s1951_s23, %s27_s28  }
   0x8   : > { %p36_p4 = por %p35_p2, %p34_p1  ;;  %p41_p5 = scmp.eq.s32.totalorder %s2017_s25, 0 }
   0x9   : > { %p1757_p6 = scmp.lt.s32.totalorder %s1955_s24, 2  ;;  %s216_s7 = sand.u32 1, %s1951_s23  }
   0xa   : > { %p2034_p7 = por %p41_p5, %p40_p3  ;;  %s1586_s8 = sshll.u32 %s216_s7, 6 }
   0xb   : > { %s1704_s9 = sshll.u32 %s1955_s24, 10  ;;  %s220_s13 = scalar_lea.vmem [#allocation3], %s1586_s8 }
   0xc   : > { %s2043_s12 = scalar_lea.hbm %s2705_s0, %s1704_s9  ;;  %s227_s14 = sshll.u32 %s220_s13, 4  ;;  %s2045_s14 = int_to_ptr.vmem [resolvable:$true] %s227_s14 }
   0xd   : > { %p2047_p8 = pnand %p1757_p6, %p36_p4  ;;  %s2052_s16 = scalar_lea.sflag [#allocation4], %s216_s7 }
   0xe   : > { %s1891_s17 = scalar_lea.hbm %s2043_s12, 1024  ;;  %s1896_s20 = scalar_lea.hbm %s2705_s0, 2048 }
   0xf   : > { %p1892_p10 = scmp.ne.s32.totalorder %s2043_s12, %s1891_s17  ;;  %p1893_p11 = pneg %p2047_p8 }
  0x10   : > { %p1897_p0 = scmp.lt.u32.totalorder %s2043_s12, %s2705_s0  ;;  %p1898_p1 = scmp.lt.u32.totalorder %s1896_s20, %s1891_s17 }
  0x11   : > { %p1894_p12 = pnand %p1893_p11, %p1892_p10  ;;  %p1900_p3 = scmp.lt.u32.totalorder %s1891_s17, %s2043_s12 }
  0x12   : > { %p1899_p2 = por %p1898_p1, %p1897_p0 }
  0x13   : > { %p1895_p13 = pneg %p1894_p12 }
  0x14   : > { %p1901_p4 = por %p1900_p3, %p1899_p2 }
  0x16   : > { %p1902_p5 = pnand %p1901_p4, %p1895_p13 }
  0x18   : > { %1905 = shalt.err (!%p1902_p5)
}
  0x19   : > { %s1906_s28 = scalar_lea.vmem %s2045_s14, 1024  ;;  %s1957_s7 = smov [#allocation3]  }
  0x1a   : > { %p1907_p6 = scmp.ne.s32.totalorder %s2045_s14, %s1906_s28  ;;  %s1911_s8 = sshll.u32 %s1957_s7, 4  ;;  %s1912_s8 = int_to_ptr.vmem [resolvable:$false] %s1911_s8 }
  0x1b   : > { %s1913_s9 = scalar_lea.vmem %s1912_s8, 2048  ;;  %p1914_p9 = scmp.lt.s32.totalorder %s2045_s14, %s1912_s8 }
  0x1c   : > { %p1909_p10 = pnand %p1907_p6, %p1893_p11  ;;  %p1915_p0 = scmp.lt.s32.totalorder %s1913_s9, %s1906_s28 }
  0x1e   : > { %p1910_p12 = pneg %p1909_p10  ;;  %p1916_p1 = por %p1915_p0, %p1914_p9 }
  0x20   : > { %p1917_p2 = pnand %p1916_p1, %p1910_p12 }
  0x22   : > { %1920 = shalt.err (!%p1917_p2)
}
  0x23   : > { %s1958_s10 = smov 128   ;;  %s1959_s11 = smov 8  }
  0x24   : > { %1756 = dma.hbm_to_vmem [thread:$0]  (!%p2047_p8), %s2043_s12, 1024, %s2045_s14, %s2052_s16, %s1958_s10, %s1958_s10, %s1959_s11  }
  0x25   : > { %p235_p11 = scmp.lt.s32.totalorder %s1955_s24, 3  ;;  %p2714_p13 = scmp.ge.s32.totalorder %s1955_s24, 1 }
  0x27   : > { %p236_p3 = pnand %p2714_p13, %p235_p11 }
  0x28   : > { %s241_s13 = sand.u32 (!%p236_p3), 1, %s1947_s22  }
  0x29   : > { %239 = sbr.rel (%p236_p3) target bundleno = 490 (0x1ea), region = 32  ;;  %s1590_s17 = sshll.u32 (!%p236_p3), %s241_s13, 6 }
  0x2a   : > { %s242_s18 = scalar_lea.sflag (!%p236_p3), [#allocation4], %s241_s13  ;;  %s2084_s19 = scalar_lea.vmem (!%p236_p3), [#allocation3], %s1590_s17 }
  0x30   : > { %1938 = dma.done.wait (%p2034_p7), %s242_s18, 1024  }
  0x31   : > { %1940 = vsyncadd (%p2034_p7), %s242_s18, 4294966272  ;;  %vm314_vm0 = vcmask 523264   ;;  %vm320_vm1 = vcmask 516096   ;;  %v1960_v0 = vmov 0.0   ;;  %v1961_v1 = vmov 0   ;;  %v306_v2 = vld [vmem:[%s2084_s19] sm:$0xff] }
  0x32   : > { %322 = vst.msk [vmem:[#allocation2 + $0x10] sm:$0x1] %vm320_vm1, %v1960_v0  ;;  %323 = vst.msk [vmem:[#allocation2 + $0x20] sm:$0x1] %vm320_vm1, %v1960_v0  ;;  %748 = vmatprep.subr.bf16.mxu0 %v1961_v1  ;;  %599 = vmatprep.subr.bf16.mxu1 %v1961_v1  ;;  %v307_v3 = vld [vmem:[%s2084_s19 + $0x8] sm:$0xff]  ;;  %v308_v4 = vld [vmem:[%s2084_s19 + $0x10] sm:$0xff] }
  0x33   : > { %315 = vst.msk [vmem:[#allocation2] sm:$0xff] %vm314_vm0, %v1960_v0  ;;  %316 = vst.msk [vmem:[#allocation2 + $0x8] sm:$0xff] %vm314_vm0, %v1960_v0  ;;  %v309_v5 = vld [vmem:[%s2084_s19 + $0x18] sm:$0xff]  ;;  %v310_v6 = vld [vmem:[%s2084_s19 + $0x20] sm:$0xff]  ;;  %s1962_s27 = smov 64   ;;  %p287_p7 = scmp.lt.s32.totalorder %s2017_s25, 1 }
  0x34   : > { %318 = vst.msk [vmem:[#allocation2 + $0x90] sm:$0xff] %vm314_vm0, %v1960_v0  ;;  %319 = vst.msk [vmem:[#allocation2 + $0x98] sm:$0xff] %vm314_vm0, %v1960_v0  ;;  %v311_v7 = vld [vmem:[%s2084_s19 + $0x28] sm:$0xff]  ;;  %v312_v8 = vld [vmem:[%s2084_s19 + $0x30] sm:$0xff]  ;;  %vm1095_vm2 = vcmask 1040384   ;;  %vm1419_vm3 = vcmask 517120  }
  0x35   : > { %324 = vst.msk [vmem:[#allocation2 + $0x30] sm:$0x1] %vm320_vm1, %v1960_v0  ;;  %325 = vst.msk [vmem:[#allocation2 + $0x40] sm:$0x1] %vm320_vm1, %v1960_v0  ;;  %v313_v9 = vld [vmem:[%s2084_s19 + $0x38] sm:$0xff]  ;;  %v1855_v10 = vld [vmem:[%s2706_s1] sm:$0xff]  }
  0x36   : > { %326 = vst.msk [vmem:[#allocation2 + $0x50] sm:$0x1] %vm320_vm1, %v1960_v0  ;;  %327 = vst.msk [vmem:[#allocation2 + $0x60] sm:$0x1] %vm320_vm1, %v1960_v0  ;;  %v1856_v11 = vld [vmem:[%s2706_s1 + $0x60] sm:$0xff]   ;;  %749 = vmatpush1.bf16.msra.mxu0 %v1855_v10  ;;  %v1857_v12 = vld [vmem:[%s2706_s1 + $0x8] sm:$0xff]  }
  0x37   : > { %328 = vst.msk [vmem:[#allocation2 + $0x70] sm:$0x1] %vm320_vm1, %v1960_v0  ;;  %329 = vst.msk [vmem:[#allocation2 + $0x80] sm:$0x1] %vm320_vm1, %v1960_v0  ;;  %750 = vmatprep.subr.bf16.mxu0 %v1961_v1  ;;  %600 = vmatpush1.bf16.msra.mxu1 %v1856_v11  ;;  %v1858_v13 = vld [vmem:[%s2706_s1 + $0x68] sm:$0xff]   ;;  %v1859_v38 = vld [vmem:[%s2706_s1 + $0x10] sm:$0xff]  }
  0x38   : > { %332 = vst.msk [vmem:[#allocation2 + $0x19] sm:$0x1] %vm320_vm1, %v1960_v0  ;;  %333 = vst.msk [vmem:[#allocation2 + $0x29] sm:$0x1] %vm320_vm1, %v1960_v0  ;;  %601 = vmatprep.subr.bf16.mxu1 %v1961_v1  ;;  %v1860_v39 = vld [vmem:[%s2706_s1 + $0x70] sm:$0xff]   ;;  %v1861_v42 = vld [vmem:[%s2706_s1 + $0x18] sm:$0xff]  }
  0x39   : > { %334 = vst.msk [vmem:[#allocation2 + $0x39] sm:$0x1] %vm320_vm1, %v1960_v0  ;;  %335 = vst.msk [vmem:[#allocation2 + $0x49] sm:$0x1] %vm320_vm1, %v1960_v0  ;;  %v1862_v46 = vld [vmem:[%s2706_s1 + $0x78] sm:$0xff]   ;;  %v1863_v50 = vld [vmem:[%s2706_s1 + $0x20] sm:$0xff]  }
  0x3a   : > { %336 = vst.msk [vmem:[#allocation2 + $0x59] sm:$0x1] %vm320_vm1, %v1960_v0  ;;  %337 = vst.msk [vmem:[#allocation2 + $0x69] sm:$0x1] %vm320_vm1, %v1960_v0  ;;  %751 = vmatpush1.bf16.msra.mxu0 %v1857_v12  ;;  %v1864_v54 = vld [vmem:[%s2706_s1 + $0x80] sm:$0xff]   ;;  %v1865_v56 = vld [vmem:[%s2706_s1 + $0x28] sm:$0xff]  }
  0x3b   : > { %338 = vst.msk [vmem:[#allocation2 + $0x79] sm:$0x1] %vm320_vm1, %v1960_v0  ;;  %339 = vst.msk [vmem:[#allocation2 + $0x89] sm:$0x1] %vm320_vm1, %v1960_v0  ;;  %752 = vmatprep.subr.bf16.mxu0 %v1961_v1  ;;  %602 = vmatpush1.bf16.msra.mxu1 %v1858_v13  ;;  %v1866_v59 = vld [vmem:[%s2706_s1 + $0x88] sm:$0xff]   ;;  %v1867_v60 = vld [vmem:[%s2706_s1 + $0x30] sm:$0xff]  }
  0x3c   : > { %321 = vst.msk [vmem:[#allocation2] sm:$0x1] %vm320_vm1, %v1960_v0  ;;  %330 = vst.msk [vmem:[#allocation2 + $0x90] sm:$0x1] %vm320_vm1, %v1960_v0  ;;  %603 = vmatprep.subr.bf16.mxu1 %v1961_v1  ;;  %v1868_v61 = vld [vmem:[%s2706_s1 + $0x90] sm:$0xff]   ;;  %v1869_v62 = vld [vmem:[%s2706_s1 + $0x38] sm:$0xff]  }
  0x3d   : > { %331 = vst.msk [vmem:[#allocation2 + $0x9] sm:$0x1] %vm320_vm1, %v1960_v0  ;;  %340 = vst.msk [vmem:[#allocation2 + $0x99] sm:$0x1] %vm320_vm1, %v1960_v0  ;;  %v1870_v63 = vld [vmem:[%s2706_s1 + $0x98] sm:$0xff]   ;;  %v1871_v0 = vld [vmem:[%s2706_s1 + $0x40] sm:$0xff]  }
  0x3e   : > { %342 = vst.msk [vmem:[#allocation2 + $0x11] sm:$0xff] %vm314_vm0, %v306_v2  ;;  %343 = vst.msk [vmem:[#allocation2 + $0x21] sm:$0xff] %vm314_vm0, %v307_v3  ;;  %753 = vmatpush1.bf16.msra.mxu0 %v1859_v38  ;;  %v1872_v2 = vld [vmem:[%s2706_s1 + $0xa0] sm:$0xff]   ;;  %v1873_v3 = vld [vmem:[%s2706_s1 + $0x48] sm:$0xff]   ;;  %s2720_s25 = smov (!%p287_p7, %s2017_s25), 1 }
  0x3f   : > { %344 = vst.msk [vmem:[#allocation2 + $0x31] sm:$0xff] %vm314_vm0, %v308_v4  ;;  %345 = vst.msk [vmem:[#allocation2 + $0x41] sm:$0xff] %vm314_vm0, %v309_v5  ;;  %754 = vmatprep.subr.bf16.mxu0 %v1961_v1  ;;  %604 = vmatpush1.bf16.msra.mxu1 %v1860_v39  ;;  %v1874_v4 = vld [vmem:[%s2706_s1 + $0xa8] sm:$0xff]   ;;  %v1875_v5 = vld [vmem:[%s2706_s1 + $0x50] sm:$0xff]   ;;  %s1705_s13 = sshll.u32 %s2720_s25, 6  ;;  %s1593_s24 = sshll.u32 %s2720_s25, 1 }
  0x40   : > { %346 = vst.msk [vmem:[#allocation2 + $0x51] sm:$0xff] %vm314_vm0, %v310_v6  ;;  %347 = vst.msk [vmem:[#allocation2 + $0x61] sm:$0xff] %vm314_vm0, %v311_v7  ;;  %605 = vmatprep.subr.bf16.mxu1 %v1961_v1  ;;  %v1876_v6 = vld [vmem:[%s2706_s1 + $0xb0] sm:$0xff]   ;;  %v1877_v7 = vld [vmem:[%s2706_s1 + $0x58] sm:$0xff]   ;;  %s2604_s19 = scalar_lea.vmem %s2710_s5, %s1705_s13  ;;  %s304_s14 = scalar_lea.vmem %s2711_s6, %s1593_s24 }
  0x41   : > { %348 = vst.msk [vmem:[#allocation2 + $0x71] sm:$0xff] %vm314_vm0, %v312_v8  ;;  %349 = vst.msk [vmem:[#allocation2 + $0x81] sm:$0xff] %vm314_vm0, %v313_v9  ;;  %v1878_v8 = vld [vmem:[%s2706_s1 + $0xb8] sm:$0xff]   ;;  %v2329_v38 = vld [vmem:[#allocation2 + $0x1] sm:$0xff]  ;;  %s2676_s20 = scalar_lea.vmem %s2708_s3, %s1705_s13  ;;  %s295_s7 = scalar_lea.vmem %s2709_s4, %s1593_s24 }
  0x42   : > { %755 = vmatpush1.bf16.msra.mxu0 %v1861_v42 }
  0x43   : > { %756 = vmatprep.subr.bf16.mxu0 %v1961_v1  ;;  %606 = vmatpush1.bf16.msra.mxu1 %v1862_v46  ;;  %v2318_v10 = vld [vmem:[#allocation2] sm:$0xff] }
  0x44   : > { %607 = vmatprep.subr.bf16.mxu1 %v1961_v1 }
  0x45   : > { %v2145_v14 = vld [vmem:[#allocation2 + $0x10] sm:$0xff]  ;;  %v2147_v15 = vld [vmem:[#allocation2 + $0x20] sm:$0xff] }
  0x46   : > { %v2149_v16 = vld [vmem:[#allocation2 + $0x11] sm:$0xff]  ;;  %v1795_v17 = vpack.i.bf16 %v2147_v15, %v2145_v14  ;;  %v2154_v18 = vld [vmem:[#allocation2 + $0x21] sm:$0xff]  ;;  %757 = vmatpush1.bf16.msra.mxu0 %v1863_v50 }
  0x47   : > { %v2156_v19 = vld [vmem:[#allocation2 + $0x30] sm:$0xff]  ;;  %v2158_v20 = vld [vmem:[#allocation2 + $0x40] sm:$0xff]  ;;  %v1800_v25 = vpack.i.bf16 %v2154_v18, %v2149_v16  ;;  %758 = vmatprep.subr.bf16.mxu0 %v1961_v1  ;;  %608 = vmatpush1.bf16.msra.mxu1 %v1864_v54  ;;  %v1880_v50 = vld [vmem:[%s2706_s1 + $0xc8] sm:$0xff]  }
  0x48   : > { %v2160_v21 = vld [vmem:[#allocation2 + $0x50] sm:$0xff]  ;;  %v1805_v22 = vpack.i.bf16 %v2158_v20, %v2156_v19  ;;  %v401_v24 = vpack.c.bf16 %v2156_v19, %v2147_v15  ;;  %1796 = vrot.lane.b32.xlu0 %v1795_v17, %s1962_s27  ;;  %v2171_v26 = vld [vmem:[#allocation2 + $0x60] sm:$0xff]  ;;  %609 = vmatprep.subr.bf16.mxu1 %v1961_v1 }
  0x49   : > { %v2164_v23 = vld [vmem:[#allocation2 + $0x31] sm:$0xff]  ;;  %v2177_v28 = vld [vmem:[#allocation2 + $0x41] sm:$0xff]  ;;  %v1810_v29 = vpack.i.bf16 %v2171_v26, %v2160_v21 }
  0x4a   : > { %v483_v27 = vpack.c.bf16 %v2164_v23, %v2154_v18  ;;  %1806 = vrot.lane.b32.xlu1 %v1805_v22, %s1962_s27  ;;  %v2181_v30 = vld [vmem:[#allocation2 + $0x70] sm:$0xff]  ;;  %v2183_v31 = vld [vmem:[#allocation2 + $0x80] sm:$0xff]  ;;  %1649 = vmatprep.mubr.msk.bf16.mxu0 %vm314_vm0, %v401_v24  ;;  %v1815_v33 = vpack.i.bf16 %v2177_v28, %v2164_v23  ;;  %v403_v22 = vpack.c.bf16 %v2160_v21, %v2158_v20 }
  0x4b   : > { %v2187_v32 = vld [vmem:[#allocation2 + $0x51] sm:$0xff]  ;;  %v2193_v34 = vld [vmem:[#allocation2 + $0x61] sm:$0xff]  ;;  %v1820_v37 = vpack.i.bf16 %v2183_v31, %v2181_v30  ;;  %759 = vmatpush1.bf16.msra.mxu0 %v1865_v56  ;;  %610 = vmatpush1.bf16.msra.mxu1 %v1866_v59 }
  0x4c   : > { %1633 = vmatprep.mubr.msk.bf16.mxu1 %vm314_vm0, %v483_v27  ;;  %1801 = vrot.lane.b32.xlu0 %v1800_v25, %s1962_s27  ;;  %v2195_v35 = vld [vmem:[#allocation2 + $0x71] sm:$0xff]  ;;  %v2197_v36 = vld [vmem:[#allocation2 + $0x81] sm:$0xff]  ;;  %v1825_v43 = vpack.i.bf16 %v2193_v34, %v2187_v32  ;;  %v485_v59 = vpack.c.bf16 %v2187_v32, %v2177_v28 }
  0x4d   : > { %v2208_v40 = vld [vmem:[#allocation2 + $0x12] sm:$0xff]  ;;  %v2210_v41 = vld [vmem:[#allocation2 + $0x22] sm:$0xff]  ;;  %v1830_v45 = vpack.i.bf16 %v2197_v36, %v2195_v35  ;;  %760 = vmatprep.subr.bf16.mxu0 %v1961_v1  ;;  %611 = vmatprep.subr.bf16.mxu1 %v1961_v1 }
  0x4e   : > { %1811 = vrot.lane.b32.xlu1 %v1810_v29, %s1962_s27  ;;  %v2218_v44 = vld [vmem:[#allocation2 + $0x32] sm:$0xff]  ;;  %v2227_v47 = vld [vmem:[#allocation2 + $0x42] sm:$0xff]  ;;  %v1835_v51 = vpack.i.bf16 %v2210_v41, %v2208_v40 }
  0x4f   : > { %v2230_v48 = vld [vmem:[#allocation2 + $0x52] sm:$0xff]  ;;  %v2232_v49 = vld [vmem:[#allocation2 + $0x62] sm:$0xff]  ;;  %v1840_v53 = vpack.i.bf16 %v2227_v47, %v2218_v44  ;;  %761 = vmatpush1.bf16.msra.mxu0 %v1867_v60  ;;  %612 = vmatpush1.bf16.msra.mxu1 %v1868_v61 }
  0x50   : > { %1816 = vrot.lane.b32.xlu0 %v1815_v33, %s1962_s27  ;;  %v2240_v52 = vld [vmem:[#allocation2 + $0x72] sm:$0xff]  ;;  %v2249_v55 = vld [vmem:[#allocation2 + $0x82] sm:$0xff]  ;;  %v1845_v57 = vpack.i.bf16 %v2232_v49, %v2230_v48  ;;  %762 = vmatprep.subr.bf16.mxu0 %v1961_v1 }
  0x51   : > { %v1850_v58 = vpack.i.bf16 %v2249_v55, %v2240_v52  ;;  %613 = vmatprep.subr.bf16.mxu1 %v1961_v1  ;;  %v1879_v27 = vld [vmem:[%s2706_s1 + $0xc0] sm:$0xff]   ;;  %v1881_v61 = vld [vmem:[%s2706_s1 + $0xd0] sm:$0xff]  }
  0x52   : > { %1821 = vrot.lane.b32.xlu1 %v1820_v37, %s1962_s27 }
  0x53   : > { %763 = vmatpush1.bf16.msra.mxu0 %v1869_v62  ;;  %614 = vmatpush1.bf16.msra.mxu1 %v1870_v63 }
  0x54   : > { %1826 = vrot.lane.b32.xlu0 %v1825_v43, %s1962_s27  ;;  %764 = vmatprep.subr.bf16.mxu0 %v1961_v1 }
  0x55   : > { %615 = vmatprep.subr.bf16.mxu1 %v1961_v1 }
  0x56   : > { %1831 = vrot.lane.b32.xlu1 %v1830_v45, %s1962_s27 }
  0x57   : > { %765 = vmatpush1.bf16.msra.mxu0 %v1871_v0  ;;  %616 = vmatpush1.bf16.msra.mxu1 %v1872_v2 }
  0x58   : > { %1836 = vrot.lane.b32.xlu0 %v1835_v51, %s1962_s27  ;;  %766 = vmatprep.subr.bf16.mxu0 %v1961_v1 }
  0x59   : > { %617 = vmatprep.subr.bf16.mxu1 %v1961_v1 }
  0x5a   : > { %1841 = vrot.lane.b32.xlu1 %v1840_v53, %s1962_s27 }
  0x5b   : > { %767 = vmatpush1.bf16.msra.mxu0 %v1873_v3  ;;  %618 = vmatpush1.bf16.msra.mxu1 %v1874_v4  ;;  %v405_v4 = vpack.c.bf16 %v2181_v30, %v2171_v26 }
  0x5c   : > { %1846 = vrot.lane.b32.xlu0 %v1845_v57, %s1962_s27  ;;  %768 = vmatprep.subr.bf16.mxu0 %v1961_v1 }
  0x5d   : > { %619 = vmatprep.subr.bf16.mxu1 %v1961_v1 }
  0x5e   : > { %1851 = vrot.lane.b32.xlu1 %v1850_v58, %s1962_s27 }
  0x5f   : > { %769 = vmatpush1.bf16.msra.mxu0 %v1875_v5  ;;  %620 = vmatpush1.bf16.msra.mxu1 %v1876_v6 }
  0x60   : > { %770 = vmatprep.subr.bf16.mxu0 %v1961_v1  ;;  %621 = vmatprep.subr.bf16.mxu1 %v1961_v1 }
  0x63   : > { %771 = vmatpush1.bf16.msra.mxu0 %v1877_v7  ;;  %622 = vmatpush1.bf16.msra.mxu1 %v1878_v8  ;;  %v1882_v7 = vld [vmem:[%s2706_s1 + $0xd8] sm:$0xff]  }
  0x64   : > { %980 = vmatprep.subr.bf16.mxu0 %v1961_v1  ;;  %1707 = vmatprep.subr.bf16.mxu1 %v1961_v1 }
  0xba   : > { %v1797_v9 = vpop.permute.xlu0 %1796 }
  0xbb   : > { %v1799_v11 = vunpack.i.h.bf16 %v1797_v9  ;;  %v1798_v12 = vunpack.i.l.bf16 %v1797_v9 }
  0xbc   : > { %v1807_v13 = vpop.permute.xlu1 %1806 }
  0xbd   : > { %v1808_v17 = vunpack.i.l.bf16 %v1807_v13  ;;  %v392_v24 = vsel %vm314_vm0, %v2318_v10, %v1798_v12  ;;  %v393_v25 = vsel %vm314_vm0, %v2145_v14, %v1799_v11  ;;  %v1809_v29 = vunpack.i.h.bf16 %v1807_v13 }
  0xbe   : > { %v1802_v33 = vpop.permute.xlu0 %1801  ;;  %v400_v37 = vpack.c.bf16 %v393_v25, %v392_v24  ;;  %v487_v13 = vpack.c.bf16 %v2195_v35, %v2193_v34  ;;  %v1883_v24 = vld [vmem:[%s2706_s1 + $0xe0] sm:$0xff]  }
  0xbf   : > { %v1804_v39 = vunpack.i.h.bf16 %v1802_v33  ;;  %v1803_v42 = vunpack.i.l.bf16 %v1802_v33  ;;  %v394_v43 = vsel %vm314_vm0, %v2147_v15, %v1808_v17  ;;  %v395_v51 = vsel %vm314_vm0, %v2156_v19, %v1809_v29  ;;  %v359_v17 = vld [vmem:[#allocation2 + $0x90] sm:$0xff] }
  0xc0   : > { %781 = vmatmul.mubr.bf16.vlgmr.msra.gmra.mrb[0].mxu0 %v400_v37  ;;  %v1812_v56 = vpop.permute.xlu1 %1811  ;;  %v402_v60 = vpack.c.bf16 %v395_v51, %v394_v43 }
  0xc1   : > { %981 = vmatpush1.bf16.msra.mxu0 %v1879_v27  ;;  %v474_v45 = vsel %vm314_vm0, %v2329_v38, %v1803_v42  ;;  %v475_v46 = vsel %vm314_vm0, %v2149_v16, %v1804_v39  ;;  %1650 = vmatprep.mubr.msk.bf16.mxu0 %vm314_vm0, %v403_v22  ;;  %v1814_v0 = vunpack.i.h.bf16 %v1812_v56  ;;  %v1813_v2 = vunpack.i.l.bf16 %v1812_v56  ;;  %v441_v42 = vld [vmem:[#allocation2 + $0x91] sm:$0xff] }
  0xc2   : > { %982 = vmatprep.subr.bf16.mxu0 %v1961_v1  ;;  %v482_v53 = vpack.c.bf16 %v475_v46, %v474_v45  ;;  %v1817_v54 = vpop.permute.xlu0 %1816  ;;  %v407_v39 = vpack.c.bf16 %v359_v17, %v2183_v31  ;;  %v1884_v45 = vld [vmem:[%s2706_s1 + $0xe8] sm:$0xff]   ;;  %v489_v31 = vpack.c.bf16 %v441_v42, %v2197_v36  ;;  %v1885_v56 = vld [vmem:[%s2706_s1 + $0xf0] sm:$0xff]   ;;  %v864_v36 = vpack.c.bf16 %v2218_v44, %v2210_v41 }
  0xc3   : > { %v1819_v57 = vunpack.i.h.bf16 %v1817_v54  ;;  %v1818_v58 = vunpack.i.l.bf16 %v1817_v54  ;;  %v396_v11 = vsel %vm314_vm0, %v2158_v20, %v1813_v2  ;;  %v397_v12 = vsel %vm314_vm0, %v2160_v21, %v1814_v0  ;;  %v1888_v0 = vld [vmem:[%s2706_s1 + $0x108] sm:$0xff]   ;;  %v1889_v2 = vld [vmem:[%s2706_s1 + $0x110] sm:$0xff]  }
  0xc4   : > { %632 = vmatmul.mubr.bf16.vlgmr.msra.gmra.mrb[0].mxu1 %v482_v53  ;;  %v1822_v6 = vpop.permute.xlu1 %1821  ;;  %v404_v22 = vpack.c.bf16 %v397_v12, %v396_v11  ;;  %v1890_v11 = vld [vmem:[%s2706_s1 + $0x118] sm:$0xff]  }
  0xc5   : > { %1719 = vmatpush1.bf16.msra.mxu1 %v1879_v27  ;;  %983 = vmatpush1.bf16.msra.mxu0 %v1880_v50  ;;  %v476_v62 = vsel %vm314_vm0, %v2154_v18, %v1818_v58  ;;  %v477_v63 = vsel %vm314_vm0, %v2164_v23, %v1819_v57  ;;  %v1824_v25 = vunpack.i.h.bf16 %v1822_v6  ;;  %v1823_v27 = vunpack.i.l.bf16 %v1822_v6 }
  0xc6   : > { %1708 = vmatprep.subr.bf16.mxu1 %v1961_v1  ;;  %984 = vmatprep.subr.bf16.mxu0 %v1961_v1  ;;  %v1827_v3 = vpop.permute.xlu0 %1826  ;;  %v484_v5 = vpack.c.bf16 %v477_v63, %v476_v62  ;;  %v1887_v62 = vld [vmem:[%s2706_s1 + $0x100] sm:$0xff]  }
  0xc7   : > { %1634 = vmatprep.mubr.msk.bf16.mxu1 %vm314_vm0, %v485_v59  ;;  %v1829_v8 = vunpack.i.h.bf16 %v1827_v3  ;;  %v1828_v9 = vunpack.i.l.bf16 %v1827_v3  ;;  %v398_v51 = vsel %vm314_vm0, %v2171_v26, %v1823_v27  ;;  %v399_v53 = vsel %vm314_vm0, %v2181_v30, %v1824_v25 }
  0xc8   : > { %789 = vmatmul.mubr.bf16.gmra.mrb[4].mxu0 %v402_v60  ;;  %v1832_v37 = vpop.permute.xlu1 %1831  ;;  %v406_v54 = vpack.c.bf16 %v399_v53, %v398_v51  ;;  %v1886_v60 = vld [vmem:[%s2706_s1 + $0xf8] sm:$0xff]  }
  0xc9   : > { %1720 = vmatpush1.bf16.msra.mxu1 %v1880_v50  ;;  %985 = vmatpush1.bf16.msra.mxu0 %v1881_v61  ;;  %v478_v29 = vsel %vm314_vm0, %v2177_v28, %v1828_v9  ;;  %v479_v33 = vsel %vm314_vm0, %v2187_v32, %v1829_v8  ;;  %v1834_v46 = vunpack.i.h.bf16 %v1832_v37  ;;  %v1833_v50 = vunpack.i.l.bf16 %v1832_v37 }
  0xca   : > { %1709 = vmatprep.subr.bf16.mxu1 %v1961_v1  ;;  %986 = vmatprep.subr.bf16.mxu0 %v1961_v1  ;;  %v486_v43 = vpack.c.bf16 %v479_v33, %v478_v29  ;;  %v1837_v63 = vpop.permute.xlu0 %1836 }
  0xcb   : > { %1651 = vmatprep.mubr.msk.bf16.mxu0 %vm314_vm0, %v405_v4  ;;  %v480_v57 = vsel %vm314_vm0, %v2193_v34, %v1833_v50  ;;  %v481_v58 = vsel %vm314_vm0, %v2195_v35, %v1834_v46  ;;  %v1839_v3 = vunpack.i.h.bf16 %v1837_v63  ;;  %v1838_v4 = vunpack.i.l.bf16 %v1837_v63 }
  0xcc   : > { %640 = vmatmul.mubr.bf16.gmra.mrb[4].mxu1 %v484_v5  ;;  %v488_v59 = vpack.c.bf16 %v481_v58, %v480_v57  ;;  %v813_v5 = vld [vmem:[#allocation2 + $0x2] sm:$0xff] }
  0xcd   : > { %1721 = vmatpush1.bf16.msra.mxu1 %v1881_v61  ;;  %987 = vmatpush1.bf16.msra.mxu0 %v1882_v7  ;;  %v868_v61 = vpack.c.bf16 %v2240_v52, %v2232_v49  ;;  %v856_v8 = vsel %vm314_vm0, %v2208_v40, %v1839_v3  ;;  %v855_v9 = vsel %vm314_vm0, %v813_v5, %v1838_v4 }
  0xce   : > { %1710 = vmatprep.subr.bf16.mxu1 %v1961_v1  ;;  %988 = vmatprep.subr.bf16.mxu0 %v1961_v1  ;;  %v1847_v6 = vpop.permute.xlu0 %1846  ;;  %v863_v17 = vpack.c.bf16 %v856_v8, %v855_v9 }
  0xcf   : > { %1635 = vmatprep.mubr.msk.bf16.mxu1 %vm314_vm0, %v487_v13  ;;  %v1849_v12 = vunpack.i.h.bf16 %v1847_v6  ;;  %v1848_v13 = vunpack.i.l.bf16 %v1847_v6 }
  0xd0   : > { %797 = vmatmul.mubr.bf16.gmra.mrb[8].mxu0 %v404_v22  ;;  %v866_v22 = vpack.c.bf16 %v2230_v48, %v2227_v47 }
  0xd1   : > { %1722 = vmatpush1.bf16.msra.mxu1 %v1882_v7  ;;  %989 = vmatpush1.bf16.msra.mxu0 %v1883_v24  ;;  %v1842_v7 = vpop.permute.xlu1 %1841  ;;  %v860_v25 = vsel %vm314_vm0, %v2230_v48, %v1849_v12  ;;  %v859_v27 = vsel %vm314_vm0, %v2227_v47, %v1848_v13 }
  0xd2   : > { %1711 = vmatprep.subr.bf16.mxu1 %v1961_v1  ;;  %990 = vmatprep.subr.bf16.mxu0 %v1961_v1  ;;  %v1844_v29 = vunpack.i.h.bf16 %v1842_v7  ;;  %v1843_v33 = vunpack.i.l.bf16 %v1842_v7  ;;  %v867_v42 = vpack.c.bf16 %v860_v25, %v859_v27 }
  0xd3   : > { %1652 = vmatprep.mubr.msk.bf16.mxu0 %vm314_vm0, %v407_v39 }
  0xd4   : > { %648 = vmatmul.mubr.bf16.gmra.mrb[8].mxu1 %v486_v43  ;;  %v857_v46 = vsel %vm314_vm0, %v2210_v41, %v1843_v33  ;;  %v858_v50 = vsel %vm314_vm0, %v2218_v44, %v1844_v29 }
  0xd5   : > { %1723 = vmatpush1.bf16.msra.mxu1 %v1883_v24  ;;  %991 = vmatpush1.bf16.msra.mxu0 %v1884_v45  ;;  %v822_v24 = vld [vmem:[#allocation2 + $0x92] sm:$0xff]  ;;  %v1852_v37 = vpop.permute.xlu1 %1851  ;;  %v865_v51 = vpack.c.bf16 %v858_v50, %v857_v46 }
  0xd6   : > { %1712 = vmatprep.subr.bf16.mxu1 %v1961_v1  ;;  %992 = vmatprep.subr.bf16.mxu0 %v1961_v1  ;;  %v870_v39 = vpack.c.bf16 %v822_v24, %v2249_v55  ;;  %v1854_v43 = vunpack.i.h.bf16 %v1852_v37 }
  0xd7   : > { %1636 = vmatprep.mubr.msk.bf16.mxu1 %vm314_vm0, %v489_v31  ;;  %v2457_v31 = vld [vmem:[%s2707_s2] ss:$0 sm:$0xff] }
  0xd8   : > { %805 = vmatmul.mubr.bf16.gmra.mrb[12].mxu0 %v406_v54  ;;  %v862_v55 = vsel %vm314_vm0, %v2240_v52, %v1854_v43  ;;  %v2462_v54 = vld [vmem:[%s2707_s2 + $0x1] ss:$0 sm:$0xff]  ;;  %v1112_v57 = vmul.f32 %v2457_v31, %v2145_v14  ;;  %v1116_v27 = vmul.f32 %v2457_v31, %v2160_v21 }
  0xd9   : > { %1724 = vmatpush1.bf16.msra.mxu1 %v1884_v45  ;;  %993 = vmatpush1.bf16.msra.mxu0 %v1885_v56  ;;  %v1853_v45 = vunpack.i.l.bf16 %v1852_v37  ;;  %v1140_v58 = vmul.f32 %v2462_v54, %v2329_v38  ;;  %v1143_v3 = vmul.f32 %v2462_v54, %v2164_v23  ;;  %v1144_v12 = vmul.f32 %v2462_v54, %v2177_v28 }
  0xda   : > { %1713 = vmatprep.subr.bf16.mxu1 %v1961_v1  ;;  %994 = vmatprep.subr.bf16.mxu0 %v1961_v1  ;;  %v1145_v29 = vmul.f32 %v2462_v54, %v2187_v32 }
  0xdb   : > { %1689 = vmatprep.mubr.msk.bf16.mxu0 %vm314_vm0, %v864_v36  ;;  %v1141_v36 = vmul.f32 %v2462_v54, %v2149_v16 }
  0xdc   : > { %656 = vmatmul.mubr.bf16.gmra.mrb[12].mxu1 %v488_v59  ;;  %v2475_v59 = vld [vmem:[%s2707_s2 + $0x2] ss:$0 sm:$0xff]  ;;  %v1153_v46 = vadd.f32 %v1145_v29, %v1116_v27 }
  0xdd   : > { %1725 = vmatpush1.bf16.msra.mxu1 %v1885_v56  ;;  %995 = vmatpush1.bf16.msra.mxu0 %v1886_v60  ;;  %v1111_v56 = vmul.f32 %v2457_v31, %v2318_v10  ;;  %v1142_v10 = vmul.f32 %v2462_v54, %v2154_v18  ;;  %v1169_v63 = vmul.f32 %v2475_v59, %v813_v5 }
  0xde   : > { %1714 = vmatprep.subr.bf16.mxu1 %v1961_v1  ;;  %996 = vmatprep.subr.bf16.mxu0 %v1961_v1  ;;  %v1170_v38 = vmul.f32 %v2475_v59, %v2208_v40  ;;  %v1171_v6 = vmul.f32 %v2475_v59, %v2210_v41  ;;  %v1173_v37 = vmul.f32 %v2475_v59, %v2227_v47 }
  0xdf   : > { %1691 = vmatprep.mubr.msk.bf16.mxu1 %vm314_vm0, %v868_v61  ;;  %v1148_v61 = vadd.f32 %v1140_v58, %v1111_v56  ;;  %v1174_v50 = vmul.f32 %v2475_v59, %v2230_v48 }
  0xe1   : > { %1726 = vmatpush1.bf16.msra.mxu1 %v1886_v60  ;;  %997 = vmatpush1.bf16.msra.mxu0 %v1887_v62  ;;  %v1113_v60 = vmul.f32 %v2457_v31, %v2147_v15  ;;  %v1177_v7 = vadd.f32 %v1169_v63, %v1148_v61  ;;  %v1182_v58 = vadd.f32 %v1174_v50, %v1153_v46  ;;  %v2546_v63 = vld [vmem:[%s2707_s2 + $0x6] ss:$0 sm:$0xff] }
  0xe2   : > { %1715 = vmatprep.subr.bf16.mxu1 %v1961_v1  ;;  %998 = vmatprep.subr.bf16.mxu0 %v1961_v1  ;;  %v1287_v27 = vmul.f32 %v2546_v63, %v2156_v19  ;;  %v1288_v29 = vmul.f32 %v2546_v63, %v2158_v20 }
  0xe3   : > { %v1150_v4 = vadd.f32 %v1142_v10, %v1113_v60 }
  0xe5   : > { %1727 = vmatpush1.bf16.msra.mxu1 %v1887_v62  ;;  %999 = vmatpush1.bf16.msra.mxu0 %v1888_v0  ;;  %v1149_v62 = vadd.f32 %v1141_v36, %v1112_v57  ;;  %v1179_v24 = vadd.f32 %v1171_v6, %v1150_v4 }
  0xe6   : > { %1716 = vmatprep.subr.bf16.mxu1 %v1961_v1  ;;  %1000 = vmatprep.subr.bf16.mxu0 %v1961_v1 }
  0xe7   : > { %v1178_v5 = vadd.f32 %v1170_v38, %v1149_v62  ;;  %v1273_v62 = vld [vmem:[#allocation2 + $0x20] sm:$0xff] }
  0xe9   : > { %1728 = vmatpush1.bf16.msra.mxu1 %v1888_v0  ;;  %1001 = vmatpush1.bf16.msra.mxu0 %v1889_v2  ;;  %v2487_v0 = vld [vmem:[%s2707_s2 + $0x3] ss:$0 sm:$0xff] }
  0xea   : > { %1717 = vmatprep.subr.bf16.mxu1 %v1961_v1  ;;  %1002 = vmatprep.subr.bf16.mxu0 %v1961_v1  ;;  %v1198_v8 = vmul.f32 %v2487_v0, %v2145_v14  ;;  %v1199_v9 = vmul.f32 %v2487_v0, %v2147_v15  ;;  %v1200_v14 = vmul.f32 %v2487_v0, %v2156_v19 }
  0xeb   : > { %v1203_v36 = vmul.f32 %v2487_v0, %v2171_v26 }
  0xec   : > { %v1206_v15 = vadd.f32 %v1198_v8, %v1177_v7  ;;  %v1207_v25 = vadd.f32 %v1199_v9, %v1178_v5  ;;  %v1208_v43 = vadd.f32 %v1200_v14, %v1179_v24  ;;  %v1286_v9 = vmul.f32 %v2546_v63, %v1273_v62 }
  0xed   : > { %1729 = vmatpush1.bf16.msra.mxu1 %v1889_v2  ;;  %1003 = vmatpush1.bf16.msra.mxu0 %v1890_v11  ;;  %v1114_v2 = vmul.f32 %v2457_v31, %v2156_v19  ;;  %v1211_v38 = vadd.f32 %v1203_v36, %v1182_v58 }
  0xee   : > { %1718 = vmatprep.subr.bf16.mxu1 %v1961_v1  ;;  %v861_v1 = vsel %vm314_vm0, %v2232_v49, %v1853_v45 }
  0xef   : > { %v869_v53 = vpack.c.bf16 %v862_v55, %v861_v1  ;;  %v1151_v13 = vadd.f32 %v1143_v3, %v1114_v2  ;;  %v1202_v1 = vmul.f32 %v2487_v0, %v2160_v21 }
  0xf0   : > { %1013 = vmatmul.mubr.bf16.vlgmr.msra.gmra.mrb[0].mxu0 %v863_v17  ;;  %v1172_v17 = vmul.f32 %v2475_v59, %v2218_v44 }
  0xf1   : > { %1730 = vmatpush1.bf16.msra.mxu1 %v1890_v11  ;;  %1690 = vmatprep.mubr.msk.bf16.mxu0 %vm314_vm0, %v866_v22  ;;  %v1115_v11 = vmul.f32 %v2457_v31, %v2158_v20  ;;  %v2508_v22 = vld [vmem:[%s2707_s2 + $0x4] ss:$0 sm:$0xff] }
  0xf2   : > { %v1227_v45 = vmul.f32 %v2508_v22, %v2149_v16  ;;  %v1229_v56 = vmul.f32 %v2508_v22, %v2164_v23  ;;  %v1230_v57 = vmul.f32 %v2508_v22, %v2177_v28  ;;  %v2535_v16 = vld [vmem:[%s2707_s2 + $0x5] ss:$0 sm:$0xff]  ;;  %v1232_v23 = vmul.f32 %v2508_v22, %v2193_v34 }
  0xf3   : > { %v1152_v33 = vadd.f32 %v1144_v12, %v1115_v11  ;;  %v1256_v4 = vmul.f32 %v2535_v16, %v2208_v40  ;;  %v1258_v34 = vmul.f32 %v2535_v16, %v2218_v44  ;;  %v1259_v6 = vmul.f32 %v2535_v16, %v2227_v47  ;;  %v1302_v11 = vld [vmem:[#allocation2 + $0x21] sm:$0xff] }
  0xf4   : > { %1029 = vmatmul.mubr.bf16.vlgmr.msra.gmra.mrb[16].mxu1 %v867_v42  ;;  %v1201_v42 = vmul.f32 %v2487_v0, %v2158_v20  ;;  %v1235_v10 = vadd.f32 %v1227_v45, %v1206_v15  ;;  %v1237_v28 = vadd.f32 %v1229_v56, %v1208_v43  ;;  %v1260_v7 = vmul.f32 %v2535_v16, %v2230_v48  ;;  %v2565_v12 = vld [vmem:[%s2707_s2 + $0x7] ss:$0 sm:$0xff]  ;;  %v1303_v15 = vld [vmem:[#allocation2 + $0x31] sm:$0xff] }
  0xf5   : > { %1692 = vmatprep.mubr.msk.bf16.mxu1 %vm314_vm0, %v870_v39  ;;  %v1180_v39 = vadd.f32 %v1172_v17, %v1151_v13  ;;  %v1240_v5 = vadd.f32 %v1232_v23, %v1211_v38  ;;  %v1261_v8 = vmul.f32 %v2535_v16, %v2232_v49  ;;  %v1291_v43 = vmul.f32 %v2546_v63, %v2181_v30 }
  0xf6   : > { %v1264_v40 = vadd.f32 %v1256_v4, %v1235_v10  ;;  %v1266_v17 = vadd.f32 %v1258_v34, %v1237_v28  ;;  %v1315_v19 = vmul.f32 %v2565_v12, %v1302_v11  ;;  %v1105_v28 = vld [vmem:[#allocation2 + $0x70] sm:$0xff]  ;;  %v1162_v34 = vld [vmem:[#allocation2 + $0x62] sm:$0xff] }
  0xf7   : > { %v1209_v55 = vadd.f32 %v1201_v42, %v1180_v39  ;;  %v1305_v39 = vld [vmem:[#allocation2 + $0x51] sm:$0xff]  ;;  %v1290_v42 = vmul.f32 %v2546_v63, %v2171_v26  ;;  %v1221_v11 = vld [vmem:[#allocation2 + $0x81] sm:$0xff] }
  0xf8   : > { %1021 = vmatmul.mubr.bf16.gmra.mrb[4].mxu0 %v865_v51  ;;  %v1181_v51 = vadd.f32 %v1173_v37, %v1152_v33  ;;  %v1289_v33 = vmul.f32 %v2546_v63, %v2160_v21  ;;  %v1304_v37 = vld [vmem:[#allocation2 + $0x41] sm:$0xff]  ;;  %v1294_v45 = vadd.f32 %v1286_v9, %v1264_v40  ;;  %v1296_v20 = vadd.f32 %v1288_v29, %v1266_v17 }
  0xf9   : > { %v1238_v2 = vadd.f32 %v1230_v57, %v1209_v55  ;;  %v1316_v21 = vmul.f32 %v2565_v12, %v1303_v15  ;;  %v1306_v55 = vld [vmem:[#allocation2 + $0x61] sm:$0xff]  ;;  %v1317_v30 = vmul.f32 %v2565_v12, %v1304_v37  ;;  %v1320_v57 = vmul.f32 %v2565_v12, %v2195_v35 }
  0xfa   : > { %v1210_v60 = vadd.f32 %v1202_v1, %v1181_v51  ;;  %v2587_v51 = vld [vmem:[%s2707_s2 + $0x8] ss:$0 sm:$0xff]  ;;  %v1319_v56 = vmul.f32 %v2565_v12, %v1306_v55  ;;  %v1323_v58 = vadd.f32 %v1315_v19, %v1294_v45  ;;  %v1204_v15 = vmul.f32 %v2487_v0, %v1105_v28 }
  0xfb   : > { %v1267_v24 = vadd.f32 %v1259_v6, %v1238_v2  ;;  %v1344_v23 = vmul.f32 %v2587_v51, %v2210_v41  ;;  %v1345_v10 = vmul.f32 %v2587_v51, %v2218_v44  ;;  %v1346_v38 = vmul.f32 %v2587_v51, %v2227_v47  ;;  %v1134_v2 = vld [vmem:[#allocation2 + $0x71] sm:$0xff]  ;;  %v1250_v17 = vld [vmem:[#allocation2 + $0x82] sm:$0xff] }
  0xfc   : > { %1037 = vmatmul.mubr.bf16.gmra.mrb[20].mxu1 %v869_v53  ;;  %v1228_v53 = vmul.f32 %v2508_v22, %v2154_v18  ;;  %v1231_v18 = vmul.f32 %v2508_v22, %v2187_v32  ;;  %v1257_v32 = vmul.f32 %v2535_v16, %v2210_v41  ;;  %v1347_v41 = vmul.f32 %v2587_v51, %v2230_v48  ;;  %v1163_v6 = vld [vmem:[#allocation2 + $0x72] sm:$0xff] }
  0xfd   : > { %v1297_v50 = vadd.f32 %v1289_v33, %v1267_v24  ;;  %v1348_v44 = vmul.f32 %v2587_v51, %v2232_v49  ;;  %v1352_v4 = vadd.f32 %v1344_v23, %v1323_v58  ;;  %v1118_v48 = vmul.f32 %v2457_v31, %v1105_v28 }
  0xfe   : > { %v1236_v61 = vadd.f32 %v1228_v53, %v1207_v25  ;;  %v1239_v3 = vadd.f32 %v1231_v18, %v1210_v60  ;;  %v1269_v25 = vadd.f32 %v1261_v8, %v1240_v5  ;;  %v1318_v53 = vmul.f32 %v2565_v12, %v1305_v39  ;;  %v1192_v8 = vld [vmem:[#allocation2 + $0x80] sm:$0xff] }
  0xff   : > { %v1325_v60 = vadd.f32 %v1317_v30, %v1296_v20  ;;  %1360 = vst.msk [vmem:[%s2604_s19] sm:$0xff] %vm314_vm0, %v1352_v4  ;;  %v1147_v9 = vmul.f32 %v2462_v54, %v1134_v2  ;;  %v1234_v29 = vmul.f32 %v2508_v22, %v1221_v11  ;;  %v1262_v33 = vmul.f32 %v2535_v16, %v1163_v6 }
 0x100   : > { %v1265_v13 = vadd.f32 %v1257_v32, %v1236_v61  ;;  %v1268_v14 = vadd.f32 %v1260_v7, %v1239_v3  ;;  %v1299_v26 = vadd.f32 %v1291_v43, %v1269_v25  ;;  %v1326_v18 = vadd.f32 %v1318_v53, %v1297_v50  ;;  %v1104_v61 = vld [vmem:[#allocation2 + $0x60] sm:$0xff]  ;;  %v1280_v25 = vld [vmem:[#allocation2 + $0x90] sm:$0xff] }
 0x101   : > { %v1349_v3 = vmul.f32 %v2587_v51, %v2240_v52  ;;  %v1354_v7 = vadd.f32 %v1346_v38, %v1325_v60  ;;  %v1117_v5 = vmul.f32 %v2457_v31, %v1104_v61  ;;  %v1146_v52 = vmul.f32 %v2462_v54, %v1306_v55  ;;  %v1309_v43 = vld [vmem:[#allocation2 + $0x91] sm:$0xff] }
 0x102   : > { %v1295_v46 = vadd.f32 %v1287_v27, %v1265_v13  ;;  %v1298_v1 = vadd.f32 %v1290_v42, %v1268_v14  ;;  %v1328_v62 = vadd.f32 %v1320_v57, %v1299_v26  ;;  %v1355_v47 = vadd.f32 %v1347_v41, %v1326_v18 }
 0x103   : > { %1362 = vst.msk [vmem:[%s2604_s19 + $0x10] sm:$0xff] %vm314_vm0, %v1354_v7  ;;  %v1175_v13 = vmul.f32 %v2475_v59, %v1162_v34  ;;  %v1176_v31 = vmul.f32 %v2475_v59, %v1163_v6  ;;  %v1154_v24 = vadd.f32 %v1146_v52, %v1117_v5  ;;  %v1155_v14 = vadd.f32 %v1147_v9, %v1118_v48 }
 0x104   : > { %v1324_v36 = vadd.f32 %v1316_v21, %v1295_v46  ;;  %v1327_v35 = vadd.f32 %v1319_v56, %v1298_v1  ;;  %v1357_v49 = vadd.f32 %v1349_v3, %v1328_v62  ;;  %1363 = vst.msk [vmem:[%s2604_s19 + $0x18] sm:$0xff] %vm314_vm0, %v1355_v47  ;;  %v1205_v54 = vmul.f32 %v2487_v0, %v1192_v8 }
 0x105   : > { %v1233_v27 = vmul.f32 %v2508_v22, %v1134_v2  ;;  %v1183_v37 = vadd.f32 %v1175_v13, %v1154_v24  ;;  %v1184_v59 = vadd.f32 %v1176_v31, %v1155_v14  ;;  %v1263_v39 = vmul.f32 %v2535_v16, %v1250_v17  ;;  %v1338_v22 = vld [vmem:[#allocation2 + $0x92] sm:$0xff] }
 0x106   : > { %v1353_v32 = vadd.f32 %v1345_v10, %v1324_v36  ;;  %v1356_v40 = vadd.f32 %v1348_v44, %v1327_v35  ;;  %1365 = vst.msk [vmem:[%s2604_s19 + $0x28] sm:$0xff] %vm314_vm0, %v1357_v49  ;;  %v1292_v42 = vmul.f32 %v2546_v63, %v1192_v8  ;;  %v1293_v45 = vmul.f32 %v2546_v63, %v1280_v25 }
 0x107   : > { %v1321_v19 = vmul.f32 %v2565_v12, %v1221_v11  ;;  %v1368_v0 = vsel %vm314_vm0, %v1352_v4, 0.0  ;;  %v1212_v20 = vadd.f32 %v1204_v15, %v1183_v37  ;;  %v1213_v50 = vadd.f32 %v1205_v54, %v1184_v59 }
 0x108   : > { %1361 = vst.msk [vmem:[%s2604_s19 + $0x8] sm:$0xff] %vm314_vm0, %v1353_v32  ;;  %1364 = vst.msk [vmem:[%s2604_s19 + $0x20] sm:$0xff] %vm314_vm0, %v1356_v40  ;;  %v1369_v46 = vsel %vm314_vm0, %v1353_v32, 0.0  ;;  %v1371_v1 = vsel %vm314_vm0, %v1354_v7, 0.0  ;;  %v1322_v26 = vmul.f32 %v2565_v12, %v1309_v43  ;;  %v1350_v16 = vmul.f32 %v2587_v51, %v1250_v17 }
 0x109   : > { %v1370_v21 = vadd.f32 %v1369_v46, %v1368_v0  ;;  %v1373_v55 = vsel %vm314_vm0, %v1355_v47, 0.0  ;;  %v1389_v30 = vmul.f32 %v1352_v4, %v1352_v4  ;;  %v1241_v63 = vadd.f32 %v1233_v27, %v1212_v20 }
 0x10a   : > { %v1242_v53 = vadd.f32 %v1234_v29, %v1213_v50  ;;  %v1390_v57 = vmul.f32 %v1353_v32, %v1353_v32  ;;  %v1351_v58 = vmul.f32 %v2587_v51, %v1338_v22  ;;  %v1375_v36 = vsel %vm314_vm0, %v1356_v40, 0.0 }
 0x10b   : > { %v1372_v56 = vadd.f32 %v1371_v1, %v1370_v21  ;;  %v1391_v60 = vmul.f32 %v1354_v7, %v1354_v7  ;;  %v1392_v18 = vmul.f32 %v1355_v47, %v1355_v47  ;;  %v1270_v23 = vadd.f32 %v1262_v33, %v1241_v63 }
 0x10c   : > { %v1271_v10 = vadd.f32 %v1263_v39, %v1242_v53  ;;  %v1397_v12 = vsel %vm314_vm0, %v1389_v30, 0.0  ;;  %v1377_v28 = vsel %vm314_vm0, %v1357_v49, 0.0  ;;  %v1393_v35 = vmul.f32 %v1356_v40, %v1356_v40 }
 0x10d   : > { %v1374_v61 = vadd.f32 %v1373_v55, %v1372_v56  ;;  %v1398_v62 = vsel %vm314_vm0, %v1390_v57, 0.0  ;;  %v1400_v38 = vsel %vm314_vm0, %v1391_v60, 0.0  ;;  %v1300_v41 = vadd.f32 %v1292_v42, %v1270_v23 }
 0x10e   : > { %v1301_v51 = vadd.f32 %v1293_v45, %v1271_v10  ;;  %v1399_v44 = vadd.f32 %v1398_v62, %v1397_v12  ;;  %v1402_v3 = vsel %vm314_vm0, %v1392_v18, 0.0  ;;  %v1394_v34 = vmul.f32 %v1357_v49, %v1357_v49 }
 0x10f   : > { %v1376_v2 = vadd.f32 %v1375_v36, %v1374_v61  ;;  %v1329_v4 = vadd.f32 %v1321_v19, %v1300_v41  ;;  %v1404_v8 = vsel %vm314_vm0, %v1393_v35, 0.0 }
 0x110   : > { %v1330_v32 = vadd.f32 %v1322_v26, %v1301_v51  ;;  %v1401_v6 = vadd.f32 %v1400_v38, %v1399_v44  ;;  %v1406_v11 = vsel %vm314_vm0, %v1394_v34, 0.0 }
 0x111   : > { %v1378_v7 = vadd.f32 %v1377_v28, %v1376_v2  ;;  %v1358_v47 = vadd.f32 %v1350_v16, %v1329_v4 }
 0x112   : > { %v1359_v5 = vadd.f32 %v1351_v58, %v1330_v32  ;;  %v1403_v48 = vadd.f32 %v1402_v3, %v1401_v6 }
 0x113   : > { %1366 = vst.msk [vmem:[%s2604_s19 + $0x30] sm:$0xff] %vm314_vm0, %v1358_v47  ;;  %v1379_v40 = vsel %vm314_vm0, %v1358_v47, 0.0  ;;  %v1395_v9 = vmul.f32 %v1358_v47, %v1358_v47 }
 0x114   : > { %1367 = vst.msk [vmem:[%s2604_s19 + $0x38] sm:$0xff] %vm314_vm0, %v1359_v5  ;;  %v1381_v52 = vsel %vm314_vm0, %v1359_v5, 0.0  ;;  %v1380_v13 = vadd.f32 %v1379_v40, %v1378_v7  ;;  %v1396_v49 = vmul.f32 %v1359_v5, %v1359_v5  ;;  %v1405_v31 = vadd.f32 %v1404_v8, %v1403_v48 }
 0x115   : > { %v1408_v17 = vsel %vm314_vm0, %v1395_v9, 0.0 }
 0x116   : > { %v1382_v24 = vadd.f32 %v1381_v52, %v1380_v13  ;;  %v1407_v14 = vadd.f32 %v1406_v11, %v1405_v31  ;;  %v1410_v15 = vsel %vm314_vm0, %v1396_v49, 0.0 }
 0x118   : > { %v1383_v54 = vrot.slane %v1382_v24, 4  ;;  %v1409_v25 = vadd.f32 %v1408_v17, %v1407_v14 }
 0x11a   : > { %v1384_v27 = vadd.f32 %v1383_v54, %v1382_v24  ;;  %v1411_v29 = vadd.f32 %v1410_v15, %v1409_v25 }
 0x11c   : > { %v1385_v33 = vrot.slane %v1384_v27, 2  ;;  %v1412_v37 = vrot.slane %v1411_v29, 4 }
 0x11e   : > { %v1386_v59 = vadd.f32 %v1385_v33, %v1384_v27  ;;  %v1413_v39 = vadd.f32 %v1412_v37, %v1411_v29 }
 0x120   : > { %v1387_v42 = vrot.slane %v1386_v59, 1  ;;  %v1414_v43 = vrot.slane %v1413_v39, 2 }
 0x122   : > { %v1415_v45 = vadd.f32 %v1414_v43, %v1413_v39  ;;  %v1388_v19 = vadd.f32 %v1387_v42, %v1386_v59 }
 0x124   : > { %v1416_v0 = vrot.slane %v1415_v45, 1 }
 0x126   : > { %v1417_v46 = vadd.f32 %v1416_v0, %v1415_v45 }
 0x128   : > { %v1418_v20 = vsel %vm1095_vm2, %v1388_v19, %v1417_v46 }
 0x129   : > { %1420 = vst.msk [vmem:[%s304_s14] sm:$0x3] %vm1419_vm3, %v1418_v20 }
 0x197   : > { %v633_v50 = vpop.f32.mrb[0].mxu1 }
 0x198   : > { %v635_v22 = vpop.f32.mrb[1].mxu1 }
 0x199   : > { %v636_v21 = vpop.f32.mrb[2].mxu1 }
 0x19a   : > { %v638_v1 = vpop.f32.mrb[3].mxu1 }
 0x19f   : > { %v641_v26 = vpop.f32.mrb[4].mxu1 }
 0x1a0   : > { %v643_v16 = vpop.f32.mrb[5].mxu1 }
 0x1a1   : > { %v644_v55 = vpop.f32.mrb[6].mxu1 }
 0x1a2   : > { %v646_v30 = vpop.f32.mrb[7].mxu1 }
 0x1a3   : > { %v798_v63 = vpop.f32.mrb[8].mxu0 }
 0x1a4   : > { %v800_v53 = vpop.f32.mrb[9].mxu0 }
 0x1a5   : > { %v801_v56 = vpop.f32.mrb[10].mxu0 }
 0x1a6   : > { %v803_v57 = vpop.f32.mrb[11].mxu0 }
 0x1a7   : > { %v649_v58 = vpop.f32.mrb[8].mxu1 }
 0x1a8   : > { %v799_v36 = vadd.f32 %v798_v63, %v649_v58  ;;  %v651_v60 = vpop.f32.mrb[9].mxu1 }
 0x1a9   : > { %v652_v18 = vpop.f32.mrb[10].mxu1 }
 0x1aa   : > { %v802_v23 = vadd.f32 %v801_v56, %v652_v18  ;;  %v654_v10 = vpop.f32.mrb[11].mxu1 }
 0x1ab   : > { %v806_v61 = vpop.f32.mrb[12].mxu0 }
 0x1ac   : > { %v808_v12 = vpop.f32.mrb[13].mxu0 }
 0x1ad   : > { %v809_v28 = vpop.f32.mrb[14].mxu0 }
 0x1ae   : > { %v811_v35 = vpop.f32.mrb[15].mxu0 }
 0x1af   : > { %v657_v62 = vpop.f32.mrb[12].mxu1 }
 0x1b0   : > { %v807_v38 = vadd.f32 %v806_v61, %v657_v62  ;;  %v659_v41 = vpop.f32.mrb[13].mxu1 }
 0x1b1   : > { %v660_v51 = vpop.f32.mrb[14].mxu1 }
 0x1b2   : > { %v810_v2 = vadd.f32 %v809_v28, %v660_v51  ;;  %v662_v44 = vpop.f32.mrb[15].mxu1 }
 0x1c3   : > { %v1014_v3 = vpop.f32.mrb[0].mxu0 }
 0x1c4   : > { %v1731_v4 = vadd.f32 %v1014_v3, %v633_v50  ;;  %v1016_v32 = vpop.f32.mrb[1].mxu0 }
 0x1c5   : > { %v1017_v34 = vpop.f32.mrb[2].mxu0 }
 0x1c6   : > { %1053 = vst [vmem:[%s2676_s20] sm:$0xff] %v1731_v4  ;;  %v1732_v6 = vadd.f32 %v1017_v34, %v636_v21  ;;  %v1019_v7 = vpop.f32.mrb[3].mxu0  ;;  %v1074_v5 = vmul.f32 %v1731_v4, %v1731_v4 }
 0x1c7   : > { %v1030_v47 = vpop.f32.mrb[16].mxu1 }
 0x1c8   : > { %1054 = vst [vmem:[%s2676_s20 + $0x8] sm:$0xff] %v1732_v6  ;;  %v1061_v48 = vadd.f32 %v1732_v6, %v1731_v4  ;;  %v1075_v8 = vmul.f32 %v1732_v6, %v1732_v6  ;;  %v1049_v40 = vadd.f32 %v1030_v47, %v799_v36  ;;  %v1032_v52 = vpop.f32.mrb[17].mxu1 }
 0x1c9   : > { %v1033_v9 = vpop.f32.mrb[18].mxu1 }
 0x1ca   : > { %v1082_v11 = vadd.f32 %v1075_v8, %v1074_v5  ;;  %1057 = vst [vmem:[%s2676_s20 + $0x20] sm:$0xff] %v1049_v40  ;;  %v1050_v13 = vadd.f32 %v1033_v9, %v802_v23  ;;  %v1035_v49 = vpop.f32.mrb[19].mxu1  ;;  %v1078_v45 = vmul.f32 %v1049_v40, %v1049_v40 }
 0x1cb   : > { %v1022_v31 = vpop.f32.mrb[4].mxu0 }
 0x1cc   : > { %1058 = vst [vmem:[%s2676_s20 + $0x28] sm:$0xff] %v1050_v13  ;;  %v1733_v17 = vadd.f32 %v1022_v31, %v641_v26  ;;  %v1024_v24 = vpop.f32.mrb[5].mxu0  ;;  %v1079_v50 = vmul.f32 %v1050_v13, %v1050_v13 }
 0x1cd   : > { %v1025_v14 = vpop.f32.mrb[6].mxu0 }
 0x1ce   : > { %1055 = vst [vmem:[%s2676_s20 + $0x10] sm:$0xff] %v1733_v17  ;;  %v1062_v15 = vadd.f32 %v1733_v17, %v1061_v48  ;;  %v1076_v54 = vmul.f32 %v1733_v17, %v1733_v17  ;;  %v1734_v25 = vadd.f32 %v1025_v14, %v644_v55  ;;  %v1027_v27 = vpop.f32.mrb[7].mxu0 }
 0x1cf   : > { %v1038_v29 = vpop.f32.mrb[20].mxu1 }
 0x1d0   : > { %v1083_v33 = vadd.f32 %v1082_v11, %v1076_v54  ;;  %1056 = vst [vmem:[%s2676_s20 + $0x18] sm:$0xff] %v1734_v25  ;;  %v1063_v37 = vadd.f32 %v1734_v25, %v1062_v15  ;;  %v1077_v59 = vmul.f32 %v1734_v25, %v1734_v25  ;;  %v1051_v39 = vadd.f32 %v1038_v29, %v807_v38  ;;  %v1040_v42 = vpop.f32.mrb[21].mxu1 }
 0x1d1   : > { %v1041_v43 = vpop.f32.mrb[22].mxu1 }
 0x1d2   : > { %v1064_v19 = vadd.f32 %v1063_v37, %v1049_v40  ;;  %v1084_v0 = vadd.f32 %v1083_v33, %v1077_v59  ;;  %1059 = vst [vmem:[%s2676_s20 + $0x30] sm:$0xff] %v1051_v39  ;;  %v1052_v46 = vadd.f32 %v1041_v43, %v810_v2  ;;  %v1043_v20 = vpop.f32.mrb[23].mxu1  ;;  %v1080_v26 = vmul.f32 %v1051_v39, %v1051_v39 }
 0x1d4   : > { %v1085_v22 = vadd.f32 %v1084_v0, %v1078_v45  ;;  %v1065_v21 = vadd.f32 %v1064_v19, %v1050_v13  ;;  %1060 = vst [vmem:[%s2676_s20 + $0x38] sm:$0xff] %v1052_v46  ;;  %v1081_v63 = vmul.f32 %v1052_v46, %v1052_v46 }
 0x1d6   : > { %v1066_v1 = vadd.f32 %v1065_v21, %v1051_v39  ;;  %v1086_v16 = vadd.f32 %v1085_v22, %v1079_v50 }
 0x1d8   : > { %v1087_v55 = vadd.f32 %v1086_v16, %v1080_v26  ;;  %v1067_v30 = vadd.f32 %v1066_v1, %v1052_v46 }
 0x1da   : > { %v1068_v53 = vrot.slane %v1067_v30, 4  ;;  %v1088_v56 = vadd.f32 %v1087_v55, %v1081_v63 }
 0x1dc   : > { %v1069_v57 = vadd.f32 %v1068_v53, %v1067_v30  ;;  %v1089_v58 = vrot.slane %v1088_v56, 4 }
 0x1de   : > { %v1070_v36 = vrot.slane %v1069_v57, 2  ;;  %v1090_v60 = vadd.f32 %v1089_v58, %v1088_v56 }
 0x1e0   : > { %v1071_v18 = vadd.f32 %v1070_v36, %v1069_v57  ;;  %v1091_v23 = vrot.slane %v1090_v60, 2 }
 0x1e2   : > { %v1072_v10 = vrot.slane %v1071_v18, 1  ;;  %v1092_v61 = vadd.f32 %v1091_v23, %v1090_v60 }
 0x1e4   : > { %v1093_v12 = vrot.slane %v1092_v61, 1  ;;  %v1073_v28 = vadd.f32 %v1072_v10, %v1071_v18 }
 0x1e6   : > { %v1094_v35 = vadd.f32 %v1093_v12, %v1092_v61 }
 0x1e8   : > { %v1096_v62 = vsel %vm1095_vm2, %v1073_v28, %v1094_v35 }
 0x1e9   : > { %1097 = vst [vmem:[%s295_s7] sm:$0x3] %v1096_v62 }
 0x1ea PF: > { %p17_p8 = scmp.ge.s32.totalorder %s2020_s26, 4   ;;  %s2715_s21 = smov %s1947_s22 }
 0x1eb   : > { %s2716_s22 = smov %s1951_s23  ;;  %s2717_s23 = smov %s2030_s29 }
 0x1ec   : > { %s2718_s24 = smov %s2020_s26  ;;  %19 = sbr.rel (!%p17_p8) target bundleno = 3 (0x3), region = 113 }
 0x1f3   :  { %1486 = vsyncpa [#allocation4], 1 }
 0x1f4   :  { %1488 = vsyncpa [#allocation4 + $0x1], 1 }

// kernel: phase_correlation_forward.5
= control target key start
LH: loop header
LB: loop body
LE: loop exit
PB: predicated region body
PF: predicated region fallthrough
CT: control target
= control target key end

     0   :  { %s2259_s0 = inlined_call_operand.vmem [shape: f32[2,8,8,256], index: 0, kind: input, shape index: {}]   ;;  %s2260_s1 = inlined_call_operand.vmem [shape: f32[2,8,8,64], index: 1, kind: input, shape index: {}]   ;;  %s2261_s2 = inlined_call_operand.vmem [shape: f32[1,256], index: 2, kind: input, shape index: {}]   ;;  %s2262_s3 = inlined_call_operand.vmem [shape: f32[1,256], index: 3, kind: input, shape index: {}]   ;;  %s2263_s4 = inlined_call_operand.vmem [shape: f32[1,64], index: 4, kind: input, shape index: {}]   ;;  %s2264_s5 = inlined_call_operand.vmem [shape: f32[1,64], index: 5, kind: input, shape index: {}]   ;;  %s2265_s6 = inlined_call_operand.vmem [shape: bf16[256,128], index: 6, kind: input, shape index: {}]   ;;  %s2266_s7 = inlined_call_operand.vmem [shape: f32[1,128], index: 7, kind: input, shape index: {}]   ;;  %s2267_s8 = inlined_call_operand.vmem [shape: bf16[128,192], index: 8, kind: input, shape index: {}]   ;;  %s2268_s9 = inlined_call_operand.vmem [shape: bf16[64,192], index: 9, kind: input, shape index: {}]   ;;  %s2269_s10 = inlined_call_operand.vmem [shape: f32[1,64], index: 10, kind: input, shape index: {}]   ;;  %s2270_s11 = inlined_call_operand.vmem [shape: f32[1,64], index: 11, kind: input, shape index: {}]   ;;  %s2271_s12 = inlined_call_operand.<no memory space> [shape: f32[1,1], index: 12, kind: input, shape index: {}]   ;;  %s2272_s13 = inlined_call_operand.vmem [shape: f32[1,128], index: 13, kind: input, shape index: {}]   ;;  %s2273_s14 = inlined_call_operand.hbm [shape: f32[2,8,8,128], index: 14, kind: output, shape index: {}]  }
   0x1   :  { %v19_v0 = vstv %s2271_s12 }
   0x2   :  { %20 = vst [vmem:[#allocation2] sm:$0x1] %v19_v0 }
   0x3   :  { %21 = vsyncpa [#allocation4], 0 }
   0x4   :  { %23 = vsyncpa [#allocation4 + $0x1], 0  ;;  %s1848_s15 = smov 0   ;;  %s1850_s16 = smov 0  }
   0x5   :  { %s1852_s17 = smov 0   ;;  %s1854_s18 = smov 0  }
   0x6 LB: > { %2277 = sst [smem:[#allocation6_spill]] %s1760_s17  ;;  %s1869_s12 = sadd.s32 4294967295, %s1764_s18   ;;  %s1764_s18 = sphi %s1854_s18, %s2282_s18   ;;  %s1760_s17 = sphi %s1852_s17, %s2284_s17   ;;  %s1756_s16 = sphi %s1850_s16, %s2286_s16   ;;  %s1752_s15 = sphi %s1848_s15, %s2285_s15  }
   0x7   : > { %s1426_s19 = sadd.s32 4294967294, %s1764_s18   ;;  %s1873_s20 = sadd.s32 1, %s1764_s18  }
   0x8   : > { %2278 = sst [smem:[#allocation7_spill]] %s1873_s20  ;;  %s340_s21 = sadd.s32 1, %s1760_s17 }
   0x9   : > { %s337_s22 = ssub.s32 %s1764_s18, %s1873_s20  ;;  %p350_p0 = scmp.ne.s32.totalorder %s1760_s17, %s1756_s16 }
   0xa   : > { %p338_p1 = scmp.eq.s32.totalorder %s337_s22, 0  ;;  %p351_p2 = scmp.eq.s32.totalorder %s1869_s12, 1 }
   0xb   : > { %p356_p3 = scmp.ne.s32.totalorder %s1756_s16, %s1752_s15  ;;  %p357_p4 = scmp.eq.s32.totalorder %s1426_s19, 1 }
   0xc   : > { %s1884_s23 = scalar_select %p338_p1, %s1760_s17, %s340_s21  }
   0xd   : > { %p1886_p5 = por %p351_p2, %p350_p0  ;;  %p1890_p6 = por %p357_p4, %p356_p3 }
   0xe   : > { %2279 = sst [smem:[#allocation8_spill]] %s1884_s23  ;;  %p1429_p7 = scmp.ge.s32.totalorder %s1764_s18, 1 }
   0xf   : > { %p427_p8 = scmp.lt.s32.totalorder %s1764_s18, 3 }
  0x11   : > { %p428_p9 = pnand %p1429_p7, %p427_p8 }
  0x12   : > { %v1618_v1 = vld [vmem:[%s2265_s6 + $0x40] sm:$0xff] (!%p428_p9)   ;;  %v1620_v3 = vld [vmem:[%s2265_s6 + $0x48] sm:$0xff] (!%p428_p9)   ;;  %p478_p10 = scmp.lt.s32.totalorder (!%p428_p9), %s1869_s12, 1  ;;  %v1766_v4 = vmov (!%p428_p9), 0   ;;  %v1622_v6 = vld [vmem:[%s2265_s6 + $0x50] sm:$0xff] (!%p428_p9)   ;;  %v507_v7 = vlaneseq (!%p428_p9)  ;;  %vm903_vm0 = vcmask (!%p428_p9), 523264  }
  0x13   : > { %431 = sbr.rel (%p428_p9) target bundleno = 839 (0x347), region = 76  ;;  %v1619_v2 = vld [vmem:[%s2265_s6] sm:$0xff] (!%p428_p9)   ;;  %1502 = vmatprep.subr.bf16.mxu0 (!%p428_p9), %v1618_v1  ;;  %948 = vmatprep.mubr.bf16.mxu1 (!%p428_p9), %v1766_v4  ;;  %v1621_v5 = vld [vmem:[%s2265_s6 + $0x8] sm:$0xff] (!%p428_p9)   ;;  %v1623_v8 = vld [vmem:[%s2265_s6 + $0x10] sm:$0xff] (!%p428_p9)   ;;  %s475_s17 = sand.u32 (!%p428_p9), 1, %s1756_s16  }
  0x14   : > { %1503 = vmatpush3.bf16.msra.mxu0 (!%p428_p9), %v1619_v2  ;;  %1616 = vset.pattern.permute.xlu0 (!%p428_p9), %v1766_v4  ;;  %v1624_v9 = vld [vmem:[%s2265_s6 + $0x58] sm:$0xff] (!%p428_p9)   ;;  %v508_v10 = vshrl.u32 (!%p428_p9), %v507_v7, 7  ;;  %v1626_v12 = vld [vmem:[%s2265_s6 + $0x60] sm:$0xff] (!%p428_p9)   ;;  %v1628_v16 = vld [vmem:[%s2265_s6 + $0x68] sm:$0xff] (!%p428_p9)   ;;  %s1430_s23 = sshll.u32 (!%p428_p9), %s475_s17, 6  ;;  %s1501_s29 = sshll.u32 (!%p428_p9), %s1869_s12, 10 }
  0x15   : > { %1504 = vmatprep.subr.bf16.mxu0 (!%p428_p9), %v1620_v3  ;;  %1617 = vset.pattern.permute.xlu1 (!%p428_p9), %v1766_v4  ;;  %v1625_v11 = vld [vmem:[%s2265_s6 + $0x18] sm:$0xff] (!%p428_p9)   ;;  %v1627_v15 = vld [vmem:[%s2265_s6 + $0x20] sm:$0xff] (!%p428_p9)   ;;  %v1629_v29 = vld [vmem:[%s2265_s6 + $0x28] sm:$0xff] (!%p428_p9)   ;;  %s2190_s27 = scalar_lea.vmem (!%p428_p9), [#allocation3], %s1430_s23  ;;  %s2218_s21 = scalar_lea.sflag (!%p428_p9), [#allocation4], %s475_s17 }
  0x16   : > { %v509_v13 = vsub.s32 (!%p428_p9), 0, %v508_v10  ;;  %v513_v14 = vsub.s32 (!%p428_p9), 1, %v508_v10  ;;  %v505_v19 = vld [vmem:[%s2261_s2] sm:$0x3] (!%p428_p9)  ;;  %v1630_v35 = vld [vmem:[%s2265_s6 + $0x70] sm:$0xff] (!%p428_p9)   ;;  %v1632_v46 = vld [vmem:[%s2265_s6 + $0x78] sm:$0xff] (!%p428_p9)  }
  0x17   : > { %v533_v22 = vld [vmem:[%s2262_s3] sm:$0x3] (!%p428_p9)  ;;  %v1631_v38 = vld [vmem:[%s2265_s6 + $0x30] sm:$0xff] (!%p428_p9)   ;;  %v1634_v45 = vld [vmem:[%s2268_s9 + $0x4] ss:$8 sps:$4 sm:$0xff] (!%p428_p9)   ;;  %s1767_s23 = smov (!%p428_p9), [#allocation3]  }
  0x18   : > { %1505 = vmatpush3.bf16.msra.mxu0 (!%p428_p9), %v1621_v5  ;;  %v1947_v20 = vrot.slane (!%p428_p9), %v505_v19, %v509_v13  ;;  %v1949_v21 = vrot.slane (!%p428_p9), %v505_v19, %v513_v14  ;;  %v1956_v25 = vrot.slane (!%p428_p9), %v533_v22, %v509_v13  ;;  %v1958_v26 = vrot.slane (!%p428_p9), %v533_v22, %v513_v14  ;;  %v1636_v52 = vld [vmem:[%s2268_s9] ss:$8 sps:$4 sm:$0xff] (!%p428_p9)   ;;  %v1637_v56 = vld [vmem:[%s2268_s9 + $0x14] ss:$8 sps:$4 sm:$0xff] (!%p428_p9)   ;;  %v1639_v60 = vld [vmem:[%s2268_s9 + $0x10] ss:$8 sps:$4 sm:$0xff] (!%p428_p9)  }
  0x19   : > { %1506 = vmatprep.subr.bf16.mxu0 (!%p428_p9), %v1622_v6  ;;  %916 = vmatprep.subr.bf16.mxu1 (!%p428_p9), %v1634_v45  ;;  %v1633_v61 = vld [vmem:[%s2265_s6 + $0x38] sm:$0xff] (!%p428_p9)   ;;  %v1640_v2 = vld [vmem:[%s2268_s9 + $0x24] ss:$8 sps:$4 sm:$0xff] (!%p428_p9)  }
  0x1a   : > { %s1916_s28 = scalar_select %p478_p10, %s1869_s12, 1  ;;  %917 = vmatpush1.bf16.msra.mxu1 %v1636_v52  ;;  %v2018_v5 = vld [vmem:[%s2267_s8 + $0x4] ss:$8 sps:$4 sm:$0xff]   ;;  %v1650_v22 = vld [vmem:[%s2267_s8 + $0x14] ss:$8 sps:$4 sm:$0xff]  }
  0x1b   : > { %918 = vmatprep.subr.bf16.mxu1 %v1637_v56  ;;  %v1657_v56 = vld [vmem:[%s2267_s8 + $0x34] ss:$8 sps:$4 sm:$0xff]  }
  0x1c   : > { %s1499_s22 = sshll.u32 %s1916_s28, 7  ;;  %1507 = vmatpush3.bf16.msra.mxu0 %v1623_v8  ;;  %s1500_s20 = sshll.u32 %s1916_s28, 6 }
  0x1d   : > { %1508 = vmatprep.subr.bf16.mxu0 %v1624_v9  ;;  %s1934_s30 = scalar_lea.vmem %s2259_s0, %s1499_s22  ;;  %s2023_s26 = scalar_lea.vmem %s2260_s1, %s1500_s20 }
  0x1e   : > { %v490_v17 = vld [vmem:[%s1934_s30 + $0x8] sm:$0xff]  ;;  %v492_v18 = vld [vmem:[%s1934_s30 + $0x18] sm:$0xff]  ;;  %v489_v23 = vld [vmem:[%s1934_s30] sm:$0xff]  ;;  %919 = vmatpush1.bf16.msra.mxu1 %v1639_v60  ;;  %s1352_s28 = sshll.u32 %s2190_s27, 4  ;;  %s2211_s20 = scalar_lea.hbm %s2273_s14, %s1501_s29  ;;  %s2213_s28 = int_to_ptr.vmem [resolvable:$true] %s1352_s28 }
  0x1f   : > { %v491_v24 = vld [vmem:[%s1934_s30 + $0x10] sm:$0xff]  ;;  %v494_v27 = vld [vmem:[%s1934_s30 + $0x28] sm:$0xff]  ;;  %v496_v28 = vld [vmem:[%s1934_s30 + $0x38] sm:$0xff]  ;;  %v518_v30 = vmul.f32 %v1949_v21, %v490_v17  ;;  %v520_v31 = vmul.f32 %v1949_v21, %v492_v18  ;;  %v517_v32 = vmul.f32 %v1947_v20, %v489_v23  ;;  %920 = vmatprep.subr.bf16.mxu1 %v1640_v2  ;;  %s1702_s12 = scalar_lea.vmem %s2213_s28, 1024  ;;  %s1706_s22 = sshll.u32 %s1767_s23, 4  ;;  %s1707_s22 = int_to_ptr.vmem [resolvable:$false] %s1706_s22 }
  0x20   : > { %1509 = vmatpush3.bf16.msra.mxu0 %v1625_v11  ;;  %v519_v33 = vmul.f32 %v1947_v20, %v491_v24  ;;  %v493_v34 = vld [vmem:[%s1934_s30 + $0x20] sm:$0xff]  ;;  %v522_v36 = vmul.f32 %v1949_v21, %v494_v27  ;;  %v524_v37 = vmul.f32 %v1949_v21, %v496_v28  ;;  %v495_v41 = vld [vmem:[%s1934_s30 + $0x30] sm:$0xff]  ;;  %v498_v51 = vld [vmem:[%s1934_s30 + $0x48] sm:$0xff]  ;;  %p1703_p11 = scmp.ne.s32.totalorder %s2213_s28, %s1702_s12  ;;  %p1709_p0 = scmp.lt.s32.totalorder %s2213_s28, %s1707_s22 }
  0x21   : > { %1510 = vmatprep.subr.bf16.mxu0 %v1626_v12  ;;  %v546_v39 = vadd.f32 %v1958_v26, %v518_v30  ;;  %v548_v40 = vadd.f32 %v1958_v26, %v520_v31  ;;  %v545_v42 = vadd.f32 %v1956_v25, %v517_v32  ;;  %v521_v44 = vmul.f32 %v1947_v20, %v493_v34  ;;  %v500_v53 = vld [vmem:[%s1934_s30 + $0x58] sm:$0xff]  ;;  %v497_v3 = vld [vmem:[%s1934_s30 + $0x40] sm:$0xff]  ;;  %v499_v7 = vld [vmem:[%s1934_s30 + $0x50] sm:$0xff] }
  0x22   : > { %v547_v43 = vadd.f32 %v1956_v25, %v519_v33  ;;  %v550_v49 = vadd.f32 %v1958_v26, %v522_v36  ;;  %v552_v50 = vadd.f32 %v1958_v26, %v524_v37  ;;  %v523_v55 = vmul.f32 %v1947_v20, %v495_v41  ;;  %v502_v8 = vld [vmem:[%s1934_s30 + $0x68] sm:$0xff]  ;;  %v504_v10 = vld [vmem:[%s1934_s30 + $0x78] sm:$0xff]  ;;  %v785_v18 = vld [vmem:[%s2023_s26] sm:$0xff]  ;;  %p1704_p12 = pnand %p1703_p11, %p1886_p5 }
  0x23   : > { %v562_v47 = vmax.f32 %v546_v39, 0.0  ;;  %v564_v48 = vmax.f32 %v548_v40, 0.0  ;;  %v561_v57 = vmax.f32 %v545_v42, 0.0  ;;  %v549_v59 = vadd.f32 %v1956_v25, %v521_v44  ;;  %v2032_v11 = vld [vmem:[%s2267_s8] ss:$8 sps:$4 sm:$0xff]   ;;  %v787_v45 = vld [vmem:[%s2023_s26 + $0x10] sm:$0xff] }
  0x24   : > { %1511 = vmatpush3.bf16.msra.mxu0 %v1627_v15  ;;  %v563_v58 = vmax.f32 %v547_v43, 0.0  ;;  %v566_v62 = vmax.f32 %v550_v49, 0.0  ;;  %v568_v63 = vmax.f32 %v552_v50, 0.0  ;;  %v526_v0 = vmul.f32 %v1949_v21, %v498_v51  ;;  %v1645_v12 = vld [vmem:[%s2268_s9 + $0x20] ss:$8 sps:$4 sm:$0xff]   ;;  %v503_v49 = vld [vmem:[%s1934_s30 + $0x70] sm:$0xff]  ;;  %p1705_p13 = pneg %p1704_p12 }
  0x25   : > { %1512 = vmatprep.subr.bf16.mxu0 %v1628_v16  ;;  %v578_v54 = vpack.c.bf16 %v564_v48, %v562_v47  ;;  %v528_v1 = vmul.f32 %v1949_v21, %v500_v53  ;;  %v551_v6 = vadd.f32 %v1956_v25, %v523_v55  ;;  %v565_v14 = vmax.f32 %v549_v59, 0.0  ;;  %v1646_v17 = vld [vmem:[%s2268_s9 + $0x34] ss:$8 sps:$4 sm:$0xff]   ;;  %v786_v19 = vld [vmem:[%s2023_s26 + $0x8] sm:$0xff]  ;;  %v2051_v23 = vld [vmem:[%s2263_s4] ss:$0 sm:$0xff]  ;;  %921 = vmatpush1.bf16.msra.mxu1 %v1645_v12 }
  0x26   : > { %v577_v9 = vpack.c.bf16 %v563_v58, %v561_v57  ;;  %v580_v13 = vpack.c.bf16 %v568_v63, %v566_v62  ;;  %v554_v15 = vadd.f32 %v1958_v26, %v526_v0  ;;  %v2056_v24 = vld [vmem:[%s2264_s5] ss:$0 sm:$0xff]  ;;  %v525_v28 = vmul.f32 %v1947_v20, %v497_v3  ;;  %v1651_v34 = vld [vmem:[%s2268_s9 + $0x30] ss:$8 sps:$4 sm:$0xff]   ;;  %922 = vmatprep.subr.bf16.mxu1 %v1646_v17  ;;  %v1654_v40 = vld [vmem:[%s2267_s8 + $0x24] ss:$8 sps:$4 sm:$0xff]  }
  0x27   : > { %752 = vmatprep.mubr.bf16.mxu0 %v578_v54  ;;  %v556_v16 = vadd.f32 %v1958_v26, %v528_v1  ;;  %v567_v27 = vmax.f32 %v551_v6, 0.0  ;;  %v801_v30 = vmul.f32 %v2051_v23, %v786_v19  ;;  %v527_v31 = vmul.f32 %v1947_v20, %v499_v7  ;;  %v1648_v37 = vld [vmem:[%s2267_s8 + $0x10] ss:$8 sps:$4 sm:$0xff]   ;;  %v501_v39 = vld [vmem:[%s1934_s30 + $0x60] sm:$0xff] }
  0x28   : > { %1513 = vmatpush3.bf16.msra.mxu0 %v1629_v29  ;;  %v800_v29 = vmul.f32 %v2051_v23, %v785_v18  ;;  %v530_v32 = vmul.f32 %v1949_v21, %v502_v8  ;;  %v532_v33 = vmul.f32 %v1949_v21, %v504_v10  ;;  %v553_v42 = vadd.f32 %v1956_v25, %v525_v28  ;;  %v1652_v50 = vld [vmem:[%s2267_s8 + $0x20] ss:$8 sps:$4 sm:$0xff]   ;;  %v1655_v2 = vld [vmem:[%s2267_s8 + $0x30] ss:$8 sps:$4 sm:$0xff]   ;;  %v1663_v10 = vld [vmem:[%s2267_s8 + $0x54] ss:$8 sps:$4 sm:$0xff]  }
  0x29   : > { %1514 = vmatprep.subr.bf16.mxu0 %v1630_v35  ;;  %v570_v35 = vmax.f32 %v554_v15, 0.0  ;;  %v572_v36 = vmax.f32 %v556_v16, 0.0  ;;  %v816_v21 = vadd.f32 %v2056_v24, %v801_v30  ;;  %v579_v41 = vpack.c.bf16 %v567_v27, %v565_v14  ;;  %923 = vmatpush1.bf16.msra.mxu1 %v1651_v34  ;;  %v789_v14 = vld [vmem:[%s2023_s26 + $0x20] sm:$0xff]  ;;  %v790_v15 = vld [vmem:[%s2023_s26 + $0x28] sm:$0xff] }
  0x2a   : > { %v555_v47 = vadd.f32 %v1956_v25, %v527_v31  ;;  %v558_v48 = vadd.f32 %v1958_v26, %v530_v32  ;;  %v802_v51 = vmul.f32 %v2051_v23, %v787_v45  ;;  %v560_v54 = vadd.f32 %v1958_v26, %v532_v33  ;;  %1542 = vmatprep.subr.bf16.mxu1 %v2018_v5  ;;  %v1666_v28 = vld [vmem:[%s2267_s8 + $0x64] ss:$8 sps:$4 sm:$0xff]   ;;  %v1664_v30 = vld [vmem:[%s2267_s8 + $0x60] ss:$8 sps:$4 sm:$0xff]   ;;  %v791_v31 = vld [vmem:[%s2023_s26 + $0x30] sm:$0xff] }
  0x2b   : > { %v824_v44 = vmax.f32 %v816_v21, 0.0  ;;  %v582_v53 = vpack.c.bf16 %v572_v36, %v570_v35  ;;  %v529_v59 = vmul.f32 %v1947_v20, %v501_v39  ;;  %v531_v60 = vmul.f32 %v1947_v20, %v503_v49  ;;  %v1660_v20 = vld [vmem:[%s2267_s8 + $0x44] ss:$8 sps:$4 sm:$0xff]   ;;  %v792_v32 = vld [vmem:[%s2023_s26 + $0x38] sm:$0xff] }
  0x2c   : > { %1515 = vmatpush3.bf16.msra.mxu0 %v1631_v38  ;;  %v815_v38 = vadd.f32 %v2056_v24, %v800_v29  ;;  %v817_v57 = vadd.f32 %v2056_v24, %v802_v51  ;;  %v569_v26 = vmax.f32 %v553_v42, 0.0  ;;  %v574_v0 = vmax.f32 %v558_v48, 0.0  ;;  %v1669_v35 = vld [vmem:[%s2267_s8 + $0x74] ss:$8 sps:$4 sm:$0xff]  }
  0x2d   : > { %1516 = vmatprep.subr.bf16.mxu0 %v1632_v46  ;;  %v788_v46 = vld [vmem:[%s2023_s26 + $0x18] sm:$0xff]  ;;  %v576_v1 = vmax.f32 %v560_v54, 0.0  ;;  %v557_v6 = vadd.f32 %v1956_v25, %v529_v59  ;;  %v559_v7 = vadd.f32 %v1956_v25, %v531_v60  ;;  %v804_v16 = vmul.f32 %v2051_v23, %v789_v14  ;;  %s1708_s26 = scalar_lea.vmem %s1707_s22, 2048 }
  0x2e   : > { %v823_v43 = vmax.f32 %v815_v38, 0.0  ;;  %v803_v52 = vmul.f32 %v2051_v23, %v788_v46  ;;  %v825_v62 = vmax.f32 %v817_v57, 0.0  ;;  %v1661_v25 = vld [vmem:[%s2267_s8 + $0x50] ss:$8 sps:$4 sm:$0xff]   ;;  %v805_v17 = vmul.f32 %v2051_v23, %v790_v15  ;;  %p1710_p1 = scmp.lt.s32.totalorder %s1708_s26, %s1702_s12 }
  0x2f   : > { %v584_v8 = vpack.c.bf16 %v576_v1, %v574_v0  ;;  %v575_v12 = vmax.f32 %v559_v7, 0.0  ;;  %v819_v18 = vadd.f32 %v2056_v24, %v804_v16  ;;  %v806_v33 = vmul.f32 %v2051_v23, %v791_v31  ;;  %v1667_v38 = vld [vmem:[%s2267_s8 + $0x70] ss:$8 sps:$4 sm:$0xff]  }
  0x30   : > { %1517 = vmatpush3.bf16.msra.mxu0 %v1633_v61  ;;  %v851_v55 = vpack.c.bf16 %v824_v44, %v823_v43  ;;  %v818_v58 = vadd.f32 %v2056_v24, %v803_v52  ;;  %v571_v61 = vmax.f32 %v555_v47, 0.0  ;;  %v820_v19 = vadd.f32 %v2056_v24, %v805_v17  ;;  %v1435_v43 = vld [vmem:[%s2266_s7] ss:$0 sm:$0xff]  ;;  %p1711_p2 = por %p1710_p1, %p1709_p0 }
  0x31   : > { %1069 = vmatprep.subr.bf16.mxu0 %v2018_v5  ;;  %v807_v34 = vmul.f32 %v2051_v23, %v792_v32  ;;  %v821_v36 = vadd.f32 %v2056_v24, %v806_v33  ;;  %v1482_v17 = vld [vmem:[%s2269_s10] ss:$0 sm:$0xff] }
  0x32   : > { %1462 = vmatmul.mubr.msk.bf16.vlgmr.msra.gmra.mrb[0].mxu1 %vm903_vm0, %v851_v55  ;;  %v826_v63 = vmax.f32 %v818_v58, 0.0  ;;  %v581_v5 = vpack.c.bf16 %v571_v61, %v569_v26  ;;  %v828_v27 = vmax.f32 %v820_v19, 0.0  ;;  %p1712_p3 = pnand %p1711_p2, %p1705_p13 }
  0x33   : > { %753 = vmatmul.mubr.bf16.vlgmr.msra.gmra.mrb[0].mxu0 %v577_v9  ;;  %1550 = vmatpush1.bf16.msra.mxu1 %v2032_v11  ;;  %v1658_v9 = vld [vmem:[%s2267_s8 + $0x40] ss:$8 sps:$4 sm:$0xff]   ;;  %v829_v21 = vmax.f32 %v821_v36, 0.0 }
  0x34   : > { %760 = vmatprep.mubr.bf16.mxu0 %v580_v13  ;;  %1070 = vmatpush1.bf16.msra.mxu0 %v2032_v11  ;;  %v852_v3 = vpack.c.bf16 %v826_v63, %v825_v62  ;;  %v573_v11 = vmax.f32 %v557_v6, 0.0 }
  0x35   : > { %1071 = vmatprep.subr.bf16.mxu0 %v1650_v22  ;;  %1543 = vmatprep.subr.bf16.mxu1 %v1650_v22  ;;  %v827_v22 = vmax.f32 %v819_v18, 0.0 }
  0x36   : > { %958 = vmatprep.mubr.bf16.mxu1 %v1766_v4  ;;  %v583_v13 = vpack.c.bf16 %v575_v12, %v573_v11 }
  0x37   : > { %1551 = vmatpush1.bf16.msra.mxu1 %v1648_v37  ;;  %v853_v29 = vpack.c.bf16 %v828_v27, %v827_v22 }
  0x38   : > { %1072 = vmatpush1.bf16.msra.mxu0 %v1648_v37  ;;  %1544 = vmatprep.subr.bf16.mxu1 %v1654_v40  ;;  %v822_v37 = vadd.f32 %v2056_v24, %v807_v34 }
  0x39   : > { %1073 = vmatprep.subr.bf16.mxu0 %v1654_v40 }
  0x3a   : > { %1463 = vmatmul.mubr.msk.bf16.gmra.mrb[4].mxu1 %vm903_vm0, %v852_v3  ;;  %v830_v23 = vmax.f32 %v822_v37, 0.0 }
  0x3b   : > { %761 = vmatmul.mubr.bf16.gmra.mrb[4].mxu0 %v579_v41  ;;  %1552 = vmatpush1.bf16.msra.mxu1 %v1652_v50 }
  0x3c   : > { %768 = vmatprep.mubr.bf16.mxu0 %v582_v53  ;;  %1074 = vmatpush1.bf16.msra.mxu0 %v1652_v50  ;;  %v854_v39 = vpack.c.bf16 %v830_v23, %v829_v21 }
  0x3d   : > { %1075 = vmatprep.subr.bf16.mxu0 %v1657_v56  ;;  %1545 = vmatprep.subr.bf16.mxu1 %v1657_v56 }
  0x3e   : > { %968 = vmatprep.mubr.bf16.mxu1 %v1766_v4 }
  0x3f   : > { %1553 = vmatpush1.bf16.msra.mxu1 %v1655_v2 }
  0x40   : > { %1076 = vmatpush1.bf16.msra.mxu0 %v1655_v2  ;;  %1546 = vmatprep.subr.bf16.mxu1 %v1660_v20 }
  0x41   : > { %1077 = vmatprep.subr.bf16.mxu0 %v1660_v20 }
  0x42   : > { %1464 = vmatmul.mubr.msk.bf16.gmra.mrb[8].mxu1 %vm903_vm0, %v853_v29  ;;  %v1483_v29 = vld [vmem:[%s2270_s11] ss:$0 sm:$0xff] }
  0x43   : > { %769 = vmatmul.mubr.bf16.gmra.mrb[8].mxu0 %v581_v5  ;;  %1554 = vmatpush1.bf16.msra.mxu1 %v1658_v9 }
  0x44   : > { %776 = vmatprep.mubr.bf16.mxu0 %v584_v8  ;;  %1078 = vmatpush1.bf16.msra.mxu0 %v1658_v9 }
  0x45   : > { %1079 = vmatprep.subr.bf16.mxu0 %v1663_v10  ;;  %1547 = vmatprep.subr.bf16.mxu1 %v1663_v10 }
  0x46   : > { %978 = vmatprep.mubr.bf16.mxu1 %v1766_v4 }
  0x47   : > { %1555 = vmatpush1.bf16.msra.mxu1 %v1661_v25 }
  0x48   : > { %1080 = vmatpush1.bf16.msra.mxu0 %v1661_v25  ;;  %1548 = vmatprep.subr.bf16.mxu1 %v1666_v28 }
  0x49   : > { %1081 = vmatprep.subr.bf16.mxu0 %v1666_v28 }
  0x4a   : > { %1465 = vmatmul.mubr.msk.bf16.gmra.mrb[12].mxu1 %vm903_vm0, %v854_v39 }
  0x4b   : > { %777 = vmatmul.mubr.bf16.gmra.mrb[12].mxu0 %v583_v13  ;;  %1556 = vmatpush1.bf16.msra.mxu1 %v1664_v30 }
  0x4c   : > { %1101 = vmatprep.mubr.bf16.mxu0 %v1766_v4  ;;  %1082 = vmatpush1.bf16.msra.mxu0 %v1664_v30 }
  0x4d   : > { %1083 = vmatprep.subr.bf16.mxu0 %v1669_v35  ;;  %1549 = vmatprep.subr.bf16.mxu1 %v1669_v35 }
  0x4e   : > { %1111 = vmatprep.mubr.bf16.mxu1 %v1766_v4 }
  0x4f   : > { %1557 = vmatpush1.bf16.msra.mxu1 %v1667_v38 }
  0x50   : > { %1084 = vmatpush1.bf16.msra.mxu0 %v1667_v38 }
 0x105   : > { %v950_v48 = vpop.f32.mrb[0].mxu1 }
 0x106   : > { %v1518_v40 = vpop.f32.mrb[0].mxu0  ;;  %v952_v51 = vpop.f32.mrb[1].mxu1 }
 0x107   : > { %v1519_v41 = vpop.f32.mrb[1].mxu0  ;;  %v954_v53 = vpop.f32.mrb[2].mxu1 }
 0x108   : > { %v1520_v24 = vadd.f32 %v1519_v41, %v1518_v40  ;;  %v1521_v42 = vpop.f32.mrb[2].mxu0  ;;  %v956_v56 = vpop.f32.mrb[3].mxu1 }
 0x109   : > { %v1522_v44 = vpop.f32.mrb[3].mxu0 }
 0x10a   : > { %v1523_v45 = vadd.f32 %v1522_v44, %v1521_v42  ;;  %v755_v46 = vadd.f32 %v1520_v24, %v1435_v43 }
 0x10c   : > { %v758_v47 = vadd.f32 %v1523_v45, %v1435_v43 }
 0x10e   : > { %v831_v49 = vpack.c.bf16 %v758_v47, %v755_v46  ;;  %v1524_v50 = vpop.f32.mrb[4].mxu0 }
 0x10f   : > { %v1525_v52 = vpop.f32.mrb[5].mxu0 }
 0x110   : > { %v1526_v54 = vadd.f32 %v1525_v52, %v1524_v50  ;;  %v1527_v55 = vpop.f32.mrb[6].mxu0  ;;  %1102 = vmatmul.mubr.bf16.vlgmr.msra.gmra.mrb[16].mxu0 %v831_v49 }
 0x111   : > { %v1528_v57 = vpop.f32.mrb[7].mxu0 }
 0x112   : > { %v763_v58 = vadd.f32 %v1526_v54, %v1435_v43  ;;  %v1529_v59 = vadd.f32 %v1528_v57, %v1527_v55 }
 0x114   : > { %v766_v60 = vadd.f32 %v1529_v59, %v1435_v43 }
 0x116   : > { %v832_v26 = vpack.c.bf16 %v766_v60, %v763_v58  ;;  %v1530_v61 = vpop.f32.mrb[8].mxu0 }
 0x117   : > { %v1531_v62 = vpop.f32.mrb[9].mxu0 }
 0x118   : > { %v1532_v63 = vadd.f32 %v1531_v62, %v1530_v61  ;;  %v1533_v0 = vpop.f32.mrb[10].mxu0  ;;  %1112 = vmatmul.mubr.bf16.vlgmr.msra.gmra.mrb[4].mxu1 %v832_v26 }
 0x119   : > { %v1534_v1 = vpop.f32.mrb[11].mxu0  ;;  %1121 = vmatprep.mubr.bf16.mxu1 %v1766_v4 }
 0x11a   : > { %v771_v2 = vadd.f32 %v1532_v63, %v1435_v43  ;;  %v1535_v20 = vadd.f32 %v1534_v1, %v1533_v0 }
 0x11c   : > { %v774_v3 = vadd.f32 %v1535_v20, %v1435_v43 }
 0x11e   : > { %v1536_v5 = vpop.f32.mrb[12].mxu0  ;;  %v833_v6 = vpack.c.bf16 %v774_v3, %v771_v2 }
 0x11f   : > { %v1537_v7 = vpop.f32.mrb[13].mxu0 }
 0x120   : > { %v1538_v8 = vadd.f32 %v1537_v7, %v1536_v5  ;;  %v1539_v9 = vpop.f32.mrb[14].mxu0  ;;  %1122 = vmatmul.mubr.bf16.gmra.mrb[8].mxu1 %v833_v6  ;;  %v1484_v5 = vld [vmem:[#allocation2] ss:$0 sm:$0xff] }
 0x121   : > { %v1540_v10 = vpop.f32.mrb[15].mxu0  ;;  %1131 = vmatprep.mubr.bf16.mxu1 %v1766_v4 }
 0x122   : > { %v779_v11 = vadd.f32 %v1538_v8, %v1435_v43  ;;  %v1541_v12 = vadd.f32 %v1540_v10, %v1539_v9 }
 0x124   : > { %v782_v25 = vadd.f32 %v1541_v12, %v1435_v43 }
 0x126   : > { %v834_v13 = vpack.c.bf16 %v782_v25, %v779_v11 }
 0x128   : > { %1132 = vmatmul.mubr.bf16.gmra.mrb[12].mxu1 %v834_v13 }
 0x1e3   : > { %v1103_v14 = vpop.f32.mrb[16].mxu0 }
 0x1e4   : > { %v2153_v15 = vadd.f32 %v1103_v14, %v950_v48  ;;  %v1105_v16 = vpop.f32.mrb[17].mxu0 }
 0x1e5   : > { %v1106_v18 = vadd.f32 %v1105_v16, %v952_v51  ;;  %v1107_v19 = vpop.f32.mrb[18].mxu0 }
 0x1e6   : > { %v2158_v22 = vadd.f32 %v1107_v19, %v954_v53  ;;  %v1109_v27 = vpop.f32.mrb[19].mxu0 }
 0x1e7   : > { %v1149_v28 = vadd.f32 %v1482_v17, %v1106_v18  ;;  %v1110_v4 = vadd.f32 %v1109_v27, %v956_v56 }
 0x1e9   : > { %v1157_v30 = vmax.f32 %v1149_v28, 0.0  ;;  %v1150_v31 = vadd.f32 %v1482_v17, %v1110_v4 }
 0x1eb   : > { %v1158_v32 = vmax.f32 %v1150_v31, 0.0  ;;  %v2163_v33 = vpop.f32.mrb[4].mxu1  ;;  %v1172_v34 = vmul.f32 %v1483_v29, %v1157_v30 }
 0x1ec   : > { %v1115_v35 = vpop.f32.mrb[5].mxu1 }
 0x1ed   : > { %v1151_v36 = vadd.f32 %v1482_v17, %v1115_v35  ;;  %v2165_v37 = vpop.f32.mrb[6].mxu1  ;;  %v1180_v38 = vsel %vm903_vm0, %v1172_v34, 0.0  ;;  %v1173_v21 = vmul.f32 %v1483_v29, %v1158_v32 }
 0x1ee   : > { %v1119_v23 = vpop.f32.mrb[7].mxu1  ;;  %1181 = vadd.xlane.f32.xlu0 %v1180_v38 }
 0x1ef   : > { %v1159_v39 = vmax.f32 %v1151_v36, 0.0  ;;  %v1152_v40 = vadd.f32 %v1482_v17, %v1119_v23  ;;  %v1183_v24 = vsel %vm903_vm0, %v1173_v21, 0.0 }
 0x1f1   : > { %v1160_v41 = vmax.f32 %v1152_v40, 0.0  ;;  %v1174_v42 = vmul.f32 %v1483_v29, %v1159_v39 }
 0x1f2   : > { %1184 = vadd.xlane.f32.xlu0 %v1183_v24 }
 0x1f3   : > { %v2169_v43 = vpop.f32.mrb[8].mxu1  ;;  %v1186_v44 = vsel %vm903_vm0, %v1174_v42, 0.0  ;;  %v1175_v45 = vmul.f32 %v1483_v29, %v1160_v41 }
 0x1f4   : > { %1187 = vadd.xlane.f32.xlu1 %v1186_v44  ;;  %v1125_v46 = vpop.f32.mrb[9].mxu1 }
 0x1f5   : > { %v1153_v47 = vadd.f32 %v1482_v17, %v1125_v46  ;;  %v2172_v48 = vpop.f32.mrb[10].mxu1  ;;  %v1189_v52 = vsel %vm903_vm0, %v1175_v45, 0.0 }
 0x1f6   : > { %v1129_v49 = vpop.f32.mrb[11].mxu1 }
 0x1f7   : > { %v1161_v50 = vmax.f32 %v1153_v47, 0.0  ;;  %v1154_v51 = vadd.f32 %v1482_v17, %v1129_v49 }
 0x1f8   : > { %1190 = vadd.xlane.f32.xlu1 %v1189_v52 }
 0x1f9   : > { %v1162_v53 = vmax.f32 %v1154_v51, 0.0  ;;  %v1176_v54 = vmul.f32 %v1483_v29, %v1161_v50 }
 0x1fb   : > { %v2175_v55 = vpop.f32.mrb[12].mxu1  ;;  %v1192_v56 = vsel %vm903_vm0, %v1176_v54, 0.0  ;;  %v1177_v57 = vmul.f32 %v1483_v29, %v1162_v53 }
 0x1fc   : > { %v1135_v58 = vpop.f32.mrb[13].mxu1  ;;  %1193 = vadd.xlane.f32.xlu0 %v1192_v56 }
 0x1fd   : > { %v1155_v59 = vadd.f32 %v1482_v17, %v1135_v58  ;;  %v2178_v60 = vpop.f32.mrb[14].mxu1  ;;  %v1195_v26 = vsel %vm903_vm0, %v1177_v57, 0.0 }
 0x1fe   : > { %1196 = vadd.xlane.f32.xlu1 %v1195_v26  ;;  %v1139_v61 = vpop.f32.mrb[15].mxu1 }
 0x1ff   : > { %v1163_v62 = vmax.f32 %v1155_v59, 0.0  ;;  %v1156_v63 = vadd.f32 %v1482_v17, %v1139_v61 }
 0x201   : > { %v1164_v0 = vmax.f32 %v1156_v63, 0.0  ;;  %v1178_v1 = vmul.f32 %v1483_v29, %v1163_v62  ;;  %v1493_v62 = vld [vmem:[%s2272_s13] ss:$0 sm:$0xff] }
 0x203   : > { %v1198_v2 = vsel %vm903_vm0, %v1178_v1, 0.0  ;;  %v1179_v20 = vmul.f32 %v1483_v29, %v1164_v0 }
 0x204   : > { %1199 = vadd.xlane.f32.xlu0 %v1198_v2 }
 0x205   : > { %v1201_v3 = vsel %vm903_vm0, %v1179_v20, 0.0 }
 0x206   : > { %1202 = vadd.xlane.f32.xlu1 %v1201_v3 }
 0x27b   : > { %v1182_v6 = vpop.xlane.xlu0 %1181 }
 0x27c   : > { %v1211_v7 = vadd.f32 %v1484_v5, %v1182_v6 }
 0x27e   : > { %v1485_v8 = vmul.f32 -1.442695, %v1211_v7 }
 0x27f   : > { %v1185_v9 = vpop.xlane.xlu0 %1184 }
 0x280   : > { %1670 = vpow2.f32 %v1485_v8  ;;  %v1212_v10 = vadd.f32 %v1484_v5, %v1185_v9 }
 0x281   : > { %v1188_v11 = vpop.xlane.xlu1 %1187 }
 0x282   : > { %v1486_v12 = vmul.f32 -1.442695, %v1212_v10  ;;  %v1213_v25 = vadd.f32 %v1484_v5, %v1188_v11 }
 0x284   : > { %1672 = vpow2.f32 %v1486_v12  ;;  %v1487_v13 = vmul.f32 -1.442695, %v1213_v25 }
 0x285   : > { %v1191_v14 = vpop.xlane.xlu1 %1190 }
 0x286   : > { %1674 = vpow2.f32 %v1487_v13  ;;  %v1214_v16 = vadd.f32 %v1484_v5, %v1191_v14 }
 0x288   : > { %v1488_v17 = vmul.f32 -1.442695, %v1214_v16 }
 0x289   : > { %v1194_v18 = vpop.xlane.xlu0 %1193 }
 0x28a   : > { %v1671_v19 = vpop.eup %1670  ;;  %1676 = vpow2.f32 %v1488_v17  ;;  %v1215_v27 = vadd.f32 %v1484_v5, %v1194_v18 }
 0x28b   : > { %v1243_v28 = vadd.f32 1.0, %v1671_v19  ;;  %v1197_v4 = vpop.xlane.xlu1 %1196 }
 0x28c   : > { %v1489_v29 = vmul.f32 -1.442695, %v1215_v27  ;;  %v1216_v30 = vadd.f32 %v1484_v5, %v1197_v4 }
 0x28d   : > { %1678 = vrcp.f32 %v1243_v28 }
 0x28e   : > { %v1673_v31 = vpop.eup %1672  ;;  %1680 = vpow2.f32 %v1489_v29  ;;  %v1490_v32 = vmul.f32 -1.442695, %v1216_v30 }
 0x28f   : > { %v1244_v34 = vadd.f32 1.0, %v1673_v31 }
 0x290   : > { %v1675_v35 = vpop.eup %1674  ;;  %1682 = vpow2.f32 %v1490_v32 }
 0x291   : > { %1684 = vrcp.f32 %v1244_v34  ;;  %v1245_v36 = vadd.f32 1.0, %v1675_v35  ;;  %v1200_v38 = vpop.xlane.xlu0 %1199 }
 0x292   : > { %v1217_v21 = vadd.f32 %v1484_v5, %v1200_v38 }
 0x293   : > { %v1203_v23 = vpop.xlane.xlu1 %1202  ;;  %1686 = vrcp.f32 %v1245_v36 }
 0x294   : > { %v1677_v39 = vpop.eup %1676  ;;  %v1491_v40 = vmul.f32 -1.442695, %v1217_v21  ;;  %v1218_v41 = vadd.f32 %v1484_v5, %v1203_v23 }
 0x295   : > { %v1246_v24 = vadd.f32 1.0, %v1677_v39 }
 0x296   : > { %1688 = vpow2.f32 %v1491_v40  ;;  %v1492_v42 = vmul.f32 -1.442695, %v1218_v41 }
 0x297   : > { %v1679_v44 = vpop.eup %1678 }
 0x298   : > { %v1681_v45 = vpop.eup %1680  ;;  %1690 = vpow2.f32 %v1492_v42  ;;  %1269 = vperm.xlu0 %1616, %v1679_v44  }
 0x299   : > { %1692 = vrcp.f32 %v1246_v24  ;;  %v1247_v46 = vadd.f32 1.0, %v1681_v45 }
 0x29a   : > { %v1683_v47 = vpop.eup %1682 }
 0x29b   : > { %v1685_v49 = vpop.eup %1684  ;;  %1694 = vrcp.f32 %v1247_v46  ;;  %v1248_v50 = vadd.f32 1.0, %v1683_v47 }
 0x29c   : > { %1274 = vperm.xlu1 %1617, %v1685_v49  }
 0x29d   : > { %v1687_v51 = vpop.eup %1686  ;;  %1696 = vrcp.f32 %v1248_v50 }
 0x2a0   : > { %v1689_v52 = vpop.eup %1688  ;;  %1279 = vperm.xlu1 %1617, %v1687_v51  }
 0x2a1   : > { %v1249_v53 = vadd.f32 1.0, %v1689_v52 }
 0x2a2   : > { %v1691_v54 = vpop.eup %1690 }
 0x2a3   : > { %v1693_v56 = vpop.eup %1692  ;;  %1698 = vrcp.f32 %v1249_v53  ;;  %v1250_v57 = vadd.f32 1.0, %v1691_v54 }
 0x2a4   : > { %1284 = vperm.xlu1 %1617, %v1693_v56  }
 0x2a5   : > { %v1695_v58 = vpop.eup %1694  ;;  %1700 = vrcp.f32 %v1250_v57 }
 0x2a7   : > { %v1697_v59 = vpop.eup %1696 }
 0x2a8   : > { %1289 = vperm.xlu1 %1617, %v1695_v58  }
 0x2ac   : > { %1294 = vperm.xlu1 %1617, %v1697_v59  }
 0x2ad   : > { %v1699_v26 = vpop.eup %1698 }
 0x2af   : > { %v1701_v61 = vpop.eup %1700 }
 0x2b0   : > { %1299 = vperm.xlu1 %1617, %v1699_v26  }
 0x2b4   : > { %1304 = vperm.xlu1 %1617, %v1701_v61  }
 0x317   : > { %v1270_v63 = vpop.permute.xlu0 %1269 }
 0x318   : > { %v1307_v0 = vmul.f32 %v1270_v63, %v2153_v15 }
 0x31a   : > { %v1322_v1 = vadd.f32 %v1493_v62, %v1307_v0 }
 0x31b   : > { %v1275_v2 = vpop.permute.xlu1 %1274 }
 0x31c   : > { %1330 = vst [vmem:[%s2190_s27] sm:$0xff] %v1322_v1  ;;  %v1308_v20 = vmul.f32 %v1275_v2, %v2158_v22 }
 0x31e   : > { %v1323_v3 = vadd.f32 %v1493_v62, %v1308_v20 }
 0x31f   : > { %v1280_v5 = vpop.permute.xlu1 %1279 }
 0x320   : > { %1331 = vst [vmem:[%s2190_s27 + $0x8] sm:$0xff] %v1323_v3  ;;  %v1309_v6 = vmul.f32 %v1280_v5, %v2163_v33 }
 0x322   : > { %v1324_v7 = vadd.f32 %v1493_v62, %v1309_v6 }
 0x323   : > { %v1285_v15 = vpop.permute.xlu1 %1284 }
 0x324   : > { %1332 = vst [vmem:[%s2190_s27 + $0x10] sm:$0xff] %v1324_v7  ;;  %v1310_v8 = vmul.f32 %v1285_v15, %v2165_v37 }
 0x326   : > { %v1325_v9 = vadd.f32 %v1493_v62, %v1310_v8 }
 0x327   : > { %v1290_v10 = vpop.permute.xlu1 %1289 }
 0x328   : > { %1333 = vst [vmem:[%s2190_s27 + $0x18] sm:$0xff] %v1325_v9  ;;  %v1311_v11 = vmul.f32 %v1290_v10, %v2169_v43 }
 0x32a   : > { %v1326_v22 = vadd.f32 %v1493_v62, %v1311_v11 }
 0x32b   : > { %v1295_v12 = vpop.permute.xlu1 %1294 }
 0x32c   : > { %1334 = vst [vmem:[%s2190_s27 + $0x20] sm:$0xff] %v1326_v22  ;;  %v1312_v33 = vmul.f32 %v1295_v12, %v2172_v48 }
 0x32e   : > { %v1327_v25 = vadd.f32 %v1493_v62, %v1312_v33 }
 0x32f   : > { %v1300_v13 = vpop.permute.xlu1 %1299 }
 0x330   : > { %1335 = vst [vmem:[%s2190_s27 + $0x28] sm:$0xff] %v1327_v25  ;;  %v1313_v14 = vmul.f32 %v1300_v13, %v2175_v55 }
 0x332   : > { %v1328_v37 = vadd.f32 %v1493_v62, %v1313_v14 }
 0x333   : > { %v1305_v16 = vpop.permute.xlu1 %1304 }
 0x334   : > { %1336 = vst [vmem:[%s2190_s27 + $0x30] sm:$0xff] %v1328_v37  ;;  %v1314_v43 = vmul.f32 %v1305_v16, %v2178_v60 }
 0x336   : > { %v1329_v48 = vadd.f32 %v1493_v62, %v1314_v43 }
 0x338   : > { %1337 = vst [vmem:[%s2190_s27 + $0x38] sm:$0xff] %v1329_v48 }
 0x339   : > { %1715 = shalt.err (!%p1712_p3)
}
 0x33a   : > { %s1716_s17 = scalar_lea.hbm %s2211_s20, 1024  ;;  %s1720_s19 = scalar_lea.hbm %s2273_s14, 2048 }
 0x33b   : > { %p1717_p4 = scmp.ne.s32.totalorder %s2211_s20, %s1716_s17  ;;  %p1721_p9 = scmp.lt.u32.totalorder %s2211_s20, %s2273_s14 }
 0x33c   : > { %p1722_p10 = scmp.lt.u32.totalorder %s1720_s19, %s1716_s17  ;;  %p1724_p12 = scmp.lt.u32.totalorder %s1716_s17, %s2211_s20 }
 0x33d   : > { %p1718_p7 = pnand %p1717_p4, %p1886_p5 }
 0x33e   : > { %p1723_p11 = por %p1722_p10, %p1721_p9 }
 0x33f   : > { %p1719_p8 = pneg %p1718_p7 }
 0x340   : > { %p1725_p13 = por %p1724_p12, %p1723_p11 }
 0x342   : > { %p1726_p0 = pnand %p1725_p13, %p1719_p8 }
 0x344   : > { %1729 = shalt.err (!%p1726_p0)
}
 0x345   : > { %s1768_s12 = smov 128   ;;  %s1769_s22 = smov 8  }
 0x346   : > { %1574 = dma.vmem_to_hbm [thread:$0]  (%p1886_p5), %s2213_s28, 1024, %s2211_s20, %s2218_s21, %s1768_s12, %s1768_s12, %s1769_s22  }
 0x347 PF: > { %p1580_p1 = scmp.ge.s32.totalorder %s1764_s18, 2  ;;  %s1367_s26 = sand.u32 1, %s1752_s15  }
 0x348   : > { %s1368_s17 = scalar_lea.sflag [#allocation4], %s1367_s26 }
 0x349   : > { %p1577_p2 = pnand %p1580_p1, %p1890_p6 }
 0x34b   : > { %1747 = dma.done.wait (!%p1577_p2), %s1368_s17, 1024  }
 0x34c   : > { %1749 = vsyncadd (!%p1577_p2), %s1368_s17, 4294966272  ;;  %s2282_s18 = sld [smem:[#allocation7_spill]]  ;;  %s2283_s27 = sld [smem:[#allocation6_spill]] }
 0x34d   : > { %s2284_s17 = sld [smem:[#allocation8_spill]]  ;;  %s2285_s15 = smov %s1756_s16 }
 0x352   : > { %p26_p3 = scmp.ge.s32.totalorder %s2282_s18, 4   ;;  %s2286_s16 = smov %s2283_s27 }
 0x354   :  { %28 = sbr.rel (!%p26_p3) target bundleno = 6 (0x6), region = 114 }
 0x35b   :  { %1373 = vsyncpa [#allocation4], 1 }
 0x35c   :  { %1375 = vsyncpa [#allocation4 + $0x1], 1 }

// kernel: phase_correlation_forward.4
= control target key start
LH: loop header
LB: loop body
LE: loop exit
PB: predicated region body
PF: predicated region fallthrough
CT: control target
= control target key end

     0   :  { %s3852_s17 = smov 0   ;;  %s5069_s0 = inlined_call_operand.vmem [shape: f32[2,8,8,128], index: 0, kind: input, shape index: {}]   ;;  %s5070_s1 = inlined_call_operand.vmem [shape: f32[2,8,8,64], index: 1, kind: input, shape index: {}]   ;;  %s5071_s2 = inlined_call_operand.vmem [shape: f32[1,128], index: 2, kind: input, shape index: {}]   ;;  %s5072_s3 = inlined_call_operand.vmem [shape: f32[1,128], index: 3, kind: input, shape index: {}]   ;;  %s5073_s4 = inlined_call_operand.vmem [shape: f32[1,64], index: 4, kind: input, shape index: {}]   ;;  %s5074_s5 = inlined_call_operand.vmem [shape: f32[1,64], index: 5, kind: input, shape index: {}]   ;;  %s5075_s6 = inlined_call_operand.vmem [shape: bf16[3,384,256], index: 6, kind: input, shape index: {}]   ;;  %s5076_s7 = inlined_call_operand.vmem [shape: f32[9,64], index: 7, kind: input, shape index: {}]   ;;  %s5077_s8 = inlined_call_operand.vmem [shape: f32[2,8,8,256], index: 8, kind: output, shape index: {0}]   ;;  %s5078_s9 = inlined_call_operand.vmem [shape: f32[2,2,256], index: 9, kind: output, shape index: {1}]   ;;  %s5079_s10 = inlined_call_operand.vmem [shape: f32[2,8,8,64], index: 10, kind: output, shape index: {2}]   ;;  %s5080_s11 = inlined_call_operand.vmem [shape: f32[2,2,64], index: 11, kind: output, shape index: {3}]  }
   0x1 LB: > { %s3056_s18 = sadd.s32 4294967295, %s3788_s17   ;;  %p3060_p0 = scmp.ge.s32.totalorder %s3788_s17, 1  ;;  %s3788_s17 = sphi %s3852_s17, %s22_s17  }
   0x2   : > { %p354_p1 = scmp.lt.s32.totalorder %s3788_s17, 3 }
   0x4   : > { %p355_p2 = pnand %p3060_p0, %p354_p1 }
   0x6   : > { %358 = sbr.rel (%p355_p2) target bundleno = 528 (0x210), region = 52 }
   0xd   : > { %v3516_v0 = vld [vmem:[%s5075_s6 + $0x184] ss:$8 sps:$4 sm:$0xff]   ;;  %v3518_v1 = vld [vmem:[%s5075_s6 + $0x180] ss:$8 sps:$4 sm:$0xff]   ;;  %v5081_v2 = vmov 0   ;;  %vm2533_vm0 = vcmask 523264  }
   0xe   : > { %1379 = vmatprep.mubr.bf16.mxu0 %v5081_v2  ;;  %489 = vst [vmem:[#allocation2] sm:$0xff] %v5081_v2  ;;  %491 = vst [vmem:[#allocation2 + $0x48] sm:$0xff] %v5081_v2  ;;  %1274 = vmatprep.subr.bf16.mxu1 %v3516_v0  ;;  %v3519_v3 = vld [vmem:[%s5075_s6 + $0x194] ss:$8 sps:$4 sm:$0xff]   ;;  %v3521_v4 = vld [vmem:[%s5075_s6 + $0x190] ss:$8 sps:$4 sm:$0xff]  }
   0xf   : > { %1275 = vmatpush1.bf16.msra.mxu1 %v3518_v1  ;;  %v3522_v5 = vld [vmem:[%s5075_s6 + $0x284] ss:$8 sps:$4 sm:$0xff]   ;;  %v3526_v7 = vld [vmem:[%s5075_s6 + $0x280] ss:$8 sps:$4 sm:$0xff]   ;;  %v3528_v8 = vld [vmem:[%s5075_s6 + $0x294] ss:$8 sps:$4 sm:$0xff]  }
  0x10   : > { %1276 = vmatprep.subr.bf16.mxu1 %v3519_v3  ;;  %v3524_v6 = vld [vmem:[%s5075_s6 + $0x1a4] ss:$8 sps:$4 sm:$0xff]   ;;  %1347 = vmatprep.subr.bf16.mxu0 %v3522_v5  ;;  %v3527_v9 = vld [vmem:[%s5075_s6 + $0x1a0] ss:$8 sps:$4 sm:$0xff]   ;;  %v3530_v10 = vld [vmem:[%s5075_s6 + $0x1b4] ss:$8 sps:$4 sm:$0xff]  }
  0x11   : > { %1348 = vmatpush1.bf16.msra.mxu0 %v3526_v7  ;;  %v3532_v11 = vld [vmem:[%s5075_s6 + $0x290] ss:$8 sps:$4 sm:$0xff]   ;;  %v3534_v12 = vld [vmem:[%s5075_s6 + $0x2a4] ss:$8 sps:$4 sm:$0xff]   ;;  %v3538_v14 = vld [vmem:[%s5075_s6 + $0x2a0] ss:$8 sps:$4 sm:$0xff]  }
  0x12   : > { %1349 = vmatprep.subr.bf16.mxu0 %v3528_v8  ;;  %v3533_v13 = vld [vmem:[%s5075_s6 + $0x1b0] ss:$8 sps:$4 sm:$0xff]   ;;  %v3540_v15 = vld [vmem:[%s5075_s6 + $0x2b4] ss:$8 sps:$4 sm:$0xff]   ;;  %v3536_v16 = vld [vmem:[%s5075_s6 + $0x1c4] ss:$8 sps:$4 sm:$0xff]  }
  0x13   : > { %1277 = vmatpush1.bf16.msra.mxu1 %v3521_v4  ;;  %p3913_p3 = scmp.lt.s32.totalorder %s3056_s18, 1  ;;  %v3791_v17 = vmov 0.0   ;;  %vm2539_vm1 = vcmask 516096   ;;  %v3544_v18 = vld [vmem:[%s5075_s6 + $0x2b0] ss:$8 sps:$4 sm:$0xff]   ;;  %vm492_vm2 = vcmask 1040384  }
  0x14   : > { %1278 = vmatprep.subr.bf16.mxu1 %v3524_v6  ;;  %2534 = vst.msk [vmem:[#allocation3] sm:$0xff] %vm2533_vm0, %v3791_v17  ;;  %2535 = vst.msk [vmem:[#allocation3 + $0x8] sm:$0xff] %vm2533_vm0, %v3791_v17  ;;  %v3539_v19 = vld [vmem:[%s5075_s6 + $0x1c0] ss:$8 sps:$4 sm:$0xff]   ;;  %v3546_v20 = vld [vmem:[%s5075_s6 + $0x2c4] ss:$8 sps:$4 sm:$0xff]  }
  0x15   : > { %1350 = vmatpush1.bf16.msra.mxu0 %v3532_v11  ;;  %2537 = vst.msk [vmem:[#allocation3 + $0x90] sm:$0xff] %vm2533_vm0, %v3791_v17  ;;  %2538 = vst.msk [vmem:[#allocation3 + $0x98] sm:$0xff] %vm2533_vm0, %v3791_v17  ;;  %v3542_v21 = vld [vmem:[%s5075_s6 + $0x1d4] ss:$8 sps:$4 sm:$0xff]   ;;  %s5121_s18 = smov (!%p3913_p3, %s3056_s18), 1  ;;  %vm525_vm3 = vcmask 1044484  }
  0x16   : > { %1351 = vmatprep.subr.bf16.mxu0 %v3534_v12  ;;  %2540 = vst.msk [vmem:[#allocation3] sm:$0x1] %vm2539_vm1, %v3791_v17  ;;  %2541 = vst.msk [vmem:[#allocation3 + $0x10] sm:$0x1] %vm2539_vm1, %v3791_v17  ;;  %v3545_v22 = vld [vmem:[%s5075_s6 + $0x1d0] ss:$8 sps:$4 sm:$0xff]  }
  0x17   : > { %1279 = vmatpush1.bf16.msra.mxu1 %v3527_v9  ;;  %2542 = vst.msk [vmem:[#allocation3 + $0x20] sm:$0x1] %vm2539_vm1, %v3791_v17  ;;  %2543 = vst.msk [vmem:[#allocation3 + $0x30] sm:$0x1] %vm2539_vm1, %v3791_v17  ;;  %v3550_v23 = vld [vmem:[%s5075_s6 + $0x2c0] ss:$8 sps:$4 sm:$0xff]  }
  0x18   : > { %1280 = vmatprep.subr.bf16.mxu1 %v3530_v10  ;;  %2544 = vst.msk [vmem:[#allocation3 + $0x40] sm:$0x1] %vm2539_vm1, %v3791_v17  ;;  %2545 = vst.msk [vmem:[#allocation3 + $0x50] sm:$0x1] %vm2539_vm1, %v3791_v17  ;;  %v3552_v24 = vld [vmem:[%s5075_s6 + $0x2d4] ss:$8 sps:$4 sm:$0xff]  }
  0x19   : > { %1352 = vmatpush1.bf16.msra.mxu0 %v3538_v14  ;;  %2546 = vst.msk [vmem:[#allocation3 + $0x60] sm:$0x1] %vm2539_vm1, %v3791_v17  ;;  %2547 = vst.msk [vmem:[#allocation3 + $0x70] sm:$0x1] %vm2539_vm1, %v3791_v17  ;;  %v3548_v25 = vld [vmem:[%s5075_s6 + $0x1e4] ss:$8 sps:$4 sm:$0xff]  }
  0x1a   : > { %2548 = vst.msk [vmem:[#allocation3 + $0x80] sm:$0x1] %vm2539_vm1, %v3791_v17  ;;  %2549 = vst.msk [vmem:[#allocation3 + $0x90] sm:$0x1] %vm2539_vm1, %v3791_v17  ;;  %1353 = vmatprep.subr.bf16.mxu0 %v3540_v15  ;;  %s3972_s15 = sshll.u32 %s5121_s18, 6  ;;  %v5098_v43 = vmov 0 }
  0x1b   : > { %2550 = vst.msk [vmem:[#allocation3 + $0x9] sm:$0x1] %vm2539_vm1, %v3791_v17  ;;  %2551 = vst.msk [vmem:[#allocation3 + $0x19] sm:$0x1] %vm2539_vm1, %v3791_v17  ;;  %1281 = vmatpush1.bf16.msra.mxu1 %v3533_v13  ;;  %v3556_v26 = vld [vmem:[%s5075_s6 + $0x2d0] ss:$8 sps:$4 sm:$0xff]   ;;  %s3987_s26 = scalar_lea.vmem %s5069_s0, %s3972_s15  ;;  %s4025_s28 = scalar_lea.vmem %s5070_s1, %s3972_s15 }
  0x1c   : > { %2552 = vst.msk [vmem:[#allocation3 + $0x29] sm:$0x1] %vm2539_vm1, %v3791_v17  ;;  %2553 = vst.msk [vmem:[#allocation3 + $0x39] sm:$0x1] %vm2539_vm1, %v3791_v17  ;;  %1282 = vmatprep.subr.bf16.mxu1 %v3536_v16  ;;  %v3551_v27 = vld [vmem:[%s5075_s6 + $0x1e0] ss:$8 sps:$4 sm:$0xff]   ;;  %s4431_s24 = scalar_lea.vmem %s5079_s10, %s3972_s15 }
  0x1d   : > { %2554 = vst.msk [vmem:[#allocation3 + $0x49] sm:$0x1] %vm2539_vm1, %v3791_v17  ;;  %2555 = vst.msk [vmem:[#allocation3 + $0x59] sm:$0x1] %vm2539_vm1, %v3791_v17  ;;  %1354 = vmatpush1.bf16.msra.mxu0 %v3544_v18  ;;  %v3558_v28 = vld [vmem:[%s5075_s6 + $0x2e4] ss:$8 sps:$4 sm:$0xff]  }
  0x1e   : > { %2556 = vst.msk [vmem:[#allocation3 + $0x69] sm:$0x1] %vm2539_vm1, %v3791_v17  ;;  %2557 = vst.msk [vmem:[#allocation3 + $0x79] sm:$0x1] %vm2539_vm1, %v3791_v17  ;;  %1355 = vmatprep.subr.bf16.mxu0 %v3546_v20  ;;  %v3554_v29 = vld [vmem:[%s5075_s6 + $0x1f4] ss:$8 sps:$4 sm:$0xff]  }
  0x1f   : > { %2558 = vst.msk [vmem:[#allocation3 + $0x89] sm:$0x1] %vm2539_vm1, %v3791_v17  ;;  %2559 = vst.msk [vmem:[#allocation3 + $0x99] sm:$0x1] %vm2539_vm1, %v3791_v17  ;;  %1283 = vmatpush1.bf16.msra.mxu1 %v3539_v19  ;;  %vm493_vm4 = vsmask.f32 256 }
  0x20   : > { %1284 = vmatprep.subr.bf16.mxu1 %v3542_v21  ;;  %v3557_v30 = vld [vmem:[%s5075_s6 + $0x1f0] ss:$8 sps:$4 sm:$0xff]   ;;  %v3562_v31 = vld [vmem:[%s5075_s6 + $0x2e0] ss:$8 sps:$4 sm:$0xff]   ;;  %vm526_vm5 = vsmask.f32 7954  ;;  %vm4017_vm6 = vmand %vm492_vm2, %vm493_vm4 }
  0x21   : > { %1356 = vmatpush1.bf16.msra.mxu0 %v3550_v23  ;;  %v3560_v32 = vld [vmem:[%s5075_s6 + $0x204] ss:$8 sps:$4 sm:$0xff]   ;;  %v3564_v33 = vld [vmem:[%s5075_s6 + $0x2f4] ss:$8 sps:$4 sm:$0xff]   ;;  %v4009_v36 = vld [vmem:[%s5071_s2] ss:$0 sm:$0xff] }
  0x22   : > { %1357 = vmatprep.subr.bf16.mxu0 %v3552_v24  ;;  %v444_v34 = vld [vmem:[%s3987_s26 + $0x8] sm:$0xff]  ;;  %v445_v35 = vld [vmem:[%s3987_s26 + $0x10] sm:$0xff]  ;;  %v4014_v37 = vld [vmem:[%s5072_s3] ss:$0 sm:$0xff]  ;;  %vm631_vm8 = vcmask 1044480   ;;  %v5101_v21 = vmov 0 }
  0x23   : > { %1285 = vmatpush1.bf16.msra.mxu1 %v3545_v22  ;;  %5095 = vst [vmem:[#allocation4_spill] sm:$0xff] %v4014_v37  ;;  %v459_v39 = vmul.f32 %v4009_v36, %v444_v34  ;;  %v460_v40 = vmul.f32 %v4009_v36, %v445_v35  ;;  %v501_v41 = vld [vmem:[#allocation2 + $0x10] sm:$0x1]  ;;  %v504_v42 = vld [vmem:[#allocation2 + $0x18] sm:$0x1]  ;;  %vm4031_vm7 = vmand %vm525_vm3, %vm526_vm5  ;;  %vm2890_vm14 = vcmask 517120  }
  0x24   : > { %1286 = vmatprep.subr.bf16.mxu1 %v3548_v25  ;;  %v5099_v43 = vsel %vm4031_vm7, 4294967295, %v5098_v43  ;;  %v3563_v44 = vld [vmem:[%s5075_s6 + $0x200] ss:$8 sps:$4 sm:$0xff]   ;;  %v502_v45 = vsel %vm4017_vm6, 0, %v501_v41  ;;  %v505_v46 = vsel %vm4017_vm6, 0, %v504_v42  ;;  %v2489_v62 = vld [vmem:[%s4025_s28 + $0x10] sm:$0xff] }
  0x25   : > { %1358 = vmatpush1.bf16.msra.mxu0 %v3556_v26  ;;  %5100 = vst [vmem:[#allocation5_spill] sm:$0xff] %v5099_v43  ;;  %v534_v47 = vld [vmem:[#allocation2 + $0x10] sm:$0x10]  ;;  %v537_v48 = vld [vmem:[#allocation2 + $0x18] sm:$0x10]  ;;  %v4051_v51 = vld [vmem:[%s5075_s6 + $0x220] sm:$0xff]  ;;  %v474_v53 = vadd.f32 %v4014_v37, %v459_v39  ;;  %v475_v54 = vadd.f32 %v4014_v37, %v460_v40 }
  0x26   : > { %1359 = vmatprep.subr.bf16.mxu0 %v3558_v28  ;;  %v3566_v49 = vld [vmem:[%s5075_s6 + $0x214] ss:$8 sps:$4 sm:$0xff]   ;;  %v3568_v50 = vld [vmem:[%s5075_s6 + $0x2f0] ss:$8 sps:$4 sm:$0xff]   ;;  %v4056_v52 = vld [vmem:[%s5075_s6 + $0x228] sm:$0xff]  ;;  %v535_v55 = vsel %vm4031_vm7, 0, %v534_v47 }
  0x27   : > { %1287 = vmatpush1.bf16.msra.mxu1 %v3551_v27  ;;  %503 = vst [vmem:[#allocation2 + $0x10] sm:$0x1] %v502_v45  ;;  %506 = vst [vmem:[#allocation2 + $0x18] sm:$0x1] %v505_v46  ;;  %v538_v56 = vsel %vm4031_vm7, 0, %v537_v48  ;;  %v2487_v58 = vld [vmem:[%s4025_s28] sm:$0xff]  ;;  %v3180_v4 = vcombine.low %v4051_v51, %v4056_v52 }
  0x28   : > { %1288 = vmatprep.subr.bf16.mxu1 %v3554_v29  ;;  %v3572_v57 = vld [vmem:[%s5075_s6 + $0x104] ss:$8 sps:$4 sm:$0xff]   ;;  %536 = vst [vmem:[#allocation2 + $0x10] sm:$0x10] %v535_v55  ;;  %539 = vst [vmem:[#allocation2 + $0x18] sm:$0x10] %v538_v56 }
  0x29   : > { %1360 = vmatpush1.bf16.msra.mxu0 %v3562_v31  ;;  %v2488_v59 = vld [vmem:[%s4025_s28 + $0x8] sm:$0xff]  ;;  %v482_v60 = vmax.f32 %v474_v53, 0.0  ;;  %v483_v61 = vmax.f32 %v475_v54, 0.0  ;;  %v2490_v63 = vld [vmem:[%s4025_s28 + $0x18] sm:$0xff]  ;;  %v2491_v0 = vld [vmem:[%s4025_s28 + $0x20] sm:$0xff]  ;;  %vm1856_vm15 = vcmask 1042432  }
  0x2a   : > { %1361 = vmatprep.subr.bf16.mxu0 %v3564_v33  ;;  %vm632_vm9 = vsmask.f32 4354  ;;  %v2492_v1 = vld [vmem:[%s4025_s28 + $0x28] sm:$0xff]  ;;  %v3392_v3 = vld [vmem:[%s5073_s4] ss:$0 sm:$0xff]  ;;  %v2493_v7 = vld [vmem:[%s4025_s28 + $0x30] sm:$0xff] }
  0x2b   : > { %1289 = vmatpush1.bf16.msra.mxu1 %v3557_v30  ;;  %v559_v5 = vpack.c.bf16 %v482_v60, %v482_v60  ;;  %v560_v6 = vpack.c.bf16 %v483_v61, %v483_v61  ;;  %v2494_v8 = vld [vmem:[%s4025_s28 + $0x38] sm:$0xff]  ;;  %v2502_v9 = vmul.f32 %v3392_v3, %v2487_v58  ;;  %v2503_v10 = vmul.f32 %v3392_v3, %v2488_v59  ;;  %v3393_v11 = vld [vmem:[%s5074_s5] ss:$0 sm:$0xff]  ;;  %v3573_v16 = vld [vmem:[%s5075_s6 + $0x224] ss:$8 sps:$4 sm:$0xff]   ;;  %s3407_s27 = sshll.u32 %s5121_s18, 7 }
  0x2c   : > { %1290 = vmatprep.subr.bf16.mxu1 %v3560_v32  ;;  %v3569_v12 = vld [vmem:[%s5075_s6 + $0x210] ss:$8 sps:$4 sm:$0xff]   ;;  %v2504_v13 = vmul.f32 %v3392_v3, %v2489_v62  ;;  %v2505_v14 = vmul.f32 %v3392_v3, %v2490_v63  ;;  %v2506_v15 = vmul.f32 %v3392_v3, %v2491_v0  ;;  %vm4091_vm10 = vmand %vm631_vm8, %vm632_vm9  ;;  %v2507_v22 = vmul.f32 %v3392_v3, %v2492_v1  ;;  %v4098_v31 = vld [vmem:[%s5076_s7] ss:$0 sm:$0xff]  ;;  %s4986_s12 = scalar_lea.vmem %s5077_s8, %s3407_s27  ;;  %s3408_s13 = sshll.u32 %s5121_s18, 2 }
  0x2d   : > { %1362 = vmatpush1.bf16.msra.mxu0 %v3568_v50  ;;  %v574_v17 = vshrl.u32 %v559_v5, 16  ;;  %v577_v18 = vshll.u32 %v559_v5, 16  ;;  %v581_v19 = vshrl.u32 %v560_v6, 16  ;;  %v584_v20 = vshll.u32 %v560_v6, 16  ;;  %v2569_v30 = vld [vmem:[#allocation3] sm:$0xff]  ;;  %v2751_v60 = vld [vmem:[#allocation3 + $0x90] sm:$0xff]  ;;  %s432_s28 = scalar_lea.vmem %s5078_s9, %s3408_s13 }
  0x2e   : > { %1733 = vmatprep.subr.bf16.mxu0 %v3572_v57  ;;  %v5102_v21 = vsel %vm4091_vm10, 4294967295, %v5101_v21  ;;  %v2508_v23 = vmul.f32 %v3392_v3, %v2493_v7  ;;  %v2509_v24 = vmul.f32 %v3392_v3, %v2494_v8  ;;  %v2517_v25 = vadd.f32 %v3393_v11, %v2502_v9  ;;  %v2598_v32 = vld [vmem:[#allocation3 + $0x1] sm:$0xff]  ;;  %v4103_v42 = vld [vmem:[%s5076_s7 + $0x1] ss:$0 sm:$0xff]  ;;  %v4108_v55 = vld [vmem:[%s5076_s7 + $0x2] ss:$0 sm:$0xff] }
  0x2f   : > { %1291 = vmatpush1.bf16.msra.mxu1 %v3563_v44  ;;  %5103 = vst [vmem:[#allocation6_spill] sm:$0xff] %v5102_v21  ;;  %v576_v26 = vrot.slane %v574_v17, 7  ;;  %v583_v27 = vrot.slane %v581_v19, 7  ;;  %v2518_v28 = vadd.f32 %v3393_v11, %v2503_v10  ;;  %v2519_v29 = vadd.f32 %v3393_v11, %v2504_v13  ;;  %v637_v33 = vld [vmem:[#allocation2 + $0x10] sm:$0x1f]  ;;  %v2780_v51 = vld [vmem:[#allocation3 + $0x91] sm:$0xff] }
  0x30   : > { %1292 = vmatprep.subr.bf16.mxu1 %v3566_v49  ;;  %v640_v34 = vld [vmem:[#allocation2 + $0x18] sm:$0x1f]  ;;  %v2520_v35 = vadd.f32 %v3393_v11, %v2505_v14  ;;  %v2521_v39 = vadd.f32 %v3393_v11, %v2506_v15  ;;  %v2522_v40 = vadd.f32 %v3393_v11, %v2507_v22  ;;  %v2523_v41 = vadd.f32 %v3393_v11, %v2508_v23  ;;  %v4135_v3 = vld [vmem:[%s5076_s7 + $0x6] ss:$0 sm:$0xff]  ;;  %v4142_v6 = vld [vmem:[%s5076_s7 + $0x3] ss:$0 sm:$0xff] }
  0x31   : > { %v579_v44 = vor.u32 %v577_v18, %v576_v26  ;;  %v586_v45 = vor.u32 %v584_v20, %v583_v27  ;;  %v2524_v46 = vadd.f32 %v3393_v11, %v2509_v24  ;;  %v2525_v47 = vmax.f32 %v2517_v25, 0.0  ;;  %v2627_v48 = vld [vmem:[#allocation3 + $0x2] sm:$0xff]  ;;  %v2809_v52 = vld [vmem:[#allocation3 + $0x92] sm:$0xff]  ;;  %v543_v24 = vld [vmem:[#allocation2 + $0x28] sm:$0x10] }
  0x32   : > { %v2526_v49 = vmax.f32 %v2518_v28, 0.0  ;;  %v2527_v50 = vmax.f32 %v2519_v29, 0.0  ;;  %v2528_v53 = vmax.f32 %v2520_v35, 0.0  ;;  %v2529_v54 = vmax.f32 %v2521_v39, 0.0  ;;  %v3582_v0 = vld [vmem:[%s5075_s6 + $0x234] ss:$8 sps:$4 sm:$0xff]  }
  0x33   : > { %1293 = vmatpush1.bf16.msra.mxu1 %v3569_v12  ;;  %v638_v56 = vsel %vm4091_vm10, %v579_v44, %v637_v33  ;;  %v641_v57 = vsel %vm4091_vm10, %v586_v45, %v640_v34  ;;  %v2530_v58 = vmax.f32 %v2522_v40, 0.0  ;;  %v2531_v59 = vmax.f32 %v2523_v41, 0.0  ;;  %2561 = vst.msk [vmem:[#allocation3 + $0x11] sm:$0xff] %vm2533_vm0, %v2525_v47  ;;  %v3584_v1 = vld [vmem:[%s5075_s6 + $0x230] ss:$8 sps:$4 sm:$0xff]   ;;  %v447_v11 = vld [vmem:[%s3987_s26 + $0x20] sm:$0xff] }
  0x34   : > { %1294 = vmatprep.subr.bf16.mxu1 %v3573_v16  ;;  %639 = vst [vmem:[#allocation2 + $0x10] sm:$0x1f] %v638_v56  ;;  %642 = vst [vmem:[#allocation2 + $0x18] sm:$0x1f] %v641_v57  ;;  %v2532_v61 = vmax.f32 %v2524_v46, 0.0  ;;  %v2582_v62 = vmul.f32 %v4098_v31, %v2569_v30  ;;  %v2611_v63 = vmul.f32 %v4103_v42, %v2598_v32  ;;  %v446_v10 = vld [vmem:[%s3987_s26 + $0x18] sm:$0xff] }
  0x35   : > { %2562 = vst.msk [vmem:[#allocation3 + $0x21] sm:$0xff] %vm2533_vm0, %v2526_v49  ;;  %2563 = vst.msk [vmem:[#allocation3 + $0x31] sm:$0xff] %vm2533_vm0, %v2527_v50  ;;  %v2640_v5 = vmul.f32 %v4108_v55, %v2627_v48  ;;  %v4147_v7 = vld [vmem:[%s5076_s7 + $0x7] ss:$0 sm:$0xff]  ;;  %v4152_v8 = vld [vmem:[%s5076_s7 + $0x8] ss:$0 sm:$0xff]  ;;  %v4160_v13 = vmul.f32 %v4135_v3, %v2751_v60  ;;  %v461_v14 = vmul.f32 %v4009_v36, %v446_v10 }
  0x36   : > { %2564 = vst.msk [vmem:[#allocation3 + $0x41] sm:$0xff] %vm2533_vm0, %v2528_v53  ;;  %2565 = vst.msk [vmem:[#allocation3 + $0x51] sm:$0xff] %vm2533_vm0, %v2529_v54  ;;  %v3588_v9 = vld [vmem:[%s5075_s6 + $0x244] ss:$8 sps:$4 sm:$0xff]   ;;  %vm804_vm11 = vsmask.f32 3328  ;;  %v462_v15 = vmul.f32 %v4009_v36, %v447_v11  ;;  %v4167_v19 = vmul.f32 %v4147_v7, %v2780_v51  ;;  %v4170_v20 = vmul.f32 %v4152_v8, %v2809_v52 }
  0x37   : > { %1295 = vmatpush1.bf16.msra.mxu1 %v3180_v4  ;;  %2566 = vst.msk [vmem:[#allocation3 + $0x61] sm:$0xff] %vm2533_vm0, %v2530_v58  ;;  %2567 = vst.msk [vmem:[#allocation3 + $0x71] sm:$0xff] %vm2533_vm0, %v2531_v59  ;;  %v2619_v4 = vadd.f32 %v2611_v63, %v2582_v62  ;;  %vm805_vm12 = vsmask.f32 7440  ;;  %v507_v12 = vld [vmem:[#allocation2 + $0x20] sm:$0x1]  ;;  %v4186_v30 = vadd.f32 %v4014_v37, %v461_v14 }
  0x38   : > { %2568 = vst.msk [vmem:[#allocation3 + $0x81] sm:$0xff] %vm2533_vm0, %v2532_v61  ;;  %1296 = vmatprep.subr.bf16.mxu1 %v3582_v0  ;;  %v508_v16 = vsel %vm4017_vm6, 0, %v507_v12  ;;  %v510_v17 = vld [vmem:[#allocation2 + $0x28] sm:$0x1]  ;;  %v540_v18 = vld [vmem:[#allocation2 + $0x20] sm:$0x10]  ;;  %v4189_v32 = vadd.f32 %v4014_v37, %v462_v15  ;;  %vm4245_vm13 = vmor %vm804_vm11, %vm805_vm12 }
  0x39   : > { %509 = vst [vmem:[#allocation2 + $0x20] sm:$0x1] %v508_v16  ;;  %v511_v22 = vsel %vm4017_vm6, 0, %v510_v17  ;;  %v541_v23 = vsel %vm4031_vm7, 0, %v540_v18  ;;  %v3594_v25 = vld [vmem:[%s5075_s6 + $0x240] ss:$8 sps:$4 sm:$0xff]   ;;  %v4183_v29 = vadd.f32 %v2640_v5, %v2619_v4 }
  0x3a   : > { %v2570_v26 = vld [vmem:[#allocation3 + $0x10] sm:$0xff]  ;;  %512 = vst [vmem:[#allocation2 + $0x28] sm:$0x1] %v511_v22  ;;  %542 = vst [vmem:[#allocation2 + $0x20] sm:$0x10] %v541_v23  ;;  %v544_v33 = vsel %vm4031_vm7, 0, %v543_v24 }
  0x3b   : > { %1297 = vmatpush1.bf16.msra.mxu1 %v3584_v1  ;;  %v4179_v27 = vld [vmem:[#allocation3 + $0x11] sm:$0xff]  ;;  %v756_v34 = vld [vmem:[#allocation2 + $0x10] sm:$0x1f]  ;;  %v757_v35 = vld [vmem:[#allocation2 + $0x18] sm:$0x1f]  ;;  %v2583_v40 = vmul.f32 %v4098_v31, %v2570_v26  ;;  %v4203_v45 = vmul.f32 %v4142_v6, %v2570_v26  ;;  %v5104_v26 = vmov 0 }
  0x3c   : > { %1298 = vmatprep.subr.bf16.mxu1 %v3588_v9  ;;  %v4181_v28 = vld [vmem:[#allocation3 + $0x12] sm:$0xff]  ;;  %v4193_v39 = vld [vmem:[#allocation3 + $0x20] sm:$0xff]  ;;  %v2612_v41 = vmul.f32 %v4103_v42, %v4179_v27  ;;  %545 = vst [vmem:[#allocation2 + $0x28] sm:$0x10] %v544_v33  ;;  %v3087_v46 = vcombine.low %v756_v34, %v756_v34  ;;  %v3088_v47 = vcombine.high %v756_v34, %v756_v34  ;;  %v5105_v26 = vsel %vm4245_vm13, 4294967295, %v5104_v26 }
  0x3d   : > { %v4200_v44 = vmul.f32 %v4108_v55, %v4181_v28  ;;  %v3089_v48 = vcombine.low %v757_v35, %v757_v35  ;;  %v3090_v49 = vcombine.high %v757_v35, %v757_v35  ;;  %v4205_v50 = vld [vmem:[#allocation3 + $0x30] sm:$0xff]  ;;  %v4207_v53 = vld [vmem:[#allocation3 + $0x40] sm:$0xff]  ;;  %v2584_v58 = vmul.f32 %v4098_v31, %v4193_v39  ;;  %5106 = vst [vmem:[#allocation7_spill] sm:$0xff] %v5105_v26 }
  0x3e   : > { %v4209_v54 = vld [vmem:[#allocation3 + $0x50] sm:$0xff]  ;;  %v4211_v56 = vld [vmem:[#allocation3 + $0x60] sm:$0xff]  ;;  %v2585_v59 = vmul.f32 %v4098_v31, %v4205_v50  ;;  %v2586_v60 = vmul.f32 %v4098_v31, %v4207_v53  ;;  %v836_v62 = vshrl.u32 %v3087_v46, 16  ;;  %v839_v63 = vshll.u32 %v3087_v46, 16 }
  0x3f   : > { %1299 = vmatpush1.bf16.msra.mxu1 %v3594_v25  ;;  %v4213_v57 = vld [vmem:[#allocation3 + $0x70] sm:$0xff]  ;;  %v2587_v61 = vmul.f32 %v4098_v31, %v4209_v54  ;;  %v845_v0 = vshll.u32 %v3088_v47, 16  ;;  %v850_v1 = vshrl.u32 %v3089_v48, 16  ;;  %v4223_v51 = vld [vmem:[#allocation3 + $0x21] sm:$0xff]  ;;  %v853_v4 = vshll.u32 %v3089_v48, 16 }
  0x40   : > { %v4225_v52 = vld [vmem:[#allocation3 + $0x31] sm:$0xff]  ;;  %v859_v5 = vshll.u32 %v3090_v49, 16  ;;  %v2588_v9 = vmul.f32 %v4098_v31, %v4211_v56  ;;  %v2589_v10 = vmul.f32 %v4098_v31, %v4213_v57  ;;  %v4231_v11 = vld [vmem:[#allocation3 + $0x41] sm:$0xff]  ;;  %v838_v15 = vrot.slane %v836_v62, 4 }
  0x41   : > { %v4233_v12 = vld [vmem:[#allocation3 + $0x51] sm:$0xff]  ;;  %v4235_v14 = vld [vmem:[#allocation3 + $0x61] sm:$0xff]  ;;  %v841_v16 = vrot.slane %v839_v63, 5  ;;  %v847_v17 = vrot.slane %v845_v0, 5  ;;  %v852_v18 = vrot.slane %v850_v1, 4  ;;  %v855_v23 = vrot.slane %v853_v4, 5 }
  0x42   : > { %v4237_v22 = vld [vmem:[#allocation3 + $0x71] sm:$0xff]  ;;  %v861_v24 = vrot.slane %v859_v5, 5  ;;  %v2613_v25 = vmul.f32 %v4103_v42, %v4223_v51  ;;  %v2614_v31 = vmul.f32 %v4103_v42, %v4225_v52  ;;  %v2615_v34 = vmul.f32 %v4103_v42, %v4231_v11  ;;  %v4255_v47 = vld [vmem:[#allocation3 + $0x22] sm:$0xff] }
  0x43   : > { %v842_v33 = vor.u32 %v841_v16, %v838_v15  ;;  %v2616_v35 = vmul.f32 %v4103_v42, %v4233_v12  ;;  %v2617_v46 = vmul.f32 %v4103_v42, %v4235_v14  ;;  %v856_v48 = vor.u32 %v855_v23, %v852_v18  ;;  %v4259_v0 = vld [vmem:[#allocation3 + $0x32] sm:$0xff]  ;;  %v4261_v1 = vld [vmem:[#allocation3 + $0x42] sm:$0xff] }
  0x44   : > { %v2618_v49 = vmul.f32 %v4103_v42, %v4237_v22  ;;  %v2620_v62 = vadd.f32 %v2612_v41, %v2583_v40  ;;  %v2621_v63 = vadd.f32 %v2613_v25, %v2584_v58  ;;  %v4263_v4 = vld [vmem:[#allocation3 + $0x52] sm:$0xff]  ;;  %v2622_v15 = vadd.f32 %v2614_v31, %v2585_v59  ;;  %v4265_v21 = vld [vmem:[#allocation3 + $0x62] sm:$0xff] }
  0x45   : > { %v843_v5 = vrot.slane %v842_v33, 4  ;;  %v2623_v16 = vadd.f32 %v2615_v34, %v2586_v60  ;;  %v2624_v2 = vadd.f32 %v2616_v35, %v2587_v61  ;;  %v4267_v43 = vld [vmem:[#allocation3 + $0x72] sm:$0xff]  ;;  %v857_v18 = vrot.slane %v856_v48, 4  ;;  %v3598_v40 = vld [vmem:[%s5075_s6 + $0x254] ss:$8 sps:$4 sm:$0xff]  }
  0x46   : > { %v2625_v23 = vadd.f32 %v2617_v46, %v2588_v9  ;;  %v2626_v37 = vadd.f32 %v2618_v49, %v2589_v10  ;;  %v2642_v42 = vmul.f32 %v4108_v55, %v4255_v47  ;;  %v2643_v58 = vmul.f32 %v4108_v55, %v4259_v0  ;;  %v3600_v61 = vld [vmem:[%s5075_s6 + $0x250] ss:$8 sps:$4 sm:$0xff]   ;;  %v3570_v9 = vld [vmem:[%s5075_s6 + $0x100] ss:$8 sps:$4 sm:$0xff]   ;;  %1300 = vmatprep.subr.bf16.mxu1 %v3598_v40 }
  0x47   : > { %v4276_v41 = vsel %vm4245_vm13, %v843_v5, %v847_v17  ;;  %v2644_v59 = vmul.f32 %v4108_v55, %v4261_v1  ;;  %v2645_v60 = vmul.f32 %v4108_v55, %v4263_v4  ;;  %v4292_v10 = vsel %vm4245_vm13, %v857_v18, %v861_v24  ;;  %v4303_v48 = vld [vmem:[#allocation3 + $0x80] sm:$0xff]  ;;  %1301 = vmatpush1.bf16.msra.mxu1 %v3600_v61  ;;  %v3604_v18 = vld [vmem:[%s5075_s6 + $0x264] ss:$8 sps:$4 sm:$0xff]  }
  0x48   : > { %5107 = vst [vmem:[#allocation8_spill] sm:$0xff] %v4276_v41  ;;  %5108 = vst [vmem:[#allocation9_spill] sm:$0xff] %v4292_v10  ;;  %v2646_v17 = vmul.f32 %v4108_v55, %v4265_v21  ;;  %v2647_v25 = vmul.f32 %v4108_v55, %v4267_v43  ;;  %v2649_v31 = vadd.f32 %v4200_v44, %v2620_v62  ;;  %v3581_v24 = vld [vmem:[%s5075_s6 + $0x114] ss:$8 sps:$4 sm:$0xff]   ;;  %1302 = vmatprep.subr.bf16.mxu1 %v3604_v18 }
  0x49   : > { %v4301_v33 = vcombine.low %v4276_v41, %v4292_v10  ;;  %v2650_v34 = vadd.f32 %v2642_v42, %v2621_v63  ;;  %v2651_v35 = vadd.f32 %v2643_v58, %v2622_v15  ;;  %v2652_v46 = vadd.f32 %v2644_v59, %v2623_v16  ;;  %v3587_v59 = vld [vmem:[%s5075_s6 + $0x124] ss:$8 sps:$4 sm:$0xff]   ;;  %v4360_v18 = vld [vmem:[#allocation3 + $0x82] sm:$0xff] }
  0x4a   : > { %v2653_v49 = vadd.f32 %v2645_v60, %v2624_v2  ;;  %v2654_v5 = vadd.f32 %v2646_v17, %v2625_v23  ;;  %v2655_v55 = vadd.f32 %v2647_v25, %v2626_v37  ;;  %v2670_v44 = vmul.f32 %v4142_v6, %v4193_v39  ;;  %v3398_v2 = vld [vmem:[%s5076_s7 + $0x4] ss:$0 sm:$0xff]  ;;  %v3579_v37 = vld [vmem:[%s5075_s6 + $0x110] ss:$8 sps:$4 sm:$0xff]  }
  0x4b   : > { %5109 = vst [vmem:[#allocation10_spill] sm:$0xff] %v4301_v33  ;;  %1380 = vmatmul.mubr.bf16.vlgmr.msra.gmra.mrb[0].mxu0 %v4301_v33  ;;  %v2671_v62 = vmul.f32 %v4142_v6, %v4205_v50  ;;  %v2672_v63 = vmul.f32 %v4142_v6, %v4207_v53  ;;  %v2673_v15 = vmul.f32 %v4142_v6, %v4209_v54  ;;  %v4337_v33 = vld [vmem:[#allocation3 + $0x81] sm:$0xff] }
  0x4c   : > { %v2674_v16 = vmul.f32 %v4142_v6, %v4211_v56  ;;  %v2675_v23 = vmul.f32 %v4142_v6, %v4213_v57  ;;  %v2676_v42 = vmul.f32 %v4142_v6, %v4303_v48  ;;  %v2677_v40 = vadd.f32 %v4203_v45, %v4183_v29  ;;  %1734 = vmatpush1.bf16.msra.mxu0 %v3570_v9  ;;  %v3610_v45 = vld [vmem:[%s5075_s6 + $0x260] ss:$8 sps:$4 sm:$0xff]  }
  0x4d   : > { %v2678_v58 = vadd.f32 %v2670_v44, %v2649_v31  ;;  %v2679_v60 = vadd.f32 %v2671_v62, %v2650_v34  ;;  %v2680_v61 = vadd.f32 %v2672_v63, %v2651_v35  ;;  %v2681_v17 = vadd.f32 %v2673_v15, %v2652_v46  ;;  %1735 = vmatprep.subr.bf16.mxu0 %v3581_v24  ;;  %v3614_v46 = vld [vmem:[%s5075_s6 + $0x274] ss:$8 sps:$4 sm:$0xff]   ;;  %v3585_v44 = vld [vmem:[%s5075_s6 + $0x120] ss:$8 sps:$4 sm:$0xff]  }
  0x4e   : > { %v2682_v25 = vadd.f32 %v2674_v16, %v2653_v49  ;;  %v2683_v10 = vadd.f32 %v2675_v23, %v2654_v5  ;;  %v2684_v41 = vadd.f32 %v2676_v42, %v2655_v55  ;;  %v2698_v6 = vmul.f32 %v3398_v2, %v4179_v27  ;;  %v3399_v27 = vld [vmem:[%s5076_s7 + $0x5] ss:$0 sm:$0xff]  ;;  %v3597_v23 = vld [vmem:[%s5075_s6 + $0x134] ss:$8 sps:$4 sm:$0xff]   ;;  %1303 = vmatpush1.bf16.msra.mxu1 %v3610_v45 }
  0x4f   : > { %v2699_v26 = vmul.f32 %v3398_v2, %v4223_v51  ;;  %v5110_v29 = vmov 0   ;;  %v2700_v9 = vmul.f32 %v3398_v2, %v4225_v52  ;;  %v2701_v31 = vmul.f32 %v3398_v2, %v4231_v11  ;;  %1304 = vmatprep.subr.bf16.mxu1 %v3614_v46 }
  0x50   : > { %1389 = vmatprep.mubr.bf16.mxu0 %v5110_v29  ;;  %v2702_v34 = vmul.f32 %v3398_v2, %v4233_v12  ;;  %v2703_v35 = vmul.f32 %v3398_v2, %v4235_v14  ;;  %v2704_v24 = vmul.f32 %v3398_v2, %v4237_v22  ;;  %v2705_v49 = vmul.f32 %v3398_v2, %v4337_v33 }
  0x51   : > { %v2706_v5 = vadd.f32 %v2698_v6, %v2677_v40  ;;  %v2707_v55 = vadd.f32 %v2699_v26, %v2678_v58  ;;  %1736 = vmatpush1.bf16.msra.mxu0 %v3579_v37  ;;  %v2708_v62 = vadd.f32 %v2700_v9, %v2679_v60  ;;  %v2709_v63 = vadd.f32 %v2701_v31, %v2680_v61  ;;  %v3616_v40 = vld [vmem:[%s5075_s6 + $0x270] ss:$8 sps:$4 sm:$0xff]   ;;  %v3630_v6 = vld [vmem:[%s5075_s6 + $0x4] ss:$8 sps:$4 sm:$0xff]  }
  0x52   : > { %v2710_v15 = vadd.f32 %v2702_v34, %v2681_v17  ;;  %v2711_v16 = vadd.f32 %v2703_v35, %v2682_v25  ;;  %1737 = vmatprep.subr.bf16.mxu0 %v3587_v59  ;;  %v2712_v42 = vadd.f32 %v2704_v24, %v2683_v10  ;;  %v2713_v2 = vadd.f32 %v2705_v49, %v2684_v41  ;;  %v3595_v25 = vld [vmem:[%s5075_s6 + $0x130] ss:$8 sps:$4 sm:$0xff]   ;;  %v3603_v35 = vld [vmem:[%s5075_s6 + $0x144] ss:$8 sps:$4 sm:$0xff]  }
  0x53   : > { %v2727_v26 = vmul.f32 %v3399_v27, %v4181_v28  ;;  %v2728_v37 = vmul.f32 %v3399_v27, %v4255_v47  ;;  %v2729_v58 = vmul.f32 %v3399_v27, %v4259_v0  ;;  %v2730_v60 = vmul.f32 %v3399_v27, %v4261_v1  ;;  %1305 = vmatpush1.bf16.msra.mxu1 %v3616_v40 }
  0x54   : > { %v2731_v59 = vmul.f32 %v3399_v27, %v4263_v4  ;;  %v2732_v61 = vmul.f32 %v3399_v27, %v4265_v21  ;;  %v2733_v41 = vmul.f32 %v3399_v27, %v4267_v43  ;;  %v2734_v28 = vmul.f32 %v3399_v27, %v4360_v18  ;;  %1660 = vmatprep.subr.bf16.mxu1 %v3630_v6 }
  0x55   : > { %v2735_v10 = vadd.f32 %v2727_v26, %v2706_v5  ;;  %v2736_v17 = vadd.f32 %v2728_v37, %v2707_v55  ;;  %1738 = vmatpush1.bf16.msra.mxu0 %v3585_v44  ;;  %v2737_v45 = vadd.f32 %v2729_v58, %v2708_v62  ;;  %v2738_v9 = vadd.f32 %v2730_v60, %v2709_v63 }
  0x56   : > { %v2739_v31 = vadd.f32 %v2731_v59, %v2710_v15  ;;  %v2740_v34 = vadd.f32 %v2732_v61, %v2711_v16  ;;  %1739 = vmatprep.subr.bf16.mxu0 %v3597_v23  ;;  %v2741_v27 = vadd.f32 %v2733_v41, %v2712_v42  ;;  %v2742_v46 = vadd.f32 %v2734_v28, %v2713_v2 }
  0x57   : > { %v2757_v24 = vmul.f32 %v4135_v3, %v4193_v39  ;;  %v2758_v49 = vmul.f32 %v4135_v3, %v4205_v50  ;;  %v2759_v5 = vmul.f32 %v4135_v3, %v4207_v53  ;;  %v2760_v55 = vmul.f32 %v4135_v3, %v4209_v54  ;;  %v3601_v53 = vld [vmem:[%s5075_s6 + $0x140] ss:$8 sps:$4 sm:$0xff]  }
  0x58   : > { %v2761_v44 = vmul.f32 %v4135_v3, %v4211_v56  ;;  %v2762_v62 = vmul.f32 %v4135_v3, %v4213_v57  ;;  %v2763_v39 = vmul.f32 %v4135_v3, %v4303_v48  ;;  %v2772_v50 = vadd.f32 %v4160_v13, %v2742_v46  ;;  %v3613_v57 = vld [vmem:[%s5075_s6 + $0x154] ss:$8 sps:$4 sm:$0xff]  }
  0x59   : > { %v2765_v63 = vadd.f32 %v2757_v24, %v2735_v10  ;;  %v2766_v15 = vadd.f32 %v2758_v49, %v2736_v17  ;;  %1740 = vmatpush1.bf16.msra.mxu0 %v3595_v25  ;;  %v2767_v54 = vadd.f32 %v2759_v5, %v2737_v45  ;;  %v2768_v16 = vadd.f32 %v2760_v55, %v2738_v9 }
  0x5a   : > { %v2769_v23 = vadd.f32 %v2761_v44, %v2739_v31  ;;  %v2770_v56 = vadd.f32 %v2762_v62, %v2740_v34  ;;  %1741 = vmatprep.subr.bf16.mxu0 %v3603_v35  ;;  %v2771_v42 = vadd.f32 %v2763_v39, %v2741_v27  ;;  %v2786_v3 = vmul.f32 %v4147_v7, %v4223_v51  ;;  %v448_v62 = vld [vmem:[%s3987_s26 + $0x28] sm:$0xff]  ;;  %v3631_v39 = vld [vmem:[%s5075_s6 + $0x170] ss:$8 sps:$4 sm:$0xff]  }
  0x5b   : > { %v2787_v13 = vmul.f32 %v4147_v7, %v4225_v52  ;;  %v2788_v48 = vmul.f32 %v4147_v7, %v4231_v11  ;;  %v2789_v2 = vmul.f32 %v4147_v7, %v4233_v12  ;;  %v2790_v26 = vmul.f32 %v4147_v7, %v4235_v14  ;;  %v3611_v11 = vld [vmem:[%s5075_s6 + $0x150] ss:$8 sps:$4 sm:$0xff]  }
  0x5c   : > { %v2791_v37 = vmul.f32 %v4147_v7, %v4237_v22  ;;  %v2792_v40 = vmul.f32 %v4147_v7, %v4337_v33  ;;  %v2794_v51 = vadd.f32 %v2786_v3, %v2765_v63  ;;  %v2801_v52 = vadd.f32 %v4167_v19, %v2772_v50  ;;  %v3623_v22 = vld [vmem:[%s5075_s6 + $0x164] ss:$8 sps:$4 sm:$0xff]   ;;  %v513_v3 = vld [vmem:[#allocation2 + $0x30] sm:$0x1] }
  0x5d   : > { %v2795_v58 = vadd.f32 %v2787_v13, %v2766_v15  ;;  %v2796_v60 = vadd.f32 %v2788_v48, %v2767_v54  ;;  %1742 = vmatpush1.bf16.msra.mxu0 %v3601_v53  ;;  %v2797_v12 = vadd.f32 %v2789_v2, %v2768_v16  ;;  %v2798_v59 = vadd.f32 %v2790_v26, %v2769_v23  ;;  %v449_v54 = vld [vmem:[%s3987_s26 + $0x30] sm:$0xff]  ;;  %v3639_v16 = vld [vmem:[%s5075_s6 + $0x304] ss:$8 sps:$4 sm:$0xff]  }
  0x5e   : > { %v2799_v61 = vadd.f32 %v2791_v37, %v2770_v56  ;;  %v2800_v14 = vadd.f32 %v2792_v40, %v2771_v42  ;;  %1743 = vmatprep.subr.bf16.mxu0 %v3613_v57  ;;  %v2815_v7 = vmul.f32 %v4152_v8, %v4255_v47  ;;  %v2816_v19 = vmul.f32 %v4152_v8, %v4259_v0  ;;  %v516_v37 = vld [vmem:[#allocation2 + $0x38] sm:$0x1] }
  0x5f   : > { %v2817_v33 = vmul.f32 %v4152_v8, %v4261_v1  ;;  %v2818_v41 = vmul.f32 %v4152_v8, %v4263_v4  ;;  %v2819_v28 = vmul.f32 %v4152_v8, %v4265_v21  ;;  %v2820_v10 = vmul.f32 %v4152_v8, %v4267_v43  ;;  %v3621_v21 = vld [vmem:[%s5075_s6 + $0x160] ss:$8 sps:$4 sm:$0xff]  }
  0x60   : > { %v2821_v47 = vmul.f32 %v4152_v8, %v4360_v18  ;;  %v2830_v0 = vadd.f32 %v4170_v20, %v2801_v52  ;;  %v2823_v17 = vadd.f32 %v2815_v7, %v2794_v51  ;;  %v2824_v1 = vadd.f32 %v2816_v19, %v2795_v58  ;;  %v3633_v18 = vld [vmem:[%s5075_s6 + $0x174] ss:$8 sps:$4 sm:$0xff]  }
  0x61   : > { %v2825_v25 = vadd.f32 %v2817_v33, %v2796_v60  ;;  %v2826_v6 = vadd.f32 %v2818_v41, %v2797_v12  ;;  %1744 = vmatpush1.bf16.msra.mxu0 %v3611_v11  ;;  %v2827_v43 = vadd.f32 %v2819_v28, %v2798_v59  ;;  %v2828_v4 = vadd.f32 %v2820_v10, %v2799_v61  ;;  %v546_v61 = vld [vmem:[#allocation2 + $0x30] sm:$0x10] }
  0x62   : > { %v2829_v8 = vadd.f32 %v2821_v47, %v2800_v14  ;;  %2838 = vst.msk [vmem:[%s4431_s24 + $0x38] sm:$0xff] %vm2533_vm0, %v2830_v0  ;;  %v4454_v20 = vsel %vm2533_vm0, %v2830_v0, 0.0  ;;  %1745 = vmatprep.subr.bf16.mxu0 %v3623_v22  ;;  %2831 = vst.msk [vmem:[%s4431_s24] sm:$0xff] %vm2533_vm0, %v2823_v17  ;;  %v2839_v45 = vsel %vm2533_vm0, %v2823_v17, 0.0  ;;  %v2840_v9 = vsel %vm2533_vm0, %v2824_v1, 0.0  ;;  %v5111_v28 = vld [vmem:[#allocation4_spill] sm:$0xff] }
  0x63   : > { %2832 = vst.msk [vmem:[%s4431_s24 + $0x8] sm:$0xff] %vm2533_vm0, %v2824_v1  ;;  %2833 = vst.msk [vmem:[%s4431_s24 + $0x10] sm:$0xff] %vm2533_vm0, %v2825_v25  ;;  %v2842_v31 = vsel %vm2533_vm0, %v2825_v25, 0.0  ;;  %v2844_v34 = vsel %vm2533_vm0, %v2826_v6, 0.0  ;;  %v2841_v35 = vadd.f32 %v2840_v9, %v2839_v45  ;;  %v2846_v27 = vsel %vm2533_vm0, %v2827_v43, 0.0 }
  0x64   : > { %2834 = vst.msk [vmem:[%s4431_s24 + $0x18] sm:$0xff] %vm2533_vm0, %v2826_v6  ;;  %2835 = vst.msk [vmem:[%s4431_s24 + $0x20] sm:$0xff] %vm2533_vm0, %v2827_v43  ;;  %v2848_v46 = vsel %vm2533_vm0, %v2828_v4, 0.0  ;;  %v2850_v24 = vsel %vm2533_vm0, %v2829_v8, 0.0  ;;  %v2860_v49 = vmul.f32 %v2823_v17, %v2823_v17  ;;  %v2861_v5 = vmul.f32 %v2824_v1, %v2824_v1 }
  0x65   : > { %2836 = vst.msk [vmem:[%s4431_s24 + $0x28] sm:$0xff] %vm2533_vm0, %v2828_v4  ;;  %2837 = vst.msk [vmem:[%s4431_s24 + $0x30] sm:$0xff] %vm2533_vm0, %v2829_v8  ;;  %v2862_v55 = vmul.f32 %v2825_v25, %v2825_v25  ;;  %v2863_v44 = vmul.f32 %v2826_v6, %v2826_v6  ;;  %1746 = vmatpush1.bf16.msra.mxu0 %v3621_v21  ;;  %v2843_v63 = vadd.f32 %v2842_v31, %v2841_v35  ;;  %v443_v25 = vld [vmem:[%s3987_s26] sm:$0xff] }
  0x66   : > { %v2864_v15 = vmul.f32 %v2827_v43, %v2827_v43  ;;  %v2865_v50 = vmul.f32 %v2828_v4, %v2828_v4  ;;  %v2866_v53 = vmul.f32 %v2829_v8, %v2829_v8  ;;  %1747 = vmatprep.subr.bf16.mxu0 %v3633_v18  ;;  %v2867_v23 = vmul.f32 %v2830_v0, %v2830_v0  ;;  %v495_v8 = vld [vmem:[#allocation2] sm:$0x1] }
  0x67   : > { %v2868_v56 = vsel %vm2533_vm0, %v2860_v49, 0.0  ;;  %v2869_v57 = vsel %vm2533_vm0, %v2861_v5, 0.0  ;;  %v2871_v42 = vsel %vm2533_vm0, %v2862_v55, 0.0  ;;  %v2845_v13 = vadd.f32 %v2844_v34, %v2843_v63  ;;  %v646_v49 = vld [vmem:[#allocation2 + $0x28] sm:$0x1f] }
  0x68   : > { %v2870_v48 = vadd.f32 %v2869_v57, %v2868_v56  ;;  %v2873_v2 = vsel %vm2533_vm0, %v2863_v44, 0.0  ;;  %v2875_v26 = vsel %vm2533_vm0, %v2864_v15, 0.0  ;;  %v2877_v40 = vsel %vm2533_vm0, %v2865_v50, 0.0  ;;  %v498_v63 = vld [vmem:[#allocation2 + $0x8] sm:$0x1] }
  0x69   : > { %v2879_v51 = vsel %vm2533_vm0, %v2866_v53, 0.0  ;;  %v2881_v58 = vsel %vm2533_vm0, %v2867_v23, 0.0  ;;  %v484_v60 = vmax.f32 %v4186_v30, 0.0  ;;  %1748 = vmatpush1.bf16.msra.mxu0 %v3631_v39  ;;  %v2847_v52 = vadd.f32 %v2846_v27, %v2845_v13  ;;  %v3781_v53 = vld [vmem:[%s5072_s3] ss:$0 sm:$0xff] }
  0x6a   : > { %v2872_v11 = vadd.f32 %v2871_v42, %v2870_v48  ;;  %v485_v12 = vmax.f32 %v4189_v32, 0.0  ;;  %v463_v59 = vmul.f32 %v4009_v36, %v448_v62  ;;  %2226 = vmatprep.subr.bf16.mxu0 %v3639_v16  ;;  %v464_v22 = vmul.f32 %v4009_v36, %v449_v54  ;;  %v549_v32 = vld [vmem:[#allocation2 + $0x38] sm:$0x10]  ;;  %v528_v16 = vld [vmem:[#allocation2] sm:$0x10] }
  0x6b   : > { %v561_v14 = vpack.c.bf16 %v484_v60, %v484_v60  ;;  %v514_v7 = vsel %vm4017_vm6, 0, %v513_v3  ;;  %v517_v19 = vsel %vm4017_vm6, 0, %v516_v37  ;;  %v2849_v30 = vadd.f32 %v2848_v46, %v2847_v52  ;;  %v643_v46 = vld [vmem:[#allocation2 + $0x20] sm:$0x1f]  ;;  %v531_v23 = vld [vmem:[#allocation2 + $0x8] sm:$0x10] }
  0x6c   : > { %v2874_v33 = vadd.f32 %v2873_v2, %v2872_v11  ;;  %v562_v41 = vpack.c.bf16 %v485_v12, %v485_v12  ;;  %v478_v10 = vadd.f32 %v5111_v28, %v463_v59  ;;  %515 = vst [vmem:[#allocation2 + $0x30] sm:$0x1] %v514_v7  ;;  %518 = vst [vmem:[#allocation2 + $0x38] sm:$0x1] %v517_v19  ;;  %v547_v36 = vsel %vm4031_vm7, 0, %v546_v61  ;;  %v450_v48 = vld [vmem:[%s3987_s26 + $0x38] sm:$0xff] }
  0x6d   : > { %v588_v47 = vshrl.u32 %v561_v14, 16  ;;  %v591_v0 = vshll.u32 %v561_v14, 16  ;;  %v479_v17 = vadd.f32 %v5111_v28, %v464_v22  ;;  %v2851_v6 = vadd.f32 %v2850_v24, %v2849_v30  ;;  %548 = vst [vmem:[#allocation2 + $0x30] sm:$0x10] %v547_v36  ;;  %v3780_v24 = vld [vmem:[%s5071_s2] ss:$0 sm:$0xff] }
  0x6e   : > { %v2876_v21 = vadd.f32 %v2875_v26, %v2874_v33  ;;  %v595_v43 = vshrl.u32 %v562_v41, 16  ;;  %v598_v4 = vshll.u32 %v562_v41, 16  ;;  %v486_v45 = vmax.f32 %v478_v10, 0.0  ;;  %v522_v59 = vld [vmem:[#allocation2 + $0x48] sm:$0x1]  ;;  %s3071_s26 = sshll.u32 %s5121_s18, 1 }
  0x6f   : > { %v590_v18 = vrot.slane %v588_v47, 7  ;;  %v487_v9 = vmax.f32 %v479_v17, 0.0  ;;  %v550_v31 = vsel %vm4031_vm7, 0, %v549_v32  ;;  %v2853_v34 = vadd.f32 %v4454_v20, %v2851_v6  ;;  %v552_v10 = vld [vmem:[#allocation2 + $0x40] sm:$0x10]  ;;  %s441_s23 = scalar_lea.vmem %s5080_s11, %s3071_s26 }
  0x70   : > { %v2878_v35 = vadd.f32 %v2877_v40, %v2876_v21  ;;  %v597_v27 = vrot.slane %v595_v43, 7  ;;  %551 = vst [vmem:[#allocation2 + $0x38] sm:$0x10] %v550_v31  ;;  %v458_v5 = vmul.f32 %v3780_v24, %v443_v25  ;;  %v563_v44 = vpack.c.bf16 %v486_v45, %v486_v45  ;;  %v555_v36 = vld [vmem:[#allocation2 + $0x48] sm:$0x10] }
  0x71   : > { %v593_v55 = vor.u32 %v591_v0, %v590_v18  ;;  %v564_v62 = vpack.c.bf16 %v487_v9, %v487_v9  ;;  %v496_v39 = vsel %vm4017_vm6, 0, %v495_v8  ;;  %v2854_v15 = vrot.slane %v2853_v34, 4  ;;  %v3640_v56 = vld [vmem:[%s5075_s6 + $0x20] ss:$8 sps:$4 sm:$0xff]  }
  0x72   : > { %v2880_v20 = vadd.f32 %v2879_v51, %v2878_v35  ;;  %v600_v50 = vor.u32 %v598_v4, %v597_v27  ;;  %v473_v54 = vadd.f32 %v3781_v53, %v458_v5  ;;  %497 = vst [vmem:[#allocation2] sm:$0x1] %v496_v39  ;;  %v602_v42 = vshrl.u32 %v563_v44, 16  ;;  %v519_v51 = vld [vmem:[#allocation2 + $0x40] sm:$0x1] }
  0x73   : > { %v644_v57 = vsel %vm4091_vm10, %v593_v55, %v643_v46  ;;  %v605_v3 = vshll.u32 %v563_v44, 16  ;;  %v609_v13 = vshrl.u32 %v564_v62, 16  ;;  %v2855_v2 = vadd.f32 %v2854_v15, %v2853_v34 }
  0x74   : > { %v2882_v26 = vadd.f32 %v2881_v58, %v2880_v20  ;;  %645 = vst [vmem:[#allocation2 + $0x20] sm:$0x1f] %v644_v57  ;;  %v647_v37 = vsel %vm4091_vm10, %v600_v50, %v646_v49  ;;  %v612_v40 = vshll.u32 %v564_v62, 16  ;;  %v604_v60 = vrot.slane %v602_v42, 7  ;;  %v649_v22 = vld [vmem:[#allocation2 + $0x30] sm:$0x1f] }
  0x75   : > { %648 = vst [vmem:[#allocation2 + $0x28] sm:$0x1f] %v647_v37  ;;  %v611_v52 = vrot.slane %v609_v13, 7  ;;  %v481_v11 = vmax.f32 %v473_v54, 0.0  ;;  %v499_v12 = vsel %vm4017_vm6, 0, %v498_v63  ;;  %v2856_v61 = vrot.slane %v2855_v2, 2 }
  0x76   : > { %v2883_v14 = vrot.slane %v2882_v26, 4  ;;  %500 = vst [vmem:[#allocation2 + $0x8] sm:$0x1] %v499_v12  ;;  %v529_v58 = vsel %vm4031_vm7, 0, %v528_v16  ;;  %v532_v7 = vsel %vm4031_vm7, 0, %v531_v23  ;;  %v607_v19 = vor.u32 %v605_v3, %v604_v60 }
  0x77   : > { %v614_v30 = vor.u32 %v612_v40, %v611_v52  ;;  %v652_v33 = vld [vmem:[#allocation2 + $0x38] sm:$0x1f]  ;;  %530 = vst [vmem:[#allocation2] sm:$0x10] %v529_v58  ;;  %533 = vst [vmem:[#allocation2 + $0x8] sm:$0x10] %v532_v7  ;;  %v558_v41 = vpack.c.bf16 %v481_v11, %v481_v11  ;;  %v465_v28 = vmul.f32 %v3780_v24, %v450_v48 }
  0x78   : > { %v2857_v32 = vadd.f32 %v2856_v61, %v2855_v2  ;;  %v2884_v47 = vadd.f32 %v2883_v14, %v2882_v26  ;;  %v520_v0 = vsel %vm4017_vm6, 0, %v519_v51  ;;  %v523_v17 = vsel %vm4017_vm6, 0, %v522_v59 }
  0x79   : > { %v650_v25 = vsel %vm4091_vm10, %v607_v19, %v649_v22  ;;  %v653_v6 = vsel %vm4091_vm10, %v614_v30, %v652_v33  ;;  %v567_v21 = vshrl.u32 %v558_v41, 16  ;;  %v570_v43 = vshll.u32 %v558_v41, 16  ;;  %521 = vst [vmem:[#allocation2 + $0x40] sm:$0x1] %v520_v0  ;;  %524 = vst [vmem:[#allocation2 + $0x48] sm:$0x1] %v523_v17 }
  0x7a   : > { %v2858_v4 = vrot.slane %v2857_v32, 1  ;;  %v2885_v8 = vrot.slane %v2884_v47, 2  ;;  %651 = vst [vmem:[#allocation2 + $0x30] sm:$0x1f] %v650_v25  ;;  %654 = vst [vmem:[#allocation2 + $0x38] sm:$0x1f] %v653_v6  ;;  %v4539_v18 = vadd.f32 %v3781_v53, %v465_v28 }
  0x7b   : > { %v553_v38 = vsel %vm4031_vm7, 0, %v552_v10  ;;  %v758_v45 = vld [vmem:[#allocation2 + $0x20] sm:$0x1f]  ;;  %v569_v9 = vrot.slane %v567_v21, 7  ;;  %v556_v31 = vsel %vm4031_vm7, 0, %v555_v36  ;;  %vm1857_vm0 = vcmask 1046532  }
  0x7c   : > { %554 = vst [vmem:[#allocation2 + $0x40] sm:$0x10] %v553_v38  ;;  %v2859_v34 = vadd.f32 %v2858_v4, %v2857_v32  ;;  %v2886_v35 = vadd.f32 %v2885_v8, %v2884_v47  ;;  %v759_v27 = vld [vmem:[#allocation2 + $0x28] sm:$0x1f]  ;;  %v3091_v46 = vcombine.low %v758_v45, %v758_v45  ;;  %v3092_v49 = vcombine.high %v758_v45, %v758_v45  ;;  %vm4734_vm1 = vmor %vm1856_vm15, %vm1857_vm0 }
  0x7d   : > { %557 = vst [vmem:[#allocation2 + $0x48] sm:$0x10] %v556_v31  ;;  %v3093_v24 = vcombine.low %v759_v27, %v759_v27  ;;  %v3094_v5 = vcombine.high %v759_v27, %v759_v27  ;;  %v572_v55 = vor.u32 %v570_v43, %v569_v9  ;;  %v488_v44 = vmax.f32 %v4539_v18, 0.0 }
  0x7e   : > { %v2887_v62 = vrot.slane %v2886_v35, 1  ;;  %v864_v39 = vshrl.u32 %v3091_v46, 16  ;;  %v867_v63 = vshll.u32 %v3091_v46, 16  ;;  %v873_v15 = vshll.u32 %v3092_v49, 16  ;;  %v634_v20 = vld [vmem:[#allocation2 + $0x8] sm:$0x1f] }
  0x7f   : > { %v878_v50 = vshrl.u32 %v3093_v24, 16  ;;  %v881_v1 = vshll.u32 %v3093_v24, 16  ;;  %v887_v53 = vshll.u32 %v3094_v5, 16  ;;  %v635_v54 = vsel %vm4091_vm10, %v572_v55, %v634_v20  ;;  %v754_v16 = vld [vmem:[#allocation2] sm:$0x1f] }
  0x80   : > { %v2888_v23 = vadd.f32 %v2887_v62, %v2886_v35  ;;  %v866_v57 = vrot.slane %v864_v39, 4  ;;  %v869_v42 = vrot.slane %v867_v63, 5  ;;  %v875_v3 = vrot.slane %v873_v15, 5  ;;  %636 = vst [vmem:[#allocation2 + $0x8] sm:$0x1f] %v635_v54 }
  0x81   : > { %v880_v13 = vrot.slane %v878_v50, 4  ;;  %v883_v48 = vrot.slane %v881_v1, 5  ;;  %v889_v2 = vrot.slane %v887_v53, 5  ;;  %v760_v26 = vld [vmem:[#allocation2 + $0x30] sm:$0x1f]  ;;  %v3083_v37 = vcombine.low %v754_v16, %v754_v16 }
  0x82   : > { %v2889_v40 = vsel %vm492_vm2, %v2859_v34, %v2888_v23  ;;  %v870_v51 = vor.u32 %v869_v42, %v866_v57  ;;  %v761_v60 = vld [vmem:[#allocation2 + $0x38] sm:$0x1f]  ;;  %v3095_v52 = vcombine.low %v760_v26, %v760_v26  ;;  %v3096_v11 = vcombine.high %v760_v26, %v760_v26 }
  0x83   : > { %2891 = vst.msk [vmem:[%s441_s23] sm:$0x3] %vm2890_vm14, %v2889_v40  ;;  %v884_v12 = vor.u32 %v883_v48, %v880_v13  ;;  %v3097_v59 = vcombine.low %v761_v60, %v761_v60  ;;  %v3098_v61 = vcombine.high %v761_v60, %v761_v60  ;;  %v3084_v14 = vcombine.high %v754_v16, %v754_v16 }
  0x84   : > { %v871_v22 = vrot.slane %v870_v51, 4  ;;  %v892_v58 = vshrl.u32 %v3095_v52, 16  ;;  %v895_v7 = vshll.u32 %v3095_v52, 16  ;;  %v901_v19 = vshll.u32 %v3096_v11, 16  ;;  %v763_v57 = vld [vmem:[#allocation2 + $0x48] sm:$0x1f] }
  0x85   : > { %v885_v30 = vrot.slane %v884_v12, 4  ;;  %v906_v33 = vshrl.u32 %v3097_v59, 16  ;;  %v909_v41 = vshll.u32 %v3097_v59, 16  ;;  %v915_v28 = vshll.u32 %v3098_v61, 16  ;;  %v5115_v51 = vld [vmem:[#allocation8_spill] sm:$0xff]  ;;  %v5116_v12 = vld [vmem:[#allocation9_spill] sm:$0xff] }
  0x86   : > { %v876_v32 = vsel %vm4245_vm13, %v871_v22, %v875_v3  ;;  %v894_v47 = vrot.slane %v892_v58, 4  ;;  %v897_v0 = vrot.slane %v895_v7, 5  ;;  %v903_v17 = vrot.slane %v901_v19, 5  ;;  %v3628_v11 = vld [vmem:[%s5075_s6] ss:$8 sps:$4 sm:$0xff]  }
  0x87   : > { %v4558_v36 = vsel %vm4245_vm13, %v885_v30, %v889_v2  ;;  %v908_v25 = vrot.slane %v906_v33, 4  ;;  %v911_v6 = vrot.slane %v909_v41, 5  ;;  %v917_v21 = vrot.slane %v915_v28, 5  ;;  %v755_v43 = vld [vmem:[#allocation2 + $0x8] sm:$0x1f] }
  0x88   : > { %v4561_v4 = vcombine.low %v876_v32, %v4558_v36  ;;  %v898_v8 = vor.u32 %v897_v0, %v894_v47  ;;  %v3085_v38 = vcombine.low %v755_v43, %v755_v43  ;;  %v3086_v45 = vcombine.high %v755_v43, %v755_v43  ;;  %v3636_v61 = vld [vmem:[%s5075_s6 + $0x14] ss:$8 sps:$4 sm:$0xff]   ;;  %v3634_v7 = vld [vmem:[%s5075_s6 + $0x10] ss:$8 sps:$4 sm:$0xff]   ;;  %v3642_v19 = vld [vmem:[%s5075_s6 + $0x24] ss:$8 sps:$4 sm:$0xff]  }
  0x89   : > { %v912_v9 = vor.u32 %v911_v6, %v908_v25  ;;  %v808_v31 = vshrl.u32 %v3083_v37, 16  ;;  %v811_v34 = vshll.u32 %v3083_v37, 16  ;;  %v817_v35 = vshll.u32 %v3084_v14, 16  ;;  %v3647_v43 = vld [vmem:[%s5075_s6 + $0x30] ss:$8 sps:$4 sm:$0xff]  }
  0x8a   : > { %1390 = vmatmul.mubr.bf16.gmra.mrb[4].mxu0 %v4561_v4  ;;  %v899_v27 = vrot.slane %v898_v8, 4  ;;  %v822_v46 = vshrl.u32 %v3085_v38, 16  ;;  %v825_v49 = vshll.u32 %v3085_v38, 16  ;;  %v831_v24 = vshll.u32 %v3086_v45, 16  ;;  %v3655_v45 = vld [vmem:[%s5075_s6 + $0x44] ss:$8 sps:$4 sm:$0xff]  }
  0x8b   : > { %1399 = vmatprep.mubr.bf16.mxu0 %v5110_v29  ;;  %v913_v5 = vrot.slane %v912_v9, 4  ;;  %v810_v55 = vrot.slane %v808_v31, 4  ;;  %v813_v62 = vrot.slane %v811_v34, 5  ;;  %v819_v1 = vrot.slane %v817_v35, 5 }
  0x8c   : > { %v904_v39 = vsel %vm4245_vm13, %v899_v27, %v903_v17  ;;  %v824_v63 = vrot.slane %v822_v46, 4  ;;  %v827_v15 = vrot.slane %v825_v49, 5  ;;  %v565_v53 = vpack.c.bf16 %v488_v44, %v488_v44  ;;  %v655_v44 = vld [vmem:[#allocation2 + $0x40] sm:$0x1f] }
  0x8d   : > { %v4569_v20 = vsel %vm4245_vm13, %v913_v5, %v917_v21  ;;  %v814_v50 = vor.u32 %v813_v62, %v810_v55  ;;  %v833_v23 = vrot.slane %v831_v24, 5  ;;  %v3101_v37 = vcombine.low %v763_v57, %v763_v57  ;;  %v5117_v21 = vld [vmem:[#allocation10_spill] sm:$0xff]  ;;  %v3661_v24 = vld [vmem:[%s5075_s6 + $0x54] ss:$8 sps:$4 sm:$0xff]   ;;  %v3659_v62 = vld [vmem:[%s5075_s6 + $0x50] ss:$8 sps:$4 sm:$0xff]  }
  0x8e   : > { %v4575_v54 = vcombine.low %v904_v39, %v4569_v20  ;;  %v828_v16 = vor.u32 %v827_v15, %v824_v63  ;;  %v616_v3 = vshrl.u32 %v565_v53, 16  ;;  %v619_v13 = vshll.u32 %v565_v53, 16  ;;  %v3653_v27 = vld [vmem:[%s5075_s6 + $0x40] ss:$8 sps:$4 sm:$0xff]   ;;  %v660_v53 = vld [vmem:[#allocation2 + $0x10] sm:$0xf] }
  0x8f   : > { %v815_v42 = vrot.slane %v814_v50, 4  ;;  %v3108_v59 = vcombine.low %v5116_v12, %v876_v32  ;;  %v944_v22 = vshrl.u32 %v3101_v37, 16  ;;  %v947_v58 = vshll.u32 %v3101_v37, 16  ;;  %v3649_v32 = vld [vmem:[%s5075_s6 + $0x34] ss:$8 sps:$4 sm:$0xff]  }
  0x90   : > { %v829_v48 = vrot.slane %v828_v16, 4  ;;  %v618_v26 = vrot.slane %v616_v3, 7  ;;  %v3102_v30 = vcombine.high %v763_v57, %v763_v57  ;;  %v3109_v28 = vcombine.low %v4558_v36, %v904_v39  ;;  %v4627_v63 = vld [vmem:[#allocation2 + $0x8] sm:$0xf]  ;;  %v4638_v16 = vld [vmem:[#allocation2 + $0x18] sm:$0xf] }
  0x91   : > { %v820_v2 = vsel %vm4245_vm13, %v815_v42, %v819_v1  ;;  %v946_v33 = vrot.slane %v944_v22, 4  ;;  %v949_v41 = vrot.slane %v947_v58, 5  ;;  %v3667_v1 = vld [vmem:[%s5075_s6 + $0x64] ss:$8 sps:$4 sm:$0xff]   ;;  %v3078_v10 = vcombine.low %v4627_v63, %v660_v53  ;;  %v3671_v57 = vld [vmem:[%s5075_s6 + $0x70] ss:$8 sps:$4 sm:$0xff]  }
  0x92   : > { %1400 = vmatmul.mubr.bf16.gmra.mrb[8].mxu0 %v4575_v54  ;;  %v834_v18 = vsel %vm4245_vm13, %v829_v48, %v833_v23  ;;  %v621_v52 = vor.u32 %v619_v13, %v618_v26  ;;  %v953_v6 = vshll.u32 %v3102_v30, 16  ;;  %v4645_v23 = vcombine.low %v660_v53, %v4638_v16  ;;  %v3637_v42 = vld [vmem:[%s5075_s6 + $0x300] ss:$8 sps:$4 sm:$0xff]   ;;  %v3679_v3 = vld [vmem:[%s5075_s6 + $0x84] ss:$8 sps:$4 sm:$0xff]  }
  0x93   : > { %v3103_v40 = vcombine.low %v820_v2, %v834_v18  ;;  %v3107_v60 = vcombine.low %v834_v18, %v5115_v51  ;;  %1409 = vmatprep.mubr.bf16.mxu0 %v5110_v29  ;;  %v950_v25 = vor.u32 %v949_v41, %v946_v33  ;;  %v3644_v13 = vld [vmem:[%s5075_s6 + $0x310] ss:$8 sps:$4 sm:$0xff]   ;;  %v3677_v48 = vld [vmem:[%s5075_s6 + $0x80] ss:$8 sps:$4 sm:$0xff]   ;;  %v3685_v2 = vld [vmem:[%s5075_s6 + $0x94] ss:$8 sps:$4 sm:$0xff]  }
  0x94   : > { %v656_v14 = vsel %vm4091_vm10, %v621_v52, %v655_v44  ;;  %v955_v35 = vrot.slane %v953_v6, 5  ;;  %v4669_v26 = vld [vmem:[#allocation2 + $0x20] sm:$0xf]  ;;  %v4671_v18 = vld [vmem:[#allocation2 + $0x28] sm:$0xf] }
  0x95   : > { %1306 = vmatprep.mubr.bf16.mxu1 %v3107_v60  ;;  %657 = vst [vmem:[#allocation2 + $0x40] sm:$0x1f] %v656_v14  ;;  %v951_v34 = vrot.slane %v950_v25, 4  ;;  %v3652_v44 = vld [vmem:[%s5075_s6 + $0x324] ss:$8 sps:$4 sm:$0xff]  }
  0x96   : > { %1307 = vmatmul.mubr.bf16.vlgmr.msra.gmra.mrb[0].mxu1 %v3103_v40  ;;  %v3683_v37 = vld [vmem:[%s5075_s6 + $0x90] ss:$8 sps:$4 sm:$0xff]   ;;  %v4682_v40 = vcombine.low %v4669_v26, %v4671_v18  ;;  %v3650_v51 = vld [vmem:[%s5075_s6 + $0x320] ss:$8 sps:$4 sm:$0xff]   ;;  %v3691_v60 = vld [vmem:[%s5075_s6 + $0xa4] ss:$8 sps:$4 sm:$0xff]  }
  0x97   : > { %1661 = vmatpush1.bf16.msra.mxu1 %v3628_v11  ;;  %1316 = vmatprep.mubr.bf16.mxu1 %v3108_v59  ;;  %v956_v55 = vsel %vm4245_vm13, %v951_v34, %v955_v35  ;;  %v3658_v52 = vld [vmem:[%s5075_s6 + $0x334] ss:$8 sps:$4 sm:$0xff]   ;;  %v3656_v11 = vld [vmem:[%s5075_s6 + $0x330] ss:$8 sps:$4 sm:$0xff]   ;;  %v3689_v12 = vld [vmem:[%s5075_s6 + $0xa0] ss:$8 sps:$4 sm:$0xff]  }
  0x98   : > { %1662 = vmatprep.subr.bf16.mxu1 %v3636_v61  ;;  %v1807_v59 = vld [vmem:[#allocation2 + $0x8] sm:$0x1e]  ;;  %v1808_v61 = vld [vmem:[#allocation2 + $0x10] sm:$0x1e]  ;;  %v4705_v58 = vld [vmem:[#allocation2 + $0x38] sm:$0xf] }
  0x99   : > { %v3697_v14 = vld [vmem:[%s5075_s6 + $0xb4] ss:$8 sps:$4 sm:$0xff]   ;;  %v4703_v22 = vld [vmem:[#allocation2 + $0x30] sm:$0xf]  ;;  %v3259_v30 = vcombine.high %v1807_v59, %v1807_v59  ;;  %v3260_v33 = vcombine.low %v1808_v61, %v1808_v61  ;;  %v3261_v41 = vcombine.high %v1808_v61, %v1808_v61  ;;  %v658_v53 = vld [vmem:[#allocation2] sm:$0xf] }
  0x9a   : > { %v1809_v61 = vld [vmem:[#allocation2 + $0x18] sm:$0x1e] }
  0x9b   : > { %1663 = vmatpush1.bf16.msra.mxu1 %v3634_v7  ;;  %v3664_v7 = vld [vmem:[%s5075_s6 + $0x344] ss:$8 sps:$4 sm:$0xff]   ;;  %v1865_v25 = vrot.slane %v3259_v30, 5  ;;  %v3274_v6 = vrot.slane %v3260_v33, 9  ;;  %v3718_v33 = vld [vmem:[%s5075_s6 + $0x3d0] ss:$8 sps:$4 sm:$0xff]  }
  0x9c   : > { %1664 = vmatprep.subr.bf16.mxu1 %v3642_v19  ;;  %v762_v47 = vld [vmem:[#allocation2 + $0x40] sm:$0x1f]  ;;  %v3258_v19 = vcombine.low %v1807_v59, %v1807_v59  ;;  %v3720_v59 = vld [vmem:[%s5075_s6 + $0x3d4] ss:$8 sps:$4 sm:$0xff]  }
  0x9d   : > { %v3099_v0 = vcombine.low %v762_v47, %v762_v47  ;;  %v3100_v17 = vcombine.high %v762_v47, %v762_v47  ;;  %v3704_v47 = vld [vmem:[%s5075_s6 + $0xc4] ss:$8 sps:$4 sm:$0xff]  }
  0x9e   : > { %1317 = vmatmul.mubr.bf16.gmra.mrb[4].mxu1 %v5117_v21  ;;  %v1869_v21 = vrot.slane %v3261_v41, 5  ;;  %v3262_v41 = vcombine.low %v1809_v61, %v1809_v61 }
  0x9f   : > { %1665 = vmatpush1.bf16.msra.mxu1 %v3640_v56  ;;  %1326 = vmatprep.mubr.bf16.mxu1 %v3109_v28  ;;  %v925_v8 = vshrl.u32 %v3099_v0, 16  ;;  %v928_v36 = vshll.u32 %v3099_v0, 16  ;;  %v934_v38 = vshll.u32 %v3100_v17, 16  ;;  %v3695_v56 = vld [vmem:[%s5075_s6 + $0xb0] ss:$8 sps:$4 sm:$0xff]   ;;  %v4716_v28 = vcombine.low %v4703_v22, %v4705_v58 }
  0xa0   : > { %1666 = vmatprep.subr.bf16.mxu1 %v3649_v32  ;;  %v3662_v32 = vld [vmem:[%s5075_s6 + $0x340] ss:$8 sps:$4 sm:$0xff]   ;;  %v3670_v0 = vld [vmem:[%s5075_s6 + $0x354] ss:$8 sps:$4 sm:$0xff]   ;;  %v3273_v17 = vrot.slane %v3258_v19, 9  ;;  %v4753_v35 = vsel %vm4734_vm1, %v3274_v6, %v1869_v21 }
  0xa1   : > { %v927_v9 = vrot.slane %v925_v8, 4  ;;  %v930_v31 = vrot.slane %v928_v36, 5  ;;  %v936_v49 = vrot.slane %v934_v38, 5  ;;  %v3702_v8 = vld [vmem:[%s5075_s6 + $0xc0] ss:$8 sps:$4 sm:$0xff]  }
  0xa2   : > { %v3710_v38 = vld [vmem:[%s5075_s6 + $0xd4] ss:$8 sps:$4 sm:$0xff]   ;;  %v4749_v34 = vsel %vm4734_vm1, %v3273_v17, %v1865_v25  ;;  %v4877_v19 = vld [vmem:[%s5075_s6 + $0x440] ss:$8 sps:$4 sm:$0xff]  }
  0xa3   : > { %1667 = vmatpush1.bf16.msra.mxu1 %v3647_v43  ;;  %v931_v46 = vor.u32 %v930_v31, %v927_v9  ;;  %v3668_v43 = vld [vmem:[%s5075_s6 + $0x350] ss:$8 sps:$4 sm:$0xff]   ;;  %v667_v9 = vld [vmem:[#allocation2 + $0x48] sm:$0xf]  ;;  %v3676_v31 = vld [vmem:[%s5075_s6 + $0x364] ss:$8 sps:$4 sm:$0xff]  }
  0xa4   : > { %1668 = vmatprep.subr.bf16.mxu1 %v3655_v45  ;;  %v4741_v45 = vld [vmem:[#allocation2 + $0x40] sm:$0xf]  ;;  %v1812_v25 = vld [vmem:[#allocation2 + $0x30] sm:$0x1e] }
  0xa5   : > { %v932_v5 = vrot.slane %v931_v46, 4  ;;  %v3082_v46 = vcombine.low %v4741_v45, %v667_v9  ;;  %v3081_v30 = vcombine.low %v4705_v58, %v4741_v45  ;;  %v3729_v58 = vld [vmem:[%s5075_s6 + $0x3e4] ss:$8 sps:$4 sm:$0xff]   ;;  %v3727_v45 = vld [vmem:[%s5075_s6 + $0x3e0] ss:$8 sps:$4 sm:$0xff]   ;;  %v3275_v9 = vrot.slane %v3262_v41, 9 }
  0xa6   : > { %1327 = vmatmul.mubr.bf16.gmra.mrb[8].mxu1 %v4561_v4  ;;  %v3665_v4 = vld [vmem:[%s5075_s6 + $0x60] ss:$8 sps:$4 sm:$0xff]  }
  0xa7   : > { %1669 = vmatpush1.bf16.msra.mxu1 %v3653_v27  ;;  %v937_v39 = vsel %vm4245_vm13, %v932_v5, %v936_v49  ;;  %v3708_v27 = vld [vmem:[%s5075_s6 + $0xd0] ss:$8 sps:$4 sm:$0xff]   ;;  %v3674_v49 = vld [vmem:[%s5075_s6 + $0x360] ss:$8 sps:$4 sm:$0xff]   ;;  %v3682_v5 = vld [vmem:[%s5075_s6 + $0x374] ss:$8 sps:$4 sm:$0xff]  }
  0xa8   : > { %1670 = vmatprep.subr.bf16.mxu1 %v3661_v24  ;;  %v3111_v15 = vcombine.low %v937_v39, %v956_v55  ;;  %v3110_v50 = vcombine.low %v4569_v20, %v937_v39  ;;  %v3673_v20 = vld [vmem:[%s5075_s6 + $0x74] ss:$8 sps:$4 sm:$0xff]   ;;  %v3717_v24 = vld [vmem:[%s5075_s6 + $0xe4] ss:$8 sps:$4 sm:$0xff]   ;;  %v3290_v55 = vcombine.low %v4749_v34, %v4753_v35  ;;  %v3680_v39 = vld [vmem:[%s5075_s6 + $0x370] ss:$8 sps:$4 sm:$0xff]  }
  0xaa   : > { %1410 = vmatmul.mubr.bf16.gmra.mrb[12].mxu0 %v3111_v15  ;;  %1336 = vmatprep.mubr.bf16.mxu1 %v3110_v50  ;;  %v3723_v15 = vld [vmem:[%s5075_s6 + $0xf4] ss:$8 sps:$4 sm:$0xff]   ;;  %v3688_v50 = vld [vmem:[%s5075_s6 + $0x384] ss:$8 sps:$4 sm:$0xff]  }
  0xab   : > { %1671 = vmatpush1.bf16.msra.mxu1 %v3659_v62  ;;  %1765 = vmatprep.mubr.bf16.mxu0 %v5110_v29  ;;  %v3715_v62 = vld [vmem:[%s5075_s6 + $0xe0] ss:$8 sps:$4 sm:$0xff]  }
  0xac   : > { %1672 = vmatprep.subr.bf16.mxu1 %v3667_v1  ;;  %v3721_v1 = vld [vmem:[%s5075_s6 + $0xf0] ss:$8 sps:$4 sm:$0xff]  }
  0xae   : > { %1337 = vmatmul.mubr.bf16.gmra.mrb[12].mxu1 %v4575_v54  ;;  %v3646_v54 = vld [vmem:[%s5075_s6 + $0x314] ss:$8 sps:$4 sm:$0xff]  }
  0xaf   : > { %1673 = vmatpush1.bf16.msra.mxu1 %v3665_v4  ;;  %1692 = vmatprep.mubr.bf16.mxu1 %v3078_v10  ;;  %v3686_v4 = vld [vmem:[%s5075_s6 + $0x380] ss:$8 sps:$4 sm:$0xff]   ;;  %v4791_v10 = vld [vmem:[%s5075_s6 + $0x404] ss:$8 sps:$4 sm:$0xff]  }
  0xb0   : > { %1674 = vmatprep.subr.bf16.mxu1 %v3673_v20  ;;  %v3694_v20 = vld [vmem:[%s5075_s6 + $0x394] ss:$8 sps:$4 sm:$0xff]  }
  0xb2   : > { %1766 = vmatmul.mubr.bf16.vlgmr.msra.gmra.mrb[16].mxu0 %v4645_v23 }
  0xb3   : > { %1675 = vmatpush1.bf16.msra.mxu1 %v3671_v57  ;;  %2227 = vmatpush1.bf16.msra.mxu0 %v3637_v42  ;;  %v3074_v57 = vcombine.low %v658_v53, %v4627_v63  ;;  %v4800_v42 = vld [vmem:[%s5075_s6 + $0x400] ss:$8 sps:$4 sm:$0xff]   ;;  %v4811_v63 = vld [vmem:[%s5075_s6 + $0x414] ss:$8 sps:$4 sm:$0xff]  }
  0xb4   : > { %1676 = vmatprep.subr.bf16.mxu1 %v3679_v3  ;;  %2228 = vmatprep.subr.bf16.mxu0 %v3646_v54  ;;  %v3079_v3 = vcombine.low %v4638_v16, %v4669_v26  ;;  %v3692_v54 = vld [vmem:[%s5075_s6 + $0x390] ss:$8 sps:$4 sm:$0xff]   ;;  %v3707_v26 = vld [vmem:[%s5075_s6 + $0x3b4] ss:$8 sps:$4 sm:$0xff]  }
  0xb5   : > { %1775 = vmatprep.mubr.bf16.mxu0 %v5110_v29  ;;  %v4820_v16 = vld [vmem:[%s5075_s6 + $0x410] ss:$8 sps:$4 sm:$0xff]  }
  0xb7   : > { %1677 = vmatpush1.bf16.msra.mxu1 %v3677_v48  ;;  %2229 = vmatpush1.bf16.msra.mxu0 %v3644_v13  ;;  %v3701_v13 = vld [vmem:[%s5075_s6 + $0x3a4] ss:$8 sps:$4 sm:$0xff]   ;;  %v3699_v48 = vld [vmem:[%s5075_s6 + $0x3a0] ss:$8 sps:$4 sm:$0xff]  }
  0xb8   : > { %1678 = vmatprep.subr.bf16.mxu1 %v3685_v2  ;;  %2230 = vmatprep.subr.bf16.mxu0 %v3652_v44  ;;  %v4829_v2 = vld [vmem:[%s5075_s6 + $0x424] ss:$8 sps:$4 sm:$0xff]   ;;  %v4838_v44 = vld [vmem:[%s5075_s6 + $0x420] ss:$8 sps:$4 sm:$0xff]  }
  0xba   : > { %1776 = vmatmul.mubr.bf16.gmra.mrb[20].mxu0 %v4682_v40 }
  0xbb   : > { %1679 = vmatpush1.bf16.msra.mxu1 %v3683_v37  ;;  %2231 = vmatpush1.bf16.msra.mxu0 %v3650_v51  ;;  %v3080_v37 = vcombine.low %v4671_v18, %v4703_v22  ;;  %v3705_v51 = vld [vmem:[%s5075_s6 + $0x3b0] ss:$8 sps:$4 sm:$0xff]  }
  0xbc   : > { %1680 = vmatprep.subr.bf16.mxu1 %v3691_v60  ;;  %2232 = vmatprep.subr.bf16.mxu0 %v3658_v52  ;;  %v4849_v60 = vld [vmem:[%s5075_s6 + $0x434] ss:$8 sps:$4 sm:$0xff]   ;;  %v3714_v52 = vld [vmem:[%s5075_s6 + $0x3c4] ss:$8 sps:$4 sm:$0xff]   ;;  %v4859_v18 = vld [vmem:[%s5075_s6 + $0x430] ss:$8 sps:$4 sm:$0xff]  }
  0xbd   : > { %1785 = vmatprep.mubr.bf16.mxu0 %v5110_v29 }
  0xbf   : > { %1681 = vmatpush1.bf16.msra.mxu1 %v3689_v12  ;;  %2233 = vmatpush1.bf16.msra.mxu0 %v3656_v11  ;;  %v3712_v11 = vld [vmem:[%s5075_s6 + $0x3c0] ss:$8 sps:$4 sm:$0xff]  }
  0xc0   : > { %1682 = vmatprep.subr.bf16.mxu1 %v3697_v14  ;;  %2234 = vmatprep.subr.bf16.mxu0 %v3664_v7  ;;  %v1806_v12 = vld [vmem:[#allocation2] sm:$0x1e] }
  0xc1   : > { %v1810_v14 = vld [vmem:[#allocation2 + $0x20] sm:$0x1e]  ;;  %v3256_v22 = vcombine.low %v1806_v12, %v1806_v12  ;;  %v3257_v7 = vcombine.high %v1806_v12, %v1806_v12 }
  0xc2   : > { %1786 = vmatmul.mubr.bf16.gmra.mrb[24].mxu0 %v4716_v28  ;;  %v3265_v17 = vcombine.high %v1810_v14, %v1810_v14 }
  0xc3   : > { %1683 = vmatpush1.bf16.msra.mxu1 %v3695_v56  ;;  %2235 = vmatpush1.bf16.msra.mxu0 %v3662_v32  ;;  %v3263_v56 = vcombine.high %v1809_v61, %v1809_v61  ;;  %v4888_v32 = vld [vmem:[%s5075_s6 + $0x454] ss:$8 sps:$4 sm:$0xff]   ;;  %v3272_v6 = vrot.slane %v3256_v22, 9  ;;  %v1861_v21 = vrot.slane %v3257_v7, 5 }
  0xc4   : > { %1684 = vmatprep.subr.bf16.mxu1 %v3704_v47  ;;  %2236 = vmatprep.subr.bf16.mxu0 %v3670_v0  ;;  %v1813_v47 = vld [vmem:[#allocation2 + $0x38] sm:$0x1e]  ;;  %v3264_v0 = vcombine.low %v1810_v14, %v1810_v14 }
  0xc5   : > { %1795 = vmatprep.mubr.bf16.mxu0 %v5110_v29 }
  0xc7   : > { %1685 = vmatpush1.bf16.msra.mxu1 %v3702_v8  ;;  %2237 = vmatpush1.bf16.msra.mxu0 %v3668_v43  ;;  %v4898_v43 = vld [vmem:[%s5075_s6 + $0x450] ss:$8 sps:$4 sm:$0xff]   ;;  %v3270_v8 = vcombine.low %v1813_v47, %v1813_v47 }
  0xc8   : > { %1686 = vmatprep.subr.bf16.mxu1 %v3710_v38  ;;  %2238 = vmatprep.subr.bf16.mxu0 %v3676_v31  ;;  %v3271_v38 = vcombine.high %v1813_v47, %v1813_v47  ;;  %v4907_v31 = vld [vmem:[%s5075_s6 + $0x464] ss:$8 sps:$4 sm:$0xff]  }
  0xca   : > { %1796 = vmatmul.mubr.bf16.gmra.mrb[28].mxu0 %v3082_v46  ;;  %v3276_v46 = vrot.slane %v3264_v0, 9 }
  0xcb   : > { %1687 = vmatpush1.bf16.msra.mxu1 %v3708_v27  ;;  %2239 = vmatpush1.bf16.msra.mxu0 %v3674_v49  ;;  %v3735_v27 = vld [vmem:[%s5075_s6 + $0x3f4] ss:$8 sps:$4 sm:$0xff]   ;;  %v1877_v49 = vrot.slane %v3265_v17, 5 }
  0xcc   : > { %1688 = vmatprep.subr.bf16.mxu1 %v3717_v24  ;;  %2240 = vmatprep.subr.bf16.mxu0 %v3682_v5  ;;  %v1811_v24 = vld [vmem:[#allocation2 + $0x28] sm:$0x1e]  ;;  %v3268_v5 = vcombine.low %v1812_v25, %v1812_v25 }
  0xcd   : > { %2258 = vmatprep.mubr.bf16.mxu0 %v3290_v55  ;;  %v3269_v55 = vcombine.high %v1812_v25, %v1812_v25  ;;  %v3266_v53 = vcombine.low %v1811_v24, %v1811_v24 }
  0xcf   : > { %1689 = vmatpush1.bf16.msra.mxu1 %v3715_v62  ;;  %2241 = vmatpush1.bf16.msra.mxu0 %v3680_v39  ;;  %v1862_v62 = vsel %vm4734_vm1, %v3272_v6, %v1861_v21  ;;  %v4918_v39 = vld [vmem:[%s5075_s6 + $0x460] ss:$8 sps:$4 sm:$0xff]   ;;  %v3277_v61 = vrot.slane %v3266_v53, 9 }
  0xd0   : > { %1690 = vmatprep.subr.bf16.mxu1 %v3723_v15  ;;  %2242 = vmatprep.subr.bf16.mxu0 %v3688_v50  ;;  %v3279_v15 = vrot.slane %v3270_v8, 9  ;;  %v1889_v50 = vrot.slane %v3271_v38, 5 }
  0xd3   : > { %1691 = vmatpush1.bf16.msra.mxu1 %v3721_v1  ;;  %2243 = vmatpush1.bf16.msra.mxu0 %v3686_v4  ;;  %v3733_v1 = vld [vmem:[%s5075_s6 + $0x3f0] ss:$8 sps:$4 sm:$0xff]   ;;  %v3267_v4 = vcombine.high %v1811_v24, %v1811_v24 }
  0xd4   : > { %3410 = vmatprep.subr.bf16.mxu1 %v4791_v10  ;;  %2244 = vmatprep.subr.bf16.mxu0 %v3694_v20  ;;  %v3773_v20 = vld [vmem:[%s5075_s6 + $0x474] ss:$8 sps:$4 sm:$0xff]  }
  0xd6   : > { %1693 = vmatmul.mubr.bf16.vlgmr.msra.gmra.mrb[16].mxu1 %v3074_v57  ;;  %v1815_v57 = vld [vmem:[#allocation2 + $0x48] sm:$0x1e] }
  0xd7   : > { %3418 = vmatpush1.bf16.msra.mxu1 %v4800_v42  ;;  %1702 = vmatprep.mubr.bf16.mxu1 %v3079_v3  ;;  %v3284_v12 = vcombine.high %v1815_v57, %v1815_v57 }
  0xd8   : > { %2245 = vmatpush1.bf16.msra.mxu0 %v3692_v54  ;;  %3411 = vmatprep.subr.bf16.mxu1 %v4811_v63  ;;  %v1878_v54 = vsel %vm4734_vm1, %v3276_v46, %v1877_v49 }
  0xd9   : > { %2246 = vmatprep.subr.bf16.mxu0 %v3701_v13  ;;  %v3278_v13 = vrot.slane %v3268_v5, 9 }
  0xdb   : > { %3419 = vmatpush1.bf16.msra.mxu1 %v4820_v16 }
  0xdc   : > { %2247 = vmatpush1.bf16.msra.mxu0 %v3699_v48  ;;  %3412 = vmatprep.subr.bf16.mxu1 %v4829_v2  ;;  %v1885_v48 = vrot.slane %v3269_v55, 5 }
  0xdd   : > { %2248 = vmatprep.subr.bf16.mxu0 %v3707_v26  ;;  %v3286_v26 = vcombine.low %v1862_v62, %v4749_v34 }
  0xde   : > { %1703 = vmatmul.mubr.bf16.gmra.mrb[20].mxu1 %v4645_v23  ;;  %v4868_v23 = vld [vmem:[%s5075_s6 + $0x444] ss:$8 sps:$4 sm:$0xff]   ;;  %v1886_v34 = vsel %vm4734_vm1, %v3278_v13, %v1885_v48 }
  0xdf   : > { %3420 = vmatpush1.bf16.msra.mxu1 %v4838_v44  ;;  %1712 = vmatprep.mubr.bf16.mxu1 %v3080_v37  ;;  %v1814_v37 = vld [vmem:[#allocation2 + $0x40] sm:$0x1e] }
  0xe0   : > { %2249 = vmatpush1.bf16.msra.mxu0 %v3705_v51  ;;  %3413 = vmatprep.subr.bf16.mxu1 %v4849_v60  ;;  %v3771_v51 = vld [vmem:[%s5075_s6 + $0x470] ss:$8 sps:$4 sm:$0xff]   ;;  %v3280_v14 = vcombine.low %v1814_v37, %v1814_v37  ;;  %v3281_v22 = vcombine.high %v1814_v37, %v1814_v37 }
  0xe1   : > { %2250 = vmatprep.subr.bf16.mxu0 %v3714_v52  ;;  %v1890_v52 = vsel %vm4734_vm1, %v3279_v15, %v1889_v50 }
  0xe2   : > { %v3289_v7 = vcombine.low %v1886_v34, %v1890_v52 }
  0xe3   : > { %3421 = vmatpush1.bf16.msra.mxu1 %v4859_v18 }
  0xe4   : > { %2251 = vmatpush1.bf16.msra.mxu0 %v3712_v11  ;;  %3414 = vmatprep.subr.bf16.mxu1 %v4868_v23  ;;  %v3283_v11 = vcombine.low %v1815_v57, %v1815_v57 }
  0xe5   : > { %2252 = vmatprep.subr.bf16.mxu0 %v3720_v59 }
  0xe6   : > { %1713 = vmatmul.mubr.bf16.gmra.mrb[24].mxu1 %v4682_v40  ;;  %v1873_v40 = vrot.slane %v3263_v56, 5  ;;  %v1898_v56 = vrot.slane %v3281_v22, 5 }
  0xe7   : > { %3422 = vmatpush1.bf16.msra.mxu1 %v4877_v19  ;;  %1722 = vmatprep.mubr.bf16.mxu1 %v3081_v30  ;;  %v3285_v30 = vrot.slane %v3283_v11, 9 }
  0xe8   : > { %2253 = vmatpush1.bf16.msra.mxu0 %v3718_v33  ;;  %3415 = vmatprep.subr.bf16.mxu1 %v4888_v32  ;;  %v1874_v3 = vsel %vm4734_vm1, %v3275_v9, %v1873_v40  ;;  %v1907_v33 = vrot.slane %v3284_v12, 5 }
  0xe9   : > { %2254 = vmatprep.subr.bf16.mxu0 %v3729_v58  ;;  %v3291_v59 = vcombine.low %v1874_v3, %v1878_v54  ;;  %v3287_v47 = vcombine.low %v4753_v35, %v1874_v3 }
  0xea   : > { %v1908_v58 = vsel %vm4734_vm1, %v3285_v30, %v1907_v33 }
  0xeb   : > { %3423 = vmatpush1.bf16.msra.mxu1 %v4898_v43 }
  0xec   : > { %2255 = vmatpush1.bf16.msra.mxu0 %v3727_v45  ;;  %3416 = vmatprep.subr.bf16.mxu1 %v4907_v31 }
  0xed   : > { %2256 = vmatprep.subr.bf16.mxu0 %v3735_v27 }
  0xee   : > { %1723 = vmatmul.mubr.bf16.gmra.mrb[28].mxu1 %v4716_v28  ;;  %v1881_v28 = vrot.slane %v3267_v4, 5 }
  0xef   : > { %3424 = vmatpush1.bf16.msra.mxu1 %v4918_v39  ;;  %2351 = vmatprep.mubr.bf16.mxu1 %v5110_v29 }
  0xf0   : > { %2257 = vmatpush1.bf16.msra.mxu0 %v3733_v1  ;;  %3417 = vmatprep.subr.bf16.mxu1 %v3773_v20  ;;  %v1882_v41 = vsel %vm4734_vm1, %v3277_v61, %v1881_v28 }
  0xf1   : > { %2299 = vmatprep.subr.bf16.mxu0 %v4791_v10  ;;  %v3282_v10 = vrot.slane %v3280_v14, 9  ;;  %v3292_v0 = vcombine.low %v1882_v41, %v1886_v34  ;;  %v3288_v35 = vcombine.low %v1878_v54, %v1882_v41 }
  0xf3   : > { %2259 = vmatmul.mubr.bf16.vlgmr.msra.gmra.mrb[16].mxu0 %v3286_v26  ;;  %3425 = vmatpush1.bf16.msra.mxu1 %v3771_v51 }
  0xf4   : > { %2300 = vmatpush1.bf16.msra.mxu0 %v4800_v42  ;;  %2268 = vmatprep.mubr.bf16.mxu0 %v3291_v59  ;;  %v1899_v42 = vsel %vm4734_vm1, %v3282_v10, %v1898_v56 }
  0xf5   : > { %2301 = vmatprep.subr.bf16.mxu0 %v4811_v63  ;;  %v3294_v63 = vcombine.low %v1899_v42, %v1908_v58  ;;  %v3293_v17 = vcombine.low %v1890_v52, %v1899_v42 }
  0xf6   : > { %2352 = vmatmul.mubr.bf16.vlgmr.msra.gmra.mrb[32].mxu1 %v3289_v7 }
  0xf7   : > { %2361 = vmatprep.mubr.bf16.mxu1 %v5110_v29 }
  0xf8   : > { %2302 = vmatpush1.bf16.msra.mxu0 %v4820_v16 }
  0xf9   : > { %2303 = vmatprep.subr.bf16.mxu0 %v4829_v2 }
  0xfb   : > { %2269 = vmatmul.mubr.bf16.gmra.mrb[20].mxu0 %v3287_v47 }
  0xfc   : > { %2304 = vmatpush1.bf16.msra.mxu0 %v4838_v44  ;;  %2278 = vmatprep.mubr.bf16.mxu0 %v3292_v0 }
  0xfd   : > { %2305 = vmatprep.subr.bf16.mxu0 %v4849_v60 }
  0xfe   : > { %2362 = vmatmul.mubr.bf16.gmra.mrb[36].mxu1 %v3294_v63 }
 0x100   : > { %2306 = vmatpush1.bf16.msra.mxu0 %v4859_v18 }
 0x101   : > { %2307 = vmatprep.subr.bf16.mxu0 %v4868_v23 }
 0x103   : > { %2279 = vmatmul.mubr.bf16.gmra.mrb[24].mxu0 %v3288_v35 }
 0x104   : > { %2308 = vmatpush1.bf16.msra.mxu0 %v4877_v19  ;;  %2288 = vmatprep.mubr.bf16.mxu0 %v3293_v17 }
 0x105   : > { %2309 = vmatprep.subr.bf16.mxu0 %v4888_v32 }
 0x108   : > { %2310 = vmatpush1.bf16.msra.mxu0 %v4898_v43 }
 0x109   : > { %2311 = vmatprep.subr.bf16.mxu0 %v4907_v31 }
 0x10b   : > { %2289 = vmatmul.mubr.bf16.gmra.mrb[28].mxu0 %v3289_v7 }
 0x10c   : > { %2312 = vmatpush1.bf16.msra.mxu0 %v4918_v39  ;;  %2331 = vmatprep.mubr.bf16.mxu0 %v5110_v29 }
 0x10d   : > { %2313 = vmatprep.subr.bf16.mxu0 %v3773_v20 }
 0x110   : > { %2314 = vmatpush1.bf16.msra.mxu0 %v3771_v51 }
 0x113   : > { %2332 = vmatmul.mubr.bf16.vlgmr.msra.gmra.mrb[16].mxu0 %v3287_v47 }
 0x114   : > { %2341 = vmatprep.mubr.bf16.mxu0 %v5110_v29 }
 0x11b   : > { %2342 = vmatmul.mubr.bf16.gmra.mrb[20].mxu0 %v3288_v35 }
 0x11e   : > { %v1381_v36 = vpop.f32.mrb[0].mxu0 }
 0x11f   : > { %v1383_v16 = vpop.f32.mrb[1].mxu0 }
 0x120   : > { %v1385_v2 = vpop.f32.mrb[2].mxu0 }
 0x121   : > { %v1387_v44 = vpop.f32.mrb[3].mxu0 }
 0x15d   : > { %v1391_v60 = vpop.f32.mrb[4].mxu0 }
 0x15e   : > { %v1393_v18 = vpop.f32.mrb[5].mxu0 }
 0x15f   : > { %v1395_v23 = vpop.f32.mrb[6].mxu0 }
 0x160   : > { %v1397_v19 = vpop.f32.mrb[7].mxu0 }
 0x165   : > { %v1401_v32 = vpop.f32.mrb[8].mxu0 }
 0x166   : > { %v1403_v25 = vpop.f32.mrb[9].mxu0 }
 0x167   : > { %v1405_v6 = vpop.f32.mrb[10].mxu0 }
 0x168   : > { %v1407_v21 = vpop.f32.mrb[11].mxu0 }
 0x169   : > { %v1308_v43 = vpop.f32.mrb[0].mxu1 }
 0x16a   : > { %v1382_v8 = vadd.f32 %v1381_v36, %v1308_v43  ;;  %v1310_v38 = vpop.f32.mrb[1].mxu1 }
 0x16b   : > { %v1384_v45 = vadd.f32 %v1383_v16, %v1310_v38  ;;  %v1312_v9 = vpop.f32.mrb[2].mxu1 }
 0x16c   : > { %v1386_v40 = vadd.f32 %v1385_v2, %v1312_v9  ;;  %v1314_v29 = vpop.f32.mrb[3].mxu1 }
 0x16d   : > { %v1388_v31 = vadd.f32 %v1387_v44, %v1314_v29 }
 0x171   : > { %v1318_v27 = vpop.f32.mrb[4].mxu1 }
 0x172   : > { %v1392_v46 = vadd.f32 %v1391_v60, %v1318_v27  ;;  %v1320_v49 = vpop.f32.mrb[5].mxu1 }
 0x173   : > { %v1394_v24 = vadd.f32 %v1393_v18, %v1320_v49  ;;  %v1322_v5 = vpop.f32.mrb[6].mxu1 }
 0x174   : > { %v1396_v55 = vadd.f32 %v1395_v23, %v1322_v5  ;;  %v1324_v62 = vpop.f32.mrb[7].mxu1 }
 0x175   : > { %v1398_v39 = vadd.f32 %v1397_v19, %v1324_v62 }
 0x179   : > { %v1328_v15 = vpop.f32.mrb[8].mxu1 }
 0x17a   : > { %v1402_v50 = vadd.f32 %v1401_v32, %v1328_v15  ;;  %v1330_v1 = vpop.f32.mrb[9].mxu1 }
 0x17b   : > { %v1404_v53 = vadd.f32 %v1403_v25, %v1330_v1  ;;  %v1332_v4 = vpop.f32.mrb[10].mxu1 }
 0x17c   : > { %v1406_v20 = vadd.f32 %v1405_v6, %v1332_v4  ;;  %v1334_v57 = vpop.f32.mrb[11].mxu1 }
 0x17d   : > { %v1408_v3 = vadd.f32 %v1407_v21, %v1334_v57  ;;  %v1411_v54 = vpop.f32.mrb[12].mxu0 }
 0x17e   : > { %v1413_v13 = vpop.f32.mrb[13].mxu0 }
 0x17f   : > { %v1415_v48 = vpop.f32.mrb[14].mxu0 }
 0x180   : > { %v1417_v26 = vpop.f32.mrb[15].mxu0 }
 0x181   : > { %v1338_v37 = vpop.f32.mrb[12].mxu1 }
 0x182   : > { %v1412_v51 = vadd.f32 %v1411_v54, %v1338_v37  ;;  %v1340_v52 = vpop.f32.mrb[13].mxu1 }
 0x183   : > { %v1414_v11 = vadd.f32 %v1413_v13, %v1340_v52  ;;  %v1342_v12 = vpop.f32.mrb[14].mxu1 }
 0x184   : > { %v1416_v59 = vadd.f32 %v1415_v48, %v1342_v12  ;;  %v1344_v61 = vpop.f32.mrb[15].mxu1 }
 0x185   : > { %v1418_v28 = vadd.f32 %v1417_v26, %v1344_v61 }
 0x1a9   : > { %v1694_v34 = vpop.f32.mrb[16].mxu1 }
 0x1aa   : > { %v4966_v14 = vadd.f32 %v1694_v34, %v1382_v8  ;;  %v1696_v22 = vpop.f32.mrb[17].mxu1 }
 0x1ab   : > { %v4968_v7 = vadd.f32 %v1696_v22, %v1384_v45  ;;  %v1698_v30 = vpop.f32.mrb[18].mxu1 }
 0x1ac   : > { %v4970_v33 = vadd.f32 %v1698_v30, %v1386_v40  ;;  %v1700_v41 = vpop.f32.mrb[19].mxu1 }
 0x1ad   : > { %v4972_v10 = vadd.f32 %v1700_v41, %v1388_v31 }
 0x1b1   : > { %v1704_v56 = vpop.f32.mrb[20].mxu1 }
 0x1b2   : > { %v4974_v47 = vadd.f32 %v1704_v56, %v1392_v46  ;;  %v1706_v58 = vpop.f32.mrb[21].mxu1 }
 0x1b3   : > { %v4976_v0 = vadd.f32 %v1706_v58, %v1394_v24  ;;  %v1708_v42 = vpop.f32.mrb[22].mxu1 }
 0x1b4   : > { %v4978_v63 = vadd.f32 %v1708_v42, %v1396_v55  ;;  %v1710_v35 = vpop.f32.mrb[23].mxu1 }
 0x1b5   : > { %v4980_v17 = vadd.f32 %v1710_v35, %v1398_v39 }
 0x1b9   : > { %v1714_v36 = vpop.f32.mrb[24].mxu1 }
 0x1ba   : > { %v1715_v16 = vadd.f32 %v1714_v36, %v1402_v50  ;;  %v1716_v2 = vpop.f32.mrb[25].mxu1 }
 0x1bb   : > { %v1717_v44 = vadd.f32 %v1716_v2, %v1404_v53  ;;  %v1718_v60 = vpop.f32.mrb[26].mxu1 }
 0x1bc   : > { %v1719_v18 = vadd.f32 %v1718_v60, %v1406_v20  ;;  %v1720_v23 = vpop.f32.mrb[27].mxu1 }
 0x1bd   : > { %v1721_v19 = vadd.f32 %v1720_v23, %v1408_v3 }
 0x1c1   : > { %v1724_v32 = vpop.f32.mrb[28].mxu1 }
 0x1c2   : > { %v1725_v25 = vadd.f32 %v1724_v32, %v1412_v51  ;;  %v1726_v6 = vpop.f32.mrb[29].mxu1 }
 0x1c3   : > { %v1727_v21 = vadd.f32 %v1726_v6, %v1414_v11  ;;  %v1728_v43 = vpop.f32.mrb[30].mxu1 }
 0x1c4   : > { %v1729_v8 = vadd.f32 %v1728_v43, %v1416_v59  ;;  %v1730_v38 = vpop.f32.mrb[31].mxu1 }
 0x1c5   : > { %v1731_v45 = vadd.f32 %v1730_v38, %v1418_v28 }
 0x1c9   : > { %v2353_v9 = vpop.f32.mrb[32].mxu1 }
 0x1ca   : > { %v2355_v40 = vpop.f32.mrb[33].mxu1 }
 0x1cb   : > { %v2357_v29 = vpop.f32.mrb[34].mxu1 }
 0x1cc   : > { %v2359_v31 = vpop.f32.mrb[35].mxu1 }
 0x1d1   : > { %v2363_v27 = vpop.f32.mrb[36].mxu1 }
 0x1d2   : > { %v2365_v46 = vpop.f32.mrb[37].mxu1 }
 0x1d3   : > { %v2367_v49 = vpop.f32.mrb[38].mxu1 }
 0x1d4   : > { %v2369_v24 = vpop.f32.mrb[39].mxu1 }
 0x1d6   : > { %v2280_v5 = vpop.f32.mrb[24].mxu0 }
 0x1d7   : > { %v3452_v55 = vadd.f32 %v2280_v5, %v1715_v16  ;;  %v2282_v62 = vpop.f32.mrb[25].mxu0 }
 0x1d8   : > { %v3456_v39 = vadd.f32 %v2282_v62, %v1717_v44  ;;  %v2284_v15 = vpop.f32.mrb[26].mxu0 }
 0x1d9   : > { %v3460_v50 = vadd.f32 %v2284_v15, %v1719_v18  ;;  %v2286_v1 = vpop.f32.mrb[27].mxu0  ;;  %v4988_v53 = vadd.f32 %v3452_v55, %v2353_v9 }
 0x1da   : > { %v3464_v4 = vadd.f32 %v2286_v1, %v1721_v19  ;;  %v4990_v20 = vadd.f32 %v3456_v39, %v2355_v40 }
 0x1db   : > { %2396 = vst [vmem:[%s4986_s12 + $0x40] sm:$0xff] %v4988_v53  ;;  %v4994_v57 = vadd.f32 %v3460_v50, %v2357_v29 }
 0x1dc   : > { %2397 = vst [vmem:[%s4986_s12 + $0x48] sm:$0xff] %v4990_v20  ;;  %v4998_v3 = vadd.f32 %v3464_v4, %v2359_v31 }
 0x1dd   : > { %2398 = vst [vmem:[%s4986_s12 + $0x50] sm:$0xff] %v4994_v57  ;;  %v2440_v5 = vmul.f32 %v4994_v57, %v4994_v57 }
 0x1de   : > { %v2290_v54 = vpop.f32.mrb[28].mxu0  ;;  %2399 = vst [vmem:[%s4986_s12 + $0x58] sm:$0xff] %v4998_v3  ;;  %v2441_v39 = vmul.f32 %v4998_v3, %v4998_v3 }
 0x1df   : > { %v3468_v13 = vadd.f32 %v2290_v54, %v1725_v25  ;;  %v2292_v48 = vpop.f32.mrb[29].mxu0 }
 0x1e0   : > { %v3472_v26 = vadd.f32 %v2292_v48, %v1727_v21  ;;  %v2294_v37 = vpop.f32.mrb[30].mxu0 }
 0x1e1   : > { %v3476_v51 = vadd.f32 %v2294_v37, %v1729_v8  ;;  %v2296_v52 = vpop.f32.mrb[31].mxu0  ;;  %v5004_v11 = vadd.f32 %v3468_v13, %v2363_v27  ;;  %v2438_v27 = vmul.f32 %v4988_v53, %v4988_v53 }
 0x1e2   : > { %v3480_v12 = vadd.f32 %v2296_v52, %v1731_v45  ;;  %v5006_v59 = vadd.f32 %v3472_v26, %v2365_v46 }
 0x1e3   : > { %2400 = vst [vmem:[%s4986_s12 + $0x60] sm:$0xff] %v5004_v11  ;;  %v5010_v61 = vadd.f32 %v3476_v51, %v2367_v49  ;;  %v2439_v49 = vmul.f32 %v4990_v20, %v4990_v20  ;;  %v2442_v1 = vmul.f32 %v5004_v11, %v5004_v11 }
 0x1e4   : > { %2401 = vst [vmem:[%s4986_s12 + $0x68] sm:$0xff] %v5006_v59  ;;  %v5014_v28 = vadd.f32 %v3480_v12, %v2369_v24 }
 0x1e5   : > { %2402 = vst [vmem:[%s4986_s12 + $0x70] sm:$0xff] %v5010_v61 }
 0x1e6   : > { %v2333_v34 = vpop.f32.mrb[16].mxu0  ;;  %2403 = vst [vmem:[%s4986_s12 + $0x78] sm:$0xff] %v5014_v28 }
 0x1e7   : > { %v3428_v22 = vadd.f32 %v2333_v34, %v4966_v14  ;;  %v2335_v30 = vpop.f32.mrb[17].mxu0 }
 0x1e8   : > { %v3431_v41 = vadd.f32 %v2335_v30, %v4968_v7  ;;  %v2337_v56 = vpop.f32.mrb[18].mxu0 }
 0x1e9   : > { %2388 = vst [vmem:[%s4986_s12] sm:$0xff] %v3428_v22  ;;  %v3434_v58 = vadd.f32 %v2337_v56, %v4970_v33  ;;  %v2339_v42 = vpop.f32.mrb[19].mxu0  ;;  %v2430_v36 = vmul.f32 %v3428_v22, %v3428_v22 }
 0x1ea   : > { %2389 = vst [vmem:[%s4986_s12 + $0x8] sm:$0xff] %v3431_v41  ;;  %v3437_v35 = vadd.f32 %v2339_v42, %v4972_v10  ;;  %v2431_v44 = vmul.f32 %v3431_v41, %v3431_v41 }
 0x1eb   : > { %2390 = vst [vmem:[%s4986_s12 + $0x10] sm:$0xff] %v3434_v58  ;;  %v2404_v16 = vadd.f32 %v3434_v58, %v3428_v22  ;;  %v2432_v2 = vmul.f32 %v3434_v58, %v3434_v58 }
 0x1ec   : > { %2391 = vst [vmem:[%s4986_s12 + $0x18] sm:$0xff] %v3437_v35  ;;  %v2417_v14 = vadd.f32 %v3437_v35, %v3431_v41  ;;  %v2433_v60 = vmul.f32 %v3437_v35, %v3437_v35 }
 0x1ed   : > { %v2446_v18 = vadd.f32 %v2432_v2, %v2430_v36 }
 0x1ee   : > { %v2459_v7 = vadd.f32 %v2433_v60, %v2431_v44  ;;  %v2343_v23 = vpop.f32.mrb[20].mxu0 }
 0x1ef   : > { %v3440_v33 = vadd.f32 %v2343_v23, %v4974_v47  ;;  %v2345_v19 = vpop.f32.mrb[21].mxu0 }
 0x1f0   : > { %v3443_v32 = vadd.f32 %v2345_v19, %v4976_v0  ;;  %v2347_v10 = vpop.f32.mrb[22].mxu0 }
 0x1f1   : > { %2392 = vst [vmem:[%s4986_s12 + $0x20] sm:$0xff] %v3440_v33  ;;  %v2405_v25 = vadd.f32 %v3440_v33, %v2404_v16  ;;  %v2434_v6 = vmul.f32 %v3440_v33, %v3440_v33  ;;  %v3446_v21 = vadd.f32 %v2347_v10, %v4978_v63  ;;  %v2349_v43 = vpop.f32.mrb[23].mxu0 }
 0x1f2   : > { %2393 = vst [vmem:[%s4986_s12 + $0x28] sm:$0xff] %v3443_v32  ;;  %v2418_v8 = vadd.f32 %v3443_v32, %v2417_v14  ;;  %v2435_v38 = vmul.f32 %v3443_v32, %v3443_v32  ;;  %v3449_v45 = vadd.f32 %v2349_v43, %v4980_v17 }
 0x1f3   : > { %v2447_v9 = vadd.f32 %v2446_v18, %v2434_v6  ;;  %2394 = vst [vmem:[%s4986_s12 + $0x30] sm:$0xff] %v3446_v21  ;;  %v2406_v40 = vadd.f32 %v3446_v21, %v2405_v25  ;;  %v2436_v47 = vmul.f32 %v3446_v21, %v3446_v21 }
 0x1f4   : > { %v2460_v29 = vadd.f32 %v2459_v7, %v2435_v38  ;;  %2395 = vst [vmem:[%s4986_s12 + $0x38] sm:$0xff] %v3449_v45  ;;  %v2419_v0 = vadd.f32 %v3449_v45, %v2418_v8  ;;  %v2437_v31 = vmul.f32 %v3449_v45, %v3449_v45 }
 0x1f5   : > { %v2407_v46 = vadd.f32 %v4988_v53, %v2406_v40  ;;  %v2448_v63 = vadd.f32 %v2447_v9, %v2436_v47 }
 0x1f6   : > { %v2420_v24 = vadd.f32 %v4990_v20, %v2419_v0  ;;  %v2461_v17 = vadd.f32 %v2460_v29, %v2437_v31  ;;  %v2443_v20 = vmul.f32 %v5006_v59, %v5006_v59 }
 0x1f7   : > { %v2408_v55 = vadd.f32 %v4994_v57, %v2407_v46  ;;  %v2449_v62 = vadd.f32 %v2448_v63, %v2438_v27  ;;  %v2444_v57 = vmul.f32 %v5010_v61, %v5010_v61 }
 0x1f8   : > { %v2421_v15 = vadd.f32 %v4998_v3, %v2420_v24  ;;  %v2462_v50 = vadd.f32 %v2461_v17, %v2439_v49  ;;  %v2445_v3 = vmul.f32 %v5014_v28, %v5014_v28 }
 0x1f9   : > { %v2409_v53 = vadd.f32 %v5004_v11, %v2408_v55  ;;  %v2450_v4 = vadd.f32 %v2449_v62, %v2440_v5 }
 0x1fa   : > { %v2422_v54 = vadd.f32 %v5006_v59, %v2421_v15  ;;  %v2463_v13 = vadd.f32 %v2462_v50, %v2441_v39 }
 0x1fb   : > { %v2410_v48 = vadd.f32 %v5010_v61, %v2409_v53  ;;  %v2451_v26 = vadd.f32 %v2450_v4, %v2442_v1 }
 0x1fc   : > { %v2423_v37 = vadd.f32 %v5014_v28, %v2422_v54  ;;  %v2464_v51 = vadd.f32 %v2463_v13, %v2443_v20 }
 0x1fd   : > { %v2411_v52 = vrot.slane %v2410_v48, 4  ;;  %v2452_v11 = vadd.f32 %v2451_v26, %v2444_v57 }
 0x1fe   : > { %v2424_v12 = vrot.slane %v2423_v37, 4  ;;  %v2465_v34 = vadd.f32 %v2464_v51, %v2445_v3 }
 0x1ff   : > { %v2412_v22 = vadd.f32 %v2411_v52, %v2410_v48  ;;  %v2453_v30 = vrot.slane %v2452_v11, 4 }
 0x200   : > { %v2425_v59 = vadd.f32 %v2424_v12, %v2423_v37  ;;  %v2466_v41 = vrot.slane %v2465_v34, 4 }
 0x201   : > { %v2413_v56 = vrot.slane %v2412_v22, 2  ;;  %v2454_v58 = vadd.f32 %v2453_v30, %v2452_v11 }
 0x202   : > { %v2426_v42 = vrot.slane %v2425_v59, 2  ;;  %v2467_v61 = vadd.f32 %v2466_v41, %v2465_v34 }
 0x203   : > { %v2414_v35 = vadd.f32 %v2413_v56, %v2412_v22  ;;  %v2455_v36 = vrot.slane %v2454_v58, 2 }
 0x204   : > { %v2427_v16 = vadd.f32 %v2426_v42, %v2425_v59  ;;  %v2468_v2 = vrot.slane %v2467_v61, 2 }
 0x205   : > { %v2415_v44 = vrot.slane %v2414_v35, 1  ;;  %v2456_v28 = vadd.f32 %v2455_v36, %v2454_v58 }
 0x206   : > { %v2428_v14 = vrot.slane %v2427_v16, 1  ;;  %v2469_v60 = vadd.f32 %v2468_v2, %v2467_v61 }
 0x207   : > { %v2457_v18 = vrot.slane %v2456_v28, 1  ;;  %v2416_v23 = vadd.f32 %v2415_v44, %v2414_v35 }
 0x208   : > { %v2470_v7 = vrot.slane %v2469_v60, 1  ;;  %v2429_v19 = vadd.f32 %v2428_v14, %v2427_v16 }
 0x209   : > { %v2458_v33 = vadd.f32 %v2457_v18, %v2456_v28 }
 0x20a   : > { %v2471_v32 = vadd.f32 %v2470_v7, %v2469_v60 }
 0x20b   : > { %v2473_v10 = vsel %vm492_vm2, %v2416_v23, %v2458_v33 }
 0x20c   : > { %v2474_v25 = vsel %vm492_vm2, %v2429_v19, %v2471_v32 }
 0x20d   : > { %v2477_v6 = vcombine.low %v2473_v10, %v2474_v25 }
 0x20f   : > { %3391 = vst.sshfl [vmem:[%s432_s28] sm:$0x33 pattern:$0x76325410] %v2477_v6 }
 0x210 PF: > { %s22_s17 = sadd.s32 1, %s3788_s17  }
 0x211   : > { %p19_p4 = scmp.ge.s32.totalorder %s22_s17, 4  }
 0x213   :  { %21 = sbr.rel (!%p19_p4) target bundleno = 1 (0x1), region = 128 }

</bundles_post_ra>
